<compile_context>
chip_gen: v6e
topology: v6e:2x2x1
jax: 0.10.0
libtpu: 0.0.40
codegen_flags: <defaults>
</compile_context>

<pallas_src>
import jax
import jax.numpy as jnp
from jax import lax
from jax.experimental import pallas as pl
from jax.experimental.pallas import tpu as pltpu

# ----------------------------- tiny Qwen2-ish config -----------------------------
VOCAB = 128
HIDDEN = 32
N_LAYERS = 2
N_HEADS = 4
N_KV_HEADS = 2
HEAD_DIM = HIDDEN // N_HEADS          # 8
INTERMEDIATE = 64
RMS_EPS = 1e-6
ROPE_THETA = 10000.0
DTYPE = jnp.bfloat16                  # matches torch_dtype=torch.bfloat16

BATCH = 2
SEQ = 8


# ----------------------------- fused whole-model Pallas kernel -----------------------------
def _dse_model_kernel(h_ref, cos_ref, sin_ref,
                      ln1_ref, wqkv_ref, bqkv_ref, wo_ref,
                      ln2_ref, wgu_ref, wd_ref, fln_ref,
                      o_ref):
    """Runs the full decoder stack + pooling with everything VMEM-resident.

    Shapes (toy config):
      h_ref    (B*S, D)        bf16   residual stream (flat, lanes = hidden)
      cos/sin  (S, hd)         f32    RoPE tables
      ln1/ln2  (L, 1, D)       bf16
      wqkv     (L, D, D+2*KVD) bf16   fused q|k|v projection
      bqkv     (L, 1, D+2*KVD) bf16
      wo       (L, D, D)       bf16   (Qwen2 o_proj has no bias)
      wgu      (L, D, 2*F)     bf16   fused gate|up projection (lane-dense 128)
      wd       (L, F, D)       bf16
      fln      (1, D)          bf16   final RMSNorm weight
      o_ref    (B, D)          bf16   pooled, L2-normalized reps
    """
    bs, d = h_ref.shape
    s_len, hd = cos_ref.shape
    b = bs // s_len
    kvd = N_KV_HEADS * hd
    rep = N_HEADS // N_KV_HEADS
    f = wgu_ref.shape[2] // 2
    scale = 1.0 / float(hd) ** 0.5

    h = h_ref[...]                                   # (B*S, D) bf16 residual stream
    cos_b = cos_ref[...][None]                       # (1, S, hd) f32
    sin_b = sin_ref[...][None]

    # Causal additive mask, hoisted once for all layers / heads.
    row = lax.broadcasted_iota(jnp.int32, (b, s_len, s_len), 1)
    col = lax.broadcasted_iota(jnp.int32, (b, s_len, s_len), 2)
    neg_mask = jnp.where(col <= row, 0.0, -1e30).astype(jnp.float32)

    def rmsnorm_f32(x_bf16, w_row):
        xf = x_bf16.astype(jnp.float32)
        var = jnp.mean(xf * xf, axis=-1, keepdims=True)
        return xf * lax.rsqrt(var + RMS_EPS) * w_row.astype(jnp.float32)

    def rope(x_f32):
        # rotate-half RoPE on (B, S, hd) in f32
        h2 = hd // 2
        rot = jnp.concatenate([-x_f32[..., h2:], x_f32[..., :h2]], axis=-1)
        return x_f32 * cos_b + rot * sin_b

    for l in range(N_LAYERS):                        # static unroll (N_LAYERS = 2)
        # ---------------- attention block ----------------
        x = rmsnorm_f32(h, ln1_ref[l]).astype(DTYPE)                       # (B*S, D) bf16
        # Fused QKV: one bf16 MXU dot, f32 accumulate.
        qkv = jnp.dot(x, wqkv_ref[l], preferred_element_type=jnp.float32)
        qkv = qkv + bqkv_ref[l].astype(jnp.float32)                        # (B*S, D+2*KVD) f32

        # GQA: rotate each kv head once, shared across `rep` query heads
        # (no jnp.repeat, no HBM duplication, no transposes).
        ks, vs = [], []
        for hk in range(N_KV_HEADS):
            k_h = qkv[:, d + hk * hd: d + (hk + 1) * hd].reshape(b, s_len, hd)
            v_h = qkv[:, d + kvd + hk * hd: d + kvd + (hk + 1) * hd].reshape(b, s_len, hd)
            ks.append(rope(k_h).astype(DTYPE))
            vs.append(v_h.astype(DTYPE))

        # O-projection folded into the head loop:  attn_out @ Wo == sum_h ctx_h @ Wo[h*hd:(h+1)*hd]
        attn_acc = jnp.zeros((bs, d), jnp.float32)
        wo_l = wo_ref[l]                                                    # (D, D) bf16
        for hq in range(N_HEADS):
            q_h = qkv[:, hq * hd:(hq + 1) * hd].reshape(b, s_len, hd)
            q_h = (rope(q_h) * scale).astype(DTYPE)
            k_h = ks[hq // rep]
            v_h = vs[hq // rep]
            # Batched over the batch dim; bf16 operands, f32 accumulation on MXU.
            s = jnp.einsum('bqd,bkd->bqk', q_h, k_h,
                           preferred_element_type=jnp.float32)              # (B, S, S) f32
            s = s + neg_mask
            m = jnp.max(s, axis=-1, keepdims=True)
            p = jnp.exp(s - m)
            denom = jnp.sum(p, axis=-1, keepdims=True)
            p = (p * pl.reciprocal(denom, approx=True)).astype(DTYPE)       # EUP reciprocal
            ctx = jnp.einsum('bqk,bkd->bqd', p, v_h,
                             preferred_element_type=jnp.float32)            # (B, S, hd) f32
            ctx2 = ctx.reshape(bs, hd).astype(DTYPE)
            attn_acc = attn_acc + jnp.dot(ctx2, wo_l[hq * hd:(hq + 1) * hd, :],
                                          preferred_element_type=jnp.float32)
        h = h + attn_acc.astype(DTYPE)                                      # residual (bf16)

        # ---------------- SwiGLU MLP block ----------------
        x = rmsnorm_f32(h, ln2_ref[l]).astype(DTYPE)
        gu = jnp.dot(x, wgu_ref[l], preferred_element_type=jnp.float32)     # (B*S, 2F) f32
        g = gu[:, :f]
        u = gu[:, f:]
        act = ((g * jax.nn.sigmoid(g)) * u).astype(DTYPE)                   # silu(g) * u, f32 math
        mo = jnp.dot(act, wd_ref[l], preferred_element_type=jnp.float32)
        h = h + mo.astype(DTYPE)                                            # residual (bf16)

    # ---------------- pooling: last token -> final RMSNorm -> L2 normalize ----------------
    last = h.reshape(b, s_len, d)[:, s_len - 1, :]                          # (B, D) bf16
    y = rmsnorm_f32(last, fln_ref[...])                                     # (B, D) f32
    nrm = jnp.sqrt(jnp.sum(y * y, axis=-1, keepdims=True))
    o_ref[...] = (y / jnp.maximum(nrm, 1e-12)).astype(o_ref.dtype)


def _full_spec(a):
    nd = a.ndim
    return pl.BlockSpec(a.shape, lambda i, _nd=nd: (0,) * _nd)


def dse_qwen2_forward(params, input_ids):
    """Equivalent of DseQwen2.forward: run encoder, pool last hidden state, L2-normalize."""
    B, S = input_ids.shape
    # (cache_position quirk of the reference — arange over batch — only affects
    # KV-cache plumbing, which has no effect on a full-sequence forward pass.)
    h0 = jnp.take(params["embed"], input_ids, axis=0).reshape(B * S, HIDDEN)   # embedding gather (JAX)
    cos, sin = rope_cos_sin(S, HEAD_DIM, ROPE_THETA)                           # f32 (S, hd)

    args = (h0, cos, sin,
            params["ln1"], params["wqkv"], params["bqkv"], params["wo"],
            params["ln2"], params["wgu"], params["wd"], params["final_ln"])

    reps = pl.pallas_call(
        _dse_model_kernel,
        out_shape=jax.ShapeDtypeStruct((B, HIDDEN), DTYPE),
        grid=(1,),
        in_specs=[_full_spec(a) for a in args],
        out_specs=pl.BlockSpec((B, HIDDEN), lambda i: (0, 0)),
    )(*args)
    return reps                                                                # (B, D) bfloat16


# ----------------------------- JAX glue (RoPE tables, params) -----------------------------
def rope_cos_sin(seq_len, head_dim, theta):
    inv_freq = 1.0 / (theta ** (jnp.arange(0, head_dim, 2, dtype=jnp.float32) / head_dim))
    pos = jnp.arange(seq_len, dtype=jnp.float32)
    freqs = jnp.outer(pos, inv_freq)                          # (S, hd/2)
    emb = jnp.concatenate([freqs, freqs], axis=-1)            # (S, hd)
    return jnp.cos(emb), jnp.sin(emb)


def init_params(key):
    """Deterministic synthetic weights, pre-fused for the Pallas kernel:
    wqkv = [wq | wk | wv], wgu = [w_gate | w_up], all stacked over layers."""
    keys = jax.random.split(key, 2 + N_LAYERS)
    s = 0.02
    embed = (jax.random.normal(keys[0], (VOCAB, HIDDEN)) * s).astype(DTYPE)

    ln1s, ln2s, wqkvs, bqkvs, wos, wgus, wds = [], [], [], [], [], [], []
    for l in range(N_LAYERS):
        k = jax.random.split(keys[2 + l], 10)
        wq = jax.random.normal(k[0], (HIDDEN, N_HEADS * HEAD_DIM)) * s
        bq = jax.random.normal(k[1], (1, N_HEADS * HEAD_DIM)) * s
        wk = jax.random.normal(k[2], (HIDDEN, N_KV_HEADS * HEAD_DIM)) * s
        bk = jax.random.normal(k[3], (1, N_KV_HEADS * HEAD_DIM)) * s
        wv = jax.random.normal(k[4], (HIDDEN, N_KV_HEADS * HEAD_DIM)) * s
        bv = jax.random.normal(k[5], (1, N_KV_HEADS * HEAD_DIM)) * s
        wo = jax.random.normal(k[6], (HIDDEN, HIDDEN)) * s                 # o_proj (no bias in Qwen2)
        wg = jax.random.normal(k[7], (HIDDEN, INTERMEDIATE)) * s
        wu = jax.random.normal(k[8], (HIDDEN, INTERMEDIATE)) * s
        wd = jax.random.normal(k[9], (INTERMEDIATE, HIDDEN)) * s
        wqkvs.append(jnp.concatenate([wq, wk, wv], axis=1))
        bqkvs.append(jnp.concatenate([bq, bk, bv], axis=1))
        wos.append(wo)
        wgus.append(jnp.concatenate([wg, wu], axis=1))
        wds.append(wd)
        ln1s.append(jnp.ones((1, HIDDEN)))
        ln2s.append(jnp.ones((1, HIDDEN)))

    return {
        "embed": embed,
        "ln1": jnp.stack(ln1s).astype(DTYPE),        # (L, 1, D)
        "wqkv": jnp.stack(wqkvs).astype(DTYPE),      # (L, D, D + 2*KVD)
        "bqkv": jnp.stack(bqkvs).astype(DTYPE),      # (L, 1, D + 2*KVD)
        "wo": jnp.stack(wos).astype(DTYPE),          # (L, D, D)
        "ln2": jnp.stack(ln2s).astype(DTYPE),        # (L, 1, D)
        "wgu": jnp.stack(wgus).astype(DTYPE),        # (L, D, 2F)  (lane-dense: 128)
        "wd": jnp.stack(wds).astype(DTYPE),          # (L, F, D)
        "final_ln": jnp.ones((1, HIDDEN), DTYPE),
    }


if __name__ == "__main__":
    key = jax.random.PRNGKey(0)
    pkey, ikey = jax.random.split(key)
    params = init_params(pkey)
    input_ids = jax.random.randint(ikey, (BATCH, SEQ), 0, VOCAB, dtype=jnp.int32)

    reps = dse_qwen2_forward(params, input_ids)
    reps = jax.block_until_ready(reps)

    assert reps.shape == (BATCH, HIDDEN) and reps.dtype == DTYPE
    norms = jnp.linalg.norm(reps.astype(jnp.float32), axis=-1)
    assert bool(jnp.all(jnp.isfinite(reps.astype(jnp.float32))))
    assert bool(jnp.all(jnp.abs(norms - 1.0) < 2e-2)), norms
    print("KERNEL_OK")
</pallas_src>

<mosaic_0001>
module attributes {stable_mosaic.version = 11 : i64} {
  func.func @_dse_model_kernel(%arg0: i32, %arg1: memref<16x32xbf16, #tpu.memory_space<vmem>>, %arg2: memref<8x8xf32, #tpu.memory_space<vmem>>, %arg3: memref<8x8xf32, #tpu.memory_space<vmem>>, %arg4: memref<2x1x32xbf16, #tpu.memory_space<vmem>>, %arg5: memref<2x32x64xbf16, #tpu.memory_space<vmem>>, %arg6: memref<2x1x64xbf16, #tpu.memory_space<vmem>>, %arg7: memref<2x32x32xbf16, #tpu.memory_space<vmem>>, %arg8: memref<2x1x32xbf16, #tpu.memory_space<vmem>>, %arg9: memref<2x32x128xbf16, #tpu.memory_space<vmem>>, %arg10: memref<2x64x32xbf16, #tpu.memory_space<vmem>>, %arg11: memref<1x32xbf16, #tpu.memory_space<vmem>>, %arg12: memref<2x32xbf16, #tpu.memory_space<vmem>>) attributes {dimension_semantics = [#tpu.dimension_semantics<arbitrary>], iteration_bounds = array<i64: 1>, scalar_prefetch = 0 : i64, scratch_operands = 0 : i64, tpu.core_type = #tpu.core_type<tc>, window_params = [{pipeline_mode = #tpu.pipeline_mode<synchronous>, transform_indices = @transform_0, window_bounds = array<i64: 16, 32>}, {pipeline_mode = #tpu.pipeline_mode<synchronous>, transform_indices = @transform_1, window_bounds = array<i64: 8, 8>}, {pipeline_mode = #tpu.pipeline_mode<synchronous>, transform_indices = @transform_2, window_bounds = array<i64: 8, 8>}, {pipeline_mode = #tpu.pipeline_mode<synchronous>, transform_indices = @transform_3, window_bounds = array<i64: 2, 1, 32>}, {pipeline_mode = #tpu.pipeline_mode<synchronous>, transform_indices = @transform_4, window_bounds = array<i64: 2, 32, 64>}, {pipeline_mode = #tpu.pipeline_mode<synchronous>, transform_indices = @transform_5, window_bounds = array<i64: 2, 1, 64>}, {pipeline_mode = #tpu.pipeline_mode<synchronous>, transform_indices = @transform_6, window_bounds = array<i64: 2, 32, 32>}, {pipeline_mode = #tpu.pipeline_mode<synchronous>, transform_indices = @transform_7, window_bounds = array<i64: 2, 1, 32>}, {pipeline_mode = #tpu.pipeline_mode<synchronous>, transform_indices = @transform_8, window_bounds = array<i64: 2, 32, 128>}, {pipeline_mode = #tpu.pipeline_mode<synchronous>, transform_indices = @transform_9, window_bounds = array<i64: 2, 64, 32>}, {pipeline_mode = #tpu.pipeline_mode<synchronous>, transform_indices = @transform_10, window_bounds = array<i64: 1, 32>}, {pipeline_mode = #tpu.pipeline_mode<synchronous>, transform_indices = @transform_11, window_bounds = array<i64: 2, 32>}]} {
    %c0 = arith.constant 0 : index
    %c0_0 = arith.constant 0 : index
    %0 = vector.load %arg1[%c0, %c0_0] : memref<16x32xbf16, #tpu.memory_space<vmem>>, vector<16x32xbf16>
    %c0_1 = arith.constant 0 : index
    %c0_2 = arith.constant 0 : index
    %1 = vector.load %arg2[%c0_1, %c0_2] : memref<8x8xf32, #tpu.memory_space<vmem>>, vector<8x8xf32>
    %2 = vector.shape_cast %1 : vector<8x8xf32> to vector<1x8x8xf32>
    %c0_3 = arith.constant 0 : index
    %c0_4 = arith.constant 0 : index
    %3 = vector.load %arg3[%c0_3, %c0_4] : memref<8x8xf32, #tpu.memory_space<vmem>>, vector<8x8xf32>
    %4 = vector.shape_cast %3 : vector<8x8xf32> to vector<1x8x8xf32>
    %5 = tpu.iota {dimensions = array<i32: 1>} : vector<2x8x8xi32>
    %6 = tpu.iota {dimensions = array<i32: 2>} : vector<2x8x8xi32>
    %7 = arith.cmpi sle, %6, %5 : vector<2x8x8xi32>
    %cst = arith.constant 0.000000e+00 : f32
    %cst_5 = arith.constant -1.000000e+30 : f32
    %8 = vector.broadcast %cst : f32 to vector<2x8x8xf32>
    %9 = vector.broadcast %cst_5 : f32 to vector<2x8x8xf32>
    %10 = arith.select %7, %8, %9 : vector<2x8x8xi1>, vector<2x8x8xf32>
    %c0_6 = arith.constant 0 : index
    %c0_7 = arith.constant 0 : index
    %c0_8 = arith.constant 0 : index
    %11 = vector.load %arg4[%c0_6, %c0_7, %c0_8] : memref<2x1x32xbf16, #tpu.memory_space<vmem>>, vector<1x1x32xbf16>
    %12 = vector.shape_cast %11 : vector<1x1x32xbf16> to vector<1x32xbf16>
    %13 = arith.extf %0 : vector<16x32xbf16> to vector<16x32xf32>
    %14 = arith.mulf %13, %13 : vector<16x32xf32>
    %cst_9 = arith.constant dense<0.000000e+00> : vector<16xf32>
    %15 = vector.multi_reduction <add>, %14, %cst_9 [1] : vector<16x32xf32> to vector<16xf32>
    %16 = vector.shape_cast %15 : vector<16xf32> to vector<16x1xf32>
    %cst_10 = arith.constant 3.200000e+01 : f32
    %17 = vector.broadcast %cst_10 : f32 to vector<16x1xf32>
    %18 = arith.divf %16, %17 : vector<16x1xf32>
    %cst_11 = arith.constant 9.99999997E-7 : f32
    %19 = vector.broadcast %cst_11 : f32 to vector<16x1xf32>
    %20 = arith.addf %18, %19 : vector<16x1xf32>
    %21 = math.rsqrt %20 : vector<16x1xf32>
    %22 = vector.broadcast %21 : vector<16x1xf32> to vector<16x32xf32>
    %23 = arith.mulf %13, %22 : vector<16x32xf32>
    %24 = arith.extf %12 : vector<1x32xbf16> to vector<1x32xf32>
    %25 = vector.broadcast %24 : vector<1x32xf32> to vector<16x32xf32>
    %26 = arith.mulf %23, %25 : vector<16x32xf32>
    %27 = arith.truncf %26 : vector<16x32xf32> to vector<16x32xbf16>
    %c0_12 = arith.constant 0 : index
    %c0_13 = arith.constant 0 : index
    %c0_14 = arith.constant 0 : index
    %28 = vector.load %arg5[%c0_12, %c0_13, %c0_14] : memref<2x32x64xbf16, #tpu.memory_space<vmem>>, vector<1x32x64xbf16>
    %29 = vector.shape_cast %28 : vector<1x32x64xbf16> to vector<32x64xbf16>
    %cst_15 = arith.constant dense<0.000000e+00> : vector<16x64xf32>
    %30 = tpu.matmul %27, %29, %cst_15 {dimension_numbers = #tpu.dot_dimension_numbers<[1], [0], [0], [1], [0, 0, 1, 1], [], []>} : vector<16x32xbf16>, vector<32x64xbf16>, vector<16x64xf32> -> vector<16x64xf32>
    %c0_16 = arith.constant 0 : index
    %c0_17 = arith.constant 0 : index
    %c0_18 = arith.constant 0 : index
    %31 = vector.load %arg6[%c0_16, %c0_17, %c0_18] : memref<2x1x64xbf16, #tpu.memory_space<vmem>>, vector<1x1x64xbf16>
    %32 = vector.shape_cast %31 : vector<1x1x64xbf16> to vector<1x64xbf16>
    %33 = arith.extf %32 : vector<1x64xbf16> to vector<1x64xf32>
    %34 = vector.broadcast %33 : vector<1x64xf32> to vector<16x64xf32>
    %35 = arith.addf %30, %34 : vector<16x64xf32>
    %36 = vector.extract_strided_slice %35 {offsets = [0, 32], sizes = [16, 8], strides = [1, 1]} : vector<16x64xf32> to vector<16x8xf32>
    %37 = vector.shape_cast %36 : vector<16x8xf32> to vector<2x8x8xf32>
    %38 = vector.extract_strided_slice %35 {offsets = [0, 48], sizes = [16, 8], strides = [1, 1]} : vector<16x64xf32> to vector<16x8xf32>
    %39 = vector.shape_cast %38 : vector<16x8xf32> to vector<2x8x8xf32>
    %40 = vector.extract_strided_slice %37 {offsets = [0, 0, 4], sizes = [2, 8, 4], strides = [1, 1, 1]} : vector<2x8x8xf32> to vector<2x8x4xf32>
    %cst_19 = arith.constant 0.000000e+00 : f32
    %41 = vector.broadcast %cst_19 : f32 to vector<2x8x4xf32>
    %42 = arith.subf %41, %40 : vector<2x8x4xf32>
    %43 = vector.extract_strided_slice %37 {offsets = [0, 0, 0], sizes = [2, 8, 4], strides = [1, 1, 1]} : vector<2x8x8xf32> to vector<2x8x4xf32>
    %44 = tpu.concatenate %42, %43 in 2 : vector<2x8x4xf32>, vector<2x8x4xf32> -> vector<2x8x8xf32>
    %45 = vector.broadcast %2 : vector<1x8x8xf32> to vector<2x8x8xf32>
    %46 = arith.mulf %37, %45 : vector<2x8x8xf32>
    %47 = vector.broadcast %4 : vector<1x8x8xf32> to vector<2x8x8xf32>
    %48 = arith.mulf %44, %47 : vector<2x8x8xf32>
    %49 = arith.addf %46, %48 : vector<2x8x8xf32>
    %50 = arith.truncf %49 : vector<2x8x8xf32> to vector<2x8x8xbf16>
    %51 = arith.truncf %39 : vector<2x8x8xf32> to vector<2x8x8xbf16>
    %52 = vector.extract_strided_slice %35 {offsets = [0, 40], sizes = [16, 8], strides = [1, 1]} : vector<16x64xf32> to vector<16x8xf32>
    %53 = vector.shape_cast %52 : vector<16x8xf32> to vector<2x8x8xf32>
    %54 = vector.extract_strided_slice %35 {offsets = [0, 56], sizes = [16, 8], strides = [1, 1]} : vector<16x64xf32> to vector<16x8xf32>
    %55 = vector.shape_cast %54 : vector<16x8xf32> to vector<2x8x8xf32>
    %56 = vector.extract_strided_slice %53 {offsets = [0, 0, 4], sizes = [2, 8, 4], strides = [1, 1, 1]} : vector<2x8x8xf32> to vector<2x8x4xf32>
    %cst_20 = arith.constant 0.000000e+00 : f32
    %57 = vector.broadcast %cst_20 : f32 to vector<2x8x4xf32>
    %58 = arith.subf %57, %56 : vector<2x8x4xf32>
    %59 = vector.extract_strided_slice %53 {offsets = [0, 0, 0], sizes = [2, 8, 4], strides = [1, 1, 1]} : vector<2x8x8xf32> to vector<2x8x4xf32>
    %60 = tpu.concatenate %58, %59 in 2 : vector<2x8x4xf32>, vector<2x8x4xf32> -> vector<2x8x8xf32>
    %61 = vector.broadcast %2 : vector<1x8x8xf32> to vector<2x8x8xf32>
    %62 = arith.mulf %53, %61 : vector<2x8x8xf32>
    %63 = vector.broadcast %4 : vector<1x8x8xf32> to vector<2x8x8xf32>
    %64 = arith.mulf %60, %63 : vector<2x8x8xf32>
    %65 = arith.addf %62, %64 : vector<2x8x8xf32>
    %66 = arith.truncf %65 : vector<2x8x8xf32> to vector<2x8x8xbf16>
    %67 = arith.truncf %55 : vector<2x8x8xf32> to vector<2x8x8xbf16>
    %cst_21 = arith.constant 0.000000e+00 : f32
    %68 = vector.broadcast %cst_21 : f32 to vector<16x32xf32>
    %c0_22 = arith.constant 0 : index
    %c0_23 = arith.constant 0 : index
    %c0_24 = arith.constant 0 : index
    %69 = vector.load %arg7[%c0_22, %c0_23, %c0_24] : memref<2x32x32xbf16, #tpu.memory_space<vmem>>, vector<1x32x32xbf16>
    %70 = vector.shape_cast %69 : vector<1x32x32xbf16> to vector<32x32xbf16>
    %71 = vector.extract_strided_slice %35 {offsets = [0, 0], sizes = [16, 8], strides = [1, 1]} : vector<16x64xf32> to vector<16x8xf32>
    %72 = vector.shape_cast %71 : vector<16x8xf32> to vector<2x8x8xf32>
    %73 = vector.extract_strided_slice %72 {offsets = [0, 0, 4], sizes = [2, 8, 4], strides = [1, 1, 1]} : vector<2x8x8xf32> to vector<2x8x4xf32>
    %cst_25 = arith.constant 0.000000e+00 : f32
    %74 = vector.broadcast %cst_25 : f32 to vector<2x8x4xf32>
    %75 = arith.subf %74, %73 : vector<2x8x4xf32>
    %76 = vector.extract_strided_slice %72 {offsets = [0, 0, 0], sizes = [2, 8, 4], strides = [1, 1, 1]} : vector<2x8x8xf32> to vector<2x8x4xf32>
    %77 = tpu.concatenate %75, %76 in 2 : vector<2x8x4xf32>, vector<2x8x4xf32> -> vector<2x8x8xf32>
    %78 = vector.broadcast %2 : vector<1x8x8xf32> to vector<2x8x8xf32>
    %79 = arith.mulf %72, %78 : vector<2x8x8xf32>
    %80 = vector.broadcast %4 : vector<1x8x8xf32> to vector<2x8x8xf32>
    %81 = arith.mulf %77, %80 : vector<2x8x8xf32>
    %82 = arith.addf %79, %81 : vector<2x8x8xf32>
    %cst_26 = arith.constant 0.353553385 : f32
    %83 = vector.broadcast %cst_26 : f32 to vector<2x8x8xf32>
    %84 = arith.mulf %82, %83 : vector<2x8x8xf32>
    %85 = arith.truncf %84 : vector<2x8x8xf32> to vector<2x8x8xbf16>
    "tpu.trace_start"() <{level = 10 : i32, message = "bqd,bkd->bqk"}> : () -> ()
    %cst_27 = arith.constant dense<0.000000e+00> : vector<2x8x8xf32>
    %86 = tpu.matmul %85, %50, %cst_27 {dimension_numbers = #tpu.dot_dimension_numbers<[2], [2], [1], [1], [0, 0, 0, 1, 1, 1], [0], [0]>} : vector<2x8x8xbf16>, vector<2x8x8xbf16>, vector<2x8x8xf32> -> vector<2x8x8xf32>
    "tpu.trace_stop"() : () -> ()
    %87 = arith.addf %86, %10 : vector<2x8x8xf32>
    %cst_28 = arith.constant dense<0xFF800000> : vector<2x8xf32>
    %88 = vector.multi_reduction <maximumf>, %87, %cst_28 [2] : vector<2x8x8xf32> to vector<2x8xf32>
    %89 = vector.shape_cast %88 : vector<2x8xf32> to vector<2x8x1xf32>
    %90 = vector.broadcast %89 : vector<2x8x1xf32> to vector<2x8x8xf32>
    %91 = arith.subf %87, %90 : vector<2x8x8xf32>
    %92 = math.exp %91 : vector<2x8x8xf32>
    %cst_29 = arith.constant dense<0.000000e+00> : vector<2x8xf32>
    %93 = vector.multi_reduction <add>, %92, %cst_29 [2] : vector<2x8x8xf32> to vector<2x8xf32>
    %94 = vector.shape_cast %93 : vector<2x8xf32> to vector<2x8x1xf32>
    %95 = tpu.reciprocal %94 {approx = true} : vector<2x8x1xf32> -> vector<2x8x1xf32>
    %96 = vector.broadcast %95 : vector<2x8x1xf32> to vector<2x8x8xf32>
    %97 = arith.mulf %92, %96 : vector<2x8x8xf32>
    %98 = arith.truncf %97 : vector<2x8x8xf32> to vector<2x8x8xbf16>
    "tpu.trace_start"() <{level = 10 : i32, message = "bqk,bkd->bqd"}> : () -> ()
    %cst_30 = arith.constant dense<0.000000e+00> : vector<2x8x8xf32>
    %99 = tpu.matmul %98, %51, %cst_30 {dimension_numbers = #tpu.dot_dimension_numbers<[2], [1], [1], [2], [0, 0, 0, 1, 1, 2], [0], [0]>} : vector<2x8x8xbf16>, vector<2x8x8xbf16>, vector<2x8x8xf32> -> vector<2x8x8xf32>
    "tpu.trace_stop"() : () -> ()
    %100 = vector.shape_cast %99 : vector<2x8x8xf32> to vector<16x8xf32>
    %101 = arith.truncf %100 : vector<16x8xf32> to vector<16x8xbf16>
    %102 = vector.extract_strided_slice %70 {offsets = [0, 0], sizes = [8, 32], strides = [1, 1]} : vector<32x32xbf16> to vector<8x32xbf16>
    %cst_31 = arith.constant dense<0.000000e+00> : vector<16x32xf32>
    %103 = tpu.matmul %101, %102, %cst_31 {dimension_numbers = #tpu.dot_dimension_numbers<[1], [0], [0], [1], [0, 0, 1, 1], [], []>} : vector<16x8xbf16>, vector<8x32xbf16>, vector<16x32xf32> -> vector<16x32xf32>
    %104 = arith.addf %68, %103 : vector<16x32xf32>
    %105 = vector.extract_strided_slice %35 {offsets = [0, 8], sizes = [16, 8], strides = [1, 1]} : vector<16x64xf32> to vector<16x8xf32>
    %106 = vector.shape_cast %105 : vector<16x8xf32> to vector<2x8x8xf32>
    %107 = vector.extract_strided_slice %106 {offsets = [0, 0, 4], sizes = [2, 8, 4], strides = [1, 1, 1]} : vector<2x8x8xf32> to vector<2x8x4xf32>
    %cst_32 = arith.constant 0.000000e+00 : f32
    %108 = vector.broadcast %cst_32 : f32 to vector<2x8x4xf32>
    %109 = arith.subf %108, %107 : vector<2x8x4xf32>
    %110 = vector.extract_strided_slice %106 {offsets = [0, 0, 0], sizes = [2, 8, 4], strides = [1, 1, 1]} : vector<2x8x8xf32> to vector<2x8x4xf32>
    %111 = tpu.concatenate %109, %110 in 2 : vector<2x8x4xf32>, vector<2x8x4xf32> -> vector<2x8x8xf32>
    %112 = vector.broadcast %2 : vector<1x8x8xf32> to vector<2x8x8xf32>
    %113 = arith.mulf %106, %112 : vector<2x8x8xf32>
    %114 = vector.broadcast %4 : vector<1x8x8xf32> to vector<2x8x8xf32>
    %115 = arith.mulf %111, %114 : vector<2x8x8xf32>
    %116 = arith.addf %113, %115 : vector<2x8x8xf32>
    %cst_33 = arith.constant 0.353553385 : f32
    %117 = vector.broadcast %cst_33 : f32 to vector<2x8x8xf32>
    %118 = arith.mulf %116, %117 : vector<2x8x8xf32>
    %119 = arith.truncf %118 : vector<2x8x8xf32> to vector<2x8x8xbf16>
    "tpu.trace_start"() <{level = 10 : i32, message = "bqd,bkd->bqk"}> : () -> ()
    %cst_34 = arith.constant dense<0.000000e+00> : vector<2x8x8xf32>
    %120 = tpu.matmul %119, %50, %cst_34 {dimension_numbers = #tpu.dot_dimension_numbers<[2], [2], [1], [1], [0, 0, 0, 1, 1, 1], [0], [0]>} : vector<2x8x8xbf16>, vector<2x8x8xbf16>, vector<2x8x8xf32> -> vector<2x8x8xf32>
    "tpu.trace_stop"() : () -> ()
    %121 = arith.addf %120, %10 : vector<2x8x8xf32>
    %cst_35 = arith.constant dense<0xFF800000> : vector<2x8xf32>
    %122 = vector.multi_reduction <maximumf>, %121, %cst_35 [2] : vector<2x8x8xf32> to vector<2x8xf32>
    %123 = vector.shape_cast %122 : vector<2x8xf32> to vector<2x8x1xf32>
    %124 = vector.broadcast %123 : vector<2x8x1xf32> to vector<2x8x8xf32>
    %125 = arith.subf %121, %124 : vector<2x8x8xf32>
    %126 = math.exp %125 : vector<2x8x8xf32>
    %cst_36 = arith.constant dense<0.000000e+00> : vector<2x8xf32>
    %127 = vector.multi_reduction <add>, %126, %cst_36 [2] : vector<2x8x8xf32> to vector<2x8xf32>
    %128 = vector.shape_cast %127 : vector<2x8xf32> to vector<2x8x1xf32>
    %129 = tpu.reciprocal %128 {approx = true} : vector<2x8x1xf32> -> vector<2x8x1xf32>
    %130 = vector.broadcast %129 : vector<2x8x1xf32> to vector<2x8x8xf32>
    %131 = arith.mulf %126, %130 : vector<2x8x8xf32>
    %132 = arith.truncf %131 : vector<2x8x8xf32> to vector<2x8x8xbf16>
    "tpu.trace_start"() <{level = 10 : i32, message = "bqk,bkd->bqd"}> : () -> ()
    %cst_37 = arith.constant dense<0.000000e+00> : vector<2x8x8xf32>
    %133 = tpu.matmul %132, %51, %cst_37 {dimension_numbers = #tpu.dot_dimension_numbers<[2], [1], [1], [2], [0, 0, 0, 1, 1, 2], [0], [0]>} : vector<2x8x8xbf16>, vector<2x8x8xbf16>, vector<2x8x8xf32> -> vector<2x8x8xf32>
    "tpu.trace_stop"() : () -> ()
    %134 = vector.shape_cast %133 : vector<2x8x8xf32> to vector<16x8xf32>
    %135 = arith.truncf %134 : vector<16x8xf32> to vector<16x8xbf16>
    %136 = vector.extract_strided_slice %70 {offsets = [8, 0], sizes = [8, 32], strides = [1, 1]} : vector<32x32xbf16> to vector<8x32xbf16>
    %cst_38 = arith.constant dense<0.000000e+00> : vector<16x32xf32>
    %137 = tpu.matmul %135, %136, %cst_38 {dimension_numbers = #tpu.dot_dimension_numbers<[1], [0], [0], [1], [0, 0, 1, 1], [], []>} : vector<16x8xbf16>, vector<8x32xbf16>, vector<16x32xf32> -> vector<16x32xf32>
    %138 = arith.addf %104, %137 : vector<16x32xf32>
    %139 = vector.extract_strided_slice %35 {offsets = [0, 16], sizes = [16, 8], strides = [1, 1]} : vector<16x64xf32> to vector<16x8xf32>
    %140 = vector.shape_cast %139 : vector<16x8xf32> to vector<2x8x8xf32>
    %141 = vector.extract_strided_slice %140 {offsets = [0, 0, 4], sizes = [2, 8, 4], strides = [1, 1, 1]} : vector<2x8x8xf32> to vector<2x8x4xf32>
    %cst_39 = arith.constant 0.000000e+00 : f32
    %142 = vector.broadcast %cst_39 : f32 to vector<2x8x4xf32>
    %143 = arith.subf %142, %141 : vector<2x8x4xf32>
    %144 = vector.extract_strided_slice %140 {offsets = [0, 0, 0], sizes = [2, 8, 4], strides = [1, 1, 1]} : vector<2x8x8xf32> to vector<2x8x4xf32>
    %145 = tpu.concatenate %143, %144 in 2 : vector<2x8x4xf32>, vector<2x8x4xf32> -> vector<2x8x8xf32>
    %146 = vector.broadcast %2 : vector<1x8x8xf32> to vector<2x8x8xf32>
    %147 = arith.mulf %140, %146 : vector<2x8x8xf32>
    %148 = vector.broadcast %4 : vector<1x8x8xf32> to vector<2x8x8xf32>
    %149 = arith.mulf %145, %148 : vector<2x8x8xf32>
    %150 = arith.addf %147, %149 : vector<2x8x8xf32>
    %cst_40 = arith.constant 0.353553385 : f32
    %151 = vector.broadcast %cst_40 : f32 to vector<2x8x8xf32>
    %152 = arith.mulf %150, %151 : vector<2x8x8xf32>
    %153 = arith.truncf %152 : vector<2x8x8xf32> to vector<2x8x8xbf16>
    "tpu.trace_start"() <{level = 10 : i32, message = "bqd,bkd->bqk"}> : () -> ()
    %cst_41 = arith.constant dense<0.000000e+00> : vector<2x8x8xf32>
    %154 = tpu.matmul %153, %66, %cst_41 {dimension_numbers = #tpu.dot_dimension_numbers<[2], [2], [1], [1], [0, 0, 0, 1, 1, 1], [0], [0]>} : vector<2x8x8xbf16>, vector<2x8x8xbf16>, vector<2x8x8xf32> -> vector<2x8x8xf32>
    "tpu.trace_stop"() : () -> ()
    %155 = arith.addf %154, %10 : vector<2x8x8xf32>
    %cst_42 = arith.constant dense<0xFF800000> : vector<2x8xf32>
    %156 = vector.multi_reduction <maximumf>, %155, %cst_42 [2] : vector<2x8x8xf32> to vector<2x8xf32>
    %157 = vector.shape_cast %156 : vector<2x8xf32> to vector<2x8x1xf32>
    %158 = vector.broadcast %157 : vector<2x8x1xf32> to vector<2x8x8xf32>
    %159 = arith.subf %155, %158 : vector<2x8x8xf32>
    %160 = math.exp %159 : vector<2x8x8xf32>
    %cst_43 = arith.constant dense<0.000000e+00> : vector<2x8xf32>
    %161 = vector.multi_reduction <add>, %160, %cst_43 [2] : vector<2x8x8xf32> to vector<2x8xf32>
    %162 = vector.shape_cast %161 : vector<2x8xf32> to vector<2x8x1xf32>
    %163 = tpu.reciprocal %162 {approx = true} : vector<2x8x1xf32> -> vector<2x8x1xf32>
    %164 = vector.broadcast %163 : vector<2x8x1xf32> to vector<2x8x8xf32>
    %165 = arith.mulf %160, %164 : vector<2x8x8xf32>
    %166 = arith.truncf %165 : vector<2x8x8xf32> to vector<2x8x8xbf16>
    "tpu.trace_start"() <{level = 10 : i32, message = "bqk,bkd->bqd"}> : () -> ()
    %cst_44 = arith.constant dense<0.000000e+00> : vector<2x8x8xf32>
    %167 = tpu.matmul %166, %67, %cst_44 {dimension_numbers = #tpu.dot_dimension_numbers<[2], [1], [1], [2], [0, 0, 0, 1, 1, 2], [0], [0]>} : vector<2x8x8xbf16>, vector<2x8x8xbf16>, vector<2x8x8xf32> -> vector<2x8x8xf32>
    "tpu.trace_stop"() : () -> ()
    %168 = vector.shape_cast %167 : vector<2x8x8xf32> to vector<16x8xf32>
    %169 = arith.truncf %168 : vector<16x8xf32> to vector<16x8xbf16>
    %170 = vector.extract_strided_slice %70 {offsets = [16, 0], sizes = [8, 32], strides = [1, 1]} : vector<32x32xbf16> to vector<8x32xbf16>
    %cst_45 = arith.constant dense<0.000000e+00> : vector<16x32xf32>
    %171 = tpu.matmul %169, %170, %cst_45 {dimension_numbers = #tpu.dot_dimension_numbers<[1], [0], [0], [1], [0, 0, 1, 1], [], []>} : vector<16x8xbf16>, vector<8x32xbf16>, vector<16x32xf32> -> vector<16x32xf32>
    %172 = arith.addf %138, %171 : vector<16x32xf32>
    %173 = vector.extract_strided_slice %35 {offsets = [0, 24], sizes = [16, 8], strides = [1, 1]} : vector<16x64xf32> to vector<16x8xf32>
    %174 = vector.shape_cast %173 : vector<16x8xf32> to vector<2x8x8xf32>
    %175 = vector.extract_strided_slice %174 {offsets = [0, 0, 4], sizes = [2, 8, 4], strides = [1, 1, 1]} : vector<2x8x8xf32> to vector<2x8x4xf32>
    %cst_46 = arith.constant 0.000000e+00 : f32
    %176 = vector.broadcast %cst_46 : f32 to vector<2x8x4xf32>
    %177 = arith.subf %176, %175 : vector<2x8x4xf32>
    %178 = vector.extract_strided_slice %174 {offsets = [0, 0, 0], sizes = [2, 8, 4], strides = [1, 1, 1]} : vector<2x8x8xf32> to vector<2x8x4xf32>
    %179 = tpu.concatenate %177, %178 in 2 : vector<2x8x4xf32>, vector<2x8x4xf32> -> vector<2x8x8xf32>
    %180 = vector.broadcast %2 : vector<1x8x8xf32> to vector<2x8x8xf32>
    %181 = arith.mulf %174, %180 : vector<2x8x8xf32>
    %182 = vector.broadcast %4 : vector<1x8x8xf32> to vector<2x8x8xf32>
    %183 = arith.mulf %179, %182 : vector<2x8x8xf32>
    %184 = arith.addf %181, %183 : vector<2x8x8xf32>
    %cst_47 = arith.constant 0.353553385 : f32
    %185 = vector.broadcast %cst_47 : f32 to vector<2x8x8xf32>
    %186 = arith.mulf %184, %185 : vector<2x8x8xf32>
    %187 = arith.truncf %186 : vector<2x8x8xf32> to vector<2x8x8xbf16>
    "tpu.trace_start"() <{level = 10 : i32, message = "bqd,bkd->bqk"}> : () -> ()
    %cst_48 = arith.constant dense<0.000000e+00> : vector<2x8x8xf32>
    %188 = tpu.matmul %187, %66, %cst_48 {dimension_numbers = #tpu.dot_dimension_numbers<[2], [2], [1], [1], [0, 0, 0, 1, 1, 1], [0], [0]>} : vector<2x8x8xbf16>, vector<2x8x8xbf16>, vector<2x8x8xf32> -> vector<2x8x8xf32>
    "tpu.trace_stop"() : () -> ()
    %189 = arith.addf %188, %10 : vector<2x8x8xf32>
    %cst_49 = arith.constant dense<0xFF800000> : vector<2x8xf32>
    %190 = vector.multi_reduction <maximumf>, %189, %cst_49 [2] : vector<2x8x8xf32> to vector<2x8xf32>
    %191 = vector.shape_cast %190 : vector<2x8xf32> to vector<2x8x1xf32>
    %192 = vector.broadcast %191 : vector<2x8x1xf32> to vector<2x8x8xf32>
    %193 = arith.subf %189, %192 : vector<2x8x8xf32>
    %194 = math.exp %193 : vector<2x8x8xf32>
    %cst_50 = arith.constant dense<0.000000e+00> : vector<2x8xf32>
    %195 = vector.multi_reduction <add>, %194, %cst_50 [2] : vector<2x8x8xf32> to vector<2x8xf32>
    %196 = vector.shape_cast %195 : vector<2x8xf32> to vector<2x8x1xf32>
    %197 = tpu.reciprocal %196 {approx = true} : vector<2x8x1xf32> -> vector<2x8x1xf32>
    %198 = vector.broadcast %197 : vector<2x8x1xf32> to vector<2x8x8xf32>
    %199 = arith.mulf %194, %198 : vector<2x8x8xf32>
    %200 = arith.truncf %199 : vector<2x8x8xf32> to vector<2x8x8xbf16>
    "tpu.trace_start"() <{level = 10 : i32, message = "bqk,bkd->bqd"}> : () -> ()
    %cst_51 = arith.constant dense<0.000000e+00> : vector<2x8x8xf32>
    %201 = tpu.matmul %200, %67, %cst_51 {dimension_numbers = #tpu.dot_dimension_numbers<[2], [1], [1], [2], [0, 0, 0, 1, 1, 2], [0], [0]>} : vector<2x8x8xbf16>, vector<2x8x8xbf16>, vector<2x8x8xf32> -> vector<2x8x8xf32>
    "tpu.trace_stop"() : () -> ()
    %202 = vector.shape_cast %201 : vector<2x8x8xf32> to vector<16x8xf32>
    %203 = arith.truncf %202 : vector<16x8xf32> to vector<16x8xbf16>
    %204 = vector.extract_strided_slice %70 {offsets = [24, 0], sizes = [8, 32], strides = [1, 1]} : vector<32x32xbf16> to vector<8x32xbf16>
    %cst_52 = arith.constant dense<0.000000e+00> : vector<16x32xf32>
    %205 = tpu.matmul %203, %204, %cst_52 {dimension_numbers = #tpu.dot_dimension_numbers<[1], [0], [0], [1], [0, 0, 1, 1], [], []>} : vector<16x8xbf16>, vector<8x32xbf16>, vector<16x32xf32> -> vector<16x32xf32>
    %206 = arith.addf %172, %205 : vector<16x32xf32>
    %207 = arith.truncf %206 : vector<16x32xf32> to vector<16x32xbf16>
    %208 = arith.addf %0, %207 : vector<16x32xbf16>
    %c0_53 = arith.constant 0 : index
    %c0_54 = arith.constant 0 : index
    %c0_55 = arith.constant 0 : index
    %209 = vector.load %arg8[%c0_53, %c0_54, %c0_55] : memref<2x1x32xbf16, #tpu.memory_space<vmem>>, vector<1x1x32xbf16>
    %210 = vector.shape_cast %209 : vector<1x1x32xbf16> to vector<1x32xbf16>
    %211 = arith.extf %208 : vector<16x32xbf16> to vector<16x32xf32>
    %212 = arith.mulf %211, %211 : vector<16x32xf32>
    %cst_56 = arith.constant dense<0.000000e+00> : vector<16xf32>
    %213 = vector.multi_reduction <add>, %212, %cst_56 [1] : vector<16x32xf32> to vector<16xf32>
    %214 = vector.shape_cast %213 : vector<16xf32> to vector<16x1xf32>
    %cst_57 = arith.constant 3.200000e+01 : f32
    %215 = vector.broadcast %cst_57 : f32 to vector<16x1xf32>
    %216 = arith.divf %214, %215 : vector<16x1xf32>
    %cst_58 = arith.constant 9.99999997E-7 : f32
    %217 = vector.broadcast %cst_58 : f32 to vector<16x1xf32>
    %218 = arith.addf %216, %217 : vector<16x1xf32>
    %219 = math.rsqrt %218 : vector<16x1xf32>
    %220 = vector.broadcast %219 : vector<16x1xf32> to vector<16x32xf32>
    %221 = arith.mulf %211, %220 : vector<16x32xf32>
    %222 = arith.extf %210 : vector<1x32xbf16> to vector<1x32xf32>
    %223 = vector.broadcast %222 : vector<1x32xf32> to vector<16x32xf32>
    %224 = arith.mulf %221, %223 : vector<16x32xf32>
    %225 = arith.truncf %224 : vector<16x32xf32> to vector<16x32xbf16>
    %c0_59 = arith.constant 0 : index
    %c0_60 = arith.constant 0 : index
    %c0_61 = arith.constant 0 : index
    %226 = vector.load %arg9[%c0_59, %c0_60, %c0_61] : memref<2x32x128xbf16, #tpu.memory_space<vmem>>, vector<1x32x128xbf16>
    %227 = vector.shape_cast %226 : vector<1x32x128xbf16> to vector<32x128xbf16>
    %cst_62 = arith.constant dense<0.000000e+00> : vector<16x128xf32>
    %228 = tpu.matmul %225, %227, %cst_62 {dimension_numbers = #tpu.dot_dimension_numbers<[1], [0], [0], [1], [0, 0, 1, 1], [], []>} : vector<16x32xbf16>, vector<32x128xbf16>, vector<16x128xf32> -> vector<16x128xf32>
    %229 = vector.extract_strided_slice %228 {offsets = [0, 0], sizes = [16, 64], strides = [1, 1]} : vector<16x128xf32> to vector<16x64xf32>
    %230 = vector.extract_strided_slice %228 {offsets = [0, 64], sizes = [16, 64], strides = [1, 1]} : vector<16x128xf32> to vector<16x64xf32>
    %231 = arith.negf %229 : vector<16x64xf32>
    %232 = math.exp %231 : vector<16x64xf32>
    %cst_63 = arith.constant 1.000000e+00 : f32
    %233 = vector.broadcast %cst_63 : f32 to vector<16x64xf32>
    %234 = arith.addf %233, %232 : vector<16x64xf32>
    %235 = arith.divf %233, %234 : vector<16x64xf32>
    %236 = arith.mulf %229, %235 : vector<16x64xf32>
    %237 = arith.mulf %236, %230 : vector<16x64xf32>
    %238 = arith.truncf %237 : vector<16x64xf32> to vector<16x64xbf16>
    %c0_64 = arith.constant 0 : index
    %c0_65 = arith.constant 0 : index
    %c0_66 = arith.constant 0 : index
    %239 = vector.load %arg10[%c0_64, %c0_65, %c0_66] : memref<2x64x32xbf16, #tpu.memory_space<vmem>>, vector<1x64x32xbf16>
    %240 = vector.shape_cast %239 : vector<1x64x32xbf16> to vector<64x32xbf16>
    %cst_67 = arith.constant dense<0.000000e+00> : vector<16x32xf32>
    %241 = tpu.matmul %238, %240, %cst_67 {dimension_numbers = #tpu.dot_dimension_numbers<[1], [0], [0], [1], [0, 0, 1, 1], [], []>} : vector<16x64xbf16>, vector<64x32xbf16>, vector<16x32xf32> -> vector<16x32xf32>
    %242 = arith.truncf %241 : vector<16x32xf32> to vector<16x32xbf16>
    %243 = arith.addf %208, %242 : vector<16x32xbf16>
    %c1 = arith.constant 1 : index
    %c0_68 = arith.constant 0 : index
    %c0_69 = arith.constant 0 : index
    %244 = vector.load %arg4[%c1, %c0_68, %c0_69] : memref<2x1x32xbf16, #tpu.memory_space<vmem>>, vector<1x1x32xbf16>
    %245 = vector.shape_cast %244 : vector<1x1x32xbf16> to vector<1x32xbf16>
    %246 = arith.extf %243 : vector<16x32xbf16> to vector<16x32xf32>
    %247 = arith.mulf %246, %246 : vector<16x32xf32>
    %cst_70 = arith.constant dense<0.000000e+00> : vector<16xf32>
    %248 = vector.multi_reduction <add>, %247, %cst_70 [1] : vector<16x32xf32> to vector<16xf32>
    %249 = vector.shape_cast %248 : vector<16xf32> to vector<16x1xf32>
    %cst_71 = arith.constant 3.200000e+01 : f32
    %250 = vector.broadcast %cst_71 : f32 to vector<16x1xf32>
    %251 = arith.divf %249, %250 : vector<16x1xf32>
    %cst_72 = arith.constant 9.99999997E-7 : f32
    %252 = vector.broadcast %cst_72 : f32 to vector<16x1xf32>
    %253 = arith.addf %251, %252 : vector<16x1xf32>
    %254 = math.rsqrt %253 : vector<16x1xf32>
    %255 = vector.broadcast %254 : vector<16x1xf32> to vector<16x32xf32>
    %256 = arith.mulf %246, %255 : vector<16x32xf32>
    %257 = arith.extf %245 : vector<1x32xbf16> to vector<1x32xf32>
    %258 = vector.broadcast %257 : vector<1x32xf32> to vector<16x32xf32>
    %259 = arith.mulf %256, %258 : vector<16x32xf32>
    %260 = arith.truncf %259 : vector<16x32xf32> to vector<16x32xbf16>
    %c1_73 = arith.constant 1 : index
    %c0_74 = arith.constant 0 : index
    %c0_75 = arith.constant 0 : index
    %261 = vector.load %arg5[%c1_73, %c0_74, %c0_75] : memref<2x32x64xbf16, #tpu.memory_space<vmem>>, vector<1x32x64xbf16>
    %262 = vector.shape_cast %261 : vector<1x32x64xbf16> to vector<32x64xbf16>
    %cst_76 = arith.constant dense<0.000000e+00> : vector<16x64xf32>
    %263 = tpu.matmul %260, %262, %cst_76 {dimension_numbers = #tpu.dot_dimension_numbers<[1], [0], [0], [1], [0, 0, 1, 1], [], []>} : vector<16x32xbf16>, vector<32x64xbf16>, vector<16x64xf32> -> vector<16x64xf32>
    %c1_77 = arith.constant 1 : index
    %c0_78 = arith.constant 0 : index
    %c0_79 = arith.constant 0 : index
    %264 = vector.load %arg6[%c1_77, %c0_78, %c0_79] : memref<2x1x64xbf16, #tpu.memory_space<vmem>>, vector<1x1x64xbf16>
    %265 = vector.shape_cast %264 : vector<1x1x64xbf16> to vector<1x64xbf16>
    %266 = arith.extf %265 : vector<1x64xbf16> to vector<1x64xf32>
    %267 = vector.broadcast %266 : vector<1x64xf32> to vector<16x64xf32>
    %268 = arith.addf %263, %267 : vector<16x64xf32>
    %269 = vector.extract_strided_slice %268 {offsets = [0, 32], sizes = [16, 8], strides = [1, 1]} : vector<16x64xf32> to vector<16x8xf32>
    %270 = vector.shape_cast %269 : vector<16x8xf32> to vector<2x8x8xf32>
    %271 = vector.extract_strided_slice %268 {offsets = [0, 48], sizes = [16, 8], strides = [1, 1]} : vector<16x64xf32> to vector<16x8xf32>
    %272 = vector.shape_cast %271 : vector<16x8xf32> to vector<2x8x8xf32>
    %273 = vector.extract_strided_slice %270 {offsets = [0, 0, 4], sizes = [2, 8, 4], strides = [1, 1, 1]} : vector<2x8x8xf32> to vector<2x8x4xf32>
    %cst_80 = arith.constant 0.000000e+00 : f32
    %274 = vector.broadcast %cst_80 : f32 to vector<2x8x4xf32>
    %275 = arith.subf %274, %273 : vector<2x8x4xf32>
    %276 = vector.extract_strided_slice %270 {offsets = [0, 0, 0], sizes = [2, 8, 4], strides = [1, 1, 1]} : vector<2x8x8xf32> to vector<2x8x4xf32>
    %277 = tpu.concatenate %275, %276 in 2 : vector<2x8x4xf32>, vector<2x8x4xf32> -> vector<2x8x8xf32>
    %278 = vector.broadcast %2 : vector<1x8x8xf32> to vector<2x8x8xf32>
    %279 = arith.mulf %270, %278 : vector<2x8x8xf32>
    %280 = vector.broadcast %4 : vector<1x8x8xf32> to vector<2x8x8xf32>
    %281 = arith.mulf %277, %280 : vector<2x8x8xf32>
    %282 = arith.addf %279, %281 : vector<2x8x8xf32>
    %283 = arith.truncf %282 : vector<2x8x8xf32> to vector<2x8x8xbf16>
    %284 = arith.truncf %272 : vector<2x8x8xf32> to vector<2x8x8xbf16>
    %285 = vector.extract_strided_slice %268 {offsets = [0, 40], sizes = [16, 8], strides = [1, 1]} : vector<16x64xf32> to vector<16x8xf32>
    %286 = vector.shape_cast %285 : vector<16x8xf32> to vector<2x8x8xf32>
    %287 = vector.extract_strided_slice %268 {offsets = [0, 56], sizes = [16, 8], strides = [1, 1]} : vector<16x64xf32> to vector<16x8xf32>
    %288 = vector.shape_cast %287 : vector<16x8xf32> to vector<2x8x8xf32>
    %289 = vector.extract_strided_slice %286 {offsets = [0, 0, 4], sizes = [2, 8, 4], strides = [1, 1, 1]} : vector<2x8x8xf32> to vector<2x8x4xf32>
    %cst_81 = arith.constant 0.000000e+00 : f32
    %290 = vector.broadcast %cst_81 : f32 to vector<2x8x4xf32>
    %291 = arith.subf %290, %289 : vector<2x8x4xf32>
    %292 = vector.extract_strided_slice %286 {offsets = [0, 0, 0], sizes = [2, 8, 4], strides = [1, 1, 1]} : vector<2x8x8xf32> to vector<2x8x4xf32>
    %293 = tpu.concatenate %291, %292 in 2 : vector<2x8x4xf32>, vector<2x8x4xf32> -> vector<2x8x8xf32>
    %294 = vector.broadcast %2 : vector<1x8x8xf32> to vector<2x8x8xf32>
    %295 = arith.mulf %286, %294 : vector<2x8x8xf32>
    %296 = vector.broadcast %4 : vector<1x8x8xf32> to vector<2x8x8xf32>
    %297 = arith.mulf %293, %296 : vector<2x8x8xf32>
    %298 = arith.addf %295, %297 : vector<2x8x8xf32>
    %299 = arith.truncf %298 : vector<2x8x8xf32> to vector<2x8x8xbf16>
    %300 = arith.truncf %288 : vector<2x8x8xf32> to vector<2x8x8xbf16>
    %cst_82 = arith.constant 0.000000e+00 : f32
    %301 = vector.broadcast %cst_82 : f32 to vector<16x32xf32>
    %c1_83 = arith.constant 1 : index
    %c0_84 = arith.constant 0 : index
    %c0_85 = arith.constant 0 : index
    %302 = vector.load %arg7[%c1_83, %c0_84, %c0_85] : memref<2x32x32xbf16, #tpu.memory_space<vmem>>, vector<1x32x32xbf16>
    %303 = vector.shape_cast %302 : vector<1x32x32xbf16> to vector<32x32xbf16>
    %304 = vector.extract_strided_slice %268 {offsets = [0, 0], sizes = [16, 8], strides = [1, 1]} : vector<16x64xf32> to vector<16x8xf32>
    %305 = vector.shape_cast %304 : vector<16x8xf32> to vector<2x8x8xf32>
    %306 = vector.extract_strided_slice %305 {offsets = [0, 0, 4], sizes = [2, 8, 4], strides = [1, 1, 1]} : vector<2x8x8xf32> to vector<2x8x4xf32>
    %cst_86 = arith.constant 0.000000e+00 : f32
    %307 = vector.broadcast %cst_86 : f32 to vector<2x8x4xf32>
    %308 = arith.subf %307, %306 : vector<2x8x4xf32>
    %309 = vector.extract_strided_slice %305 {offsets = [0, 0, 0], sizes = [2, 8, 4], strides = [1, 1, 1]} : vector<2x8x8xf32> to vector<2x8x4xf32>
    %310 = tpu.concatenate %308, %309 in 2 : vector<2x8x4xf32>, vector<2x8x4xf32> -> vector<2x8x8xf32>
    %311 = vector.broadcast %2 : vector<1x8x8xf32> to vector<2x8x8xf32>
    %312 = arith.mulf %305, %311 : vector<2x8x8xf32>
    %313 = vector.broadcast %4 : vector<1x8x8xf32> to vector<2x8x8xf32>
    %314 = arith.mulf %310, %313 : vector<2x8x8xf32>
    %315 = arith.addf %312, %314 : vector<2x8x8xf32>
    %cst_87 = arith.constant 0.353553385 : f32
    %316 = vector.broadcast %cst_87 : f32 to vector<2x8x8xf32>
    %317 = arith.mulf %315, %316 : vector<2x8x8xf32>
    %318 = arith.truncf %317 : vector<2x8x8xf32> to vector<2x8x8xbf16>
    "tpu.trace_start"() <{level = 10 : i32, message = "bqd,bkd->bqk"}> : () -> ()
    %cst_88 = arith.constant dense<0.000000e+00> : vector<2x8x8xf32>
    %319 = tpu.matmul %318, %283, %cst_88 {dimension_numbers = #tpu.dot_dimension_numbers<[2], [2], [1], [1], [0, 0, 0, 1, 1, 1], [0], [0]>} : vector<2x8x8xbf16>, vector<2x8x8xbf16>, vector<2x8x8xf32> -> vector<2x8x8xf32>
    "tpu.trace_stop"() : () -> ()
    %320 = arith.addf %319, %10 : vector<2x8x8xf32>
    %cst_89 = arith.constant dense<0xFF800000> : vector<2x8xf32>
    %321 = vector.multi_reduction <maximumf>, %320, %cst_89 [2] : vector<2x8x8xf32> to vector<2x8xf32>
    %322 = vector.shape_cast %321 : vector<2x8xf32> to vector<2x8x1xf32>
    %323 = vector.broadcast %322 : vector<2x8x1xf32> to vector<2x8x8xf32>
    %324 = arith.subf %320, %323 : vector<2x8x8xf32>
    %325 = math.exp %324 : vector<2x8x8xf32>
    %cst_90 = arith.constant dense<0.000000e+00> : vector<2x8xf32>
    %326 = vector.multi_reduction <add>, %325, %cst_90 [2] : vector<2x8x8xf32> to vector<2x8xf32>
    %327 = vector.shape_cast %326 : vector<2x8xf32> to vector<2x8x1xf32>
    %328 = tpu.reciprocal %327 {approx = true} : vector<2x8x1xf32> -> vector<2x8x1xf32>
    %329 = vector.broadcast %328 : vector<2x8x1xf32> to vector<2x8x8xf32>
    %330 = arith.mulf %325, %329 : vector<2x8x8xf32>
    %331 = arith.truncf %330 : vector<2x8x8xf32> to vector<2x8x8xbf16>
    "tpu.trace_start"() <{level = 10 : i32, message = "bqk,bkd->bqd"}> : () -> ()
    %cst_91 = arith.constant dense<0.000000e+00> : vector<2x8x8xf32>
    %332 = tpu.matmul %331, %284, %cst_91 {dimension_numbers = #tpu.dot_dimension_numbers<[2], [1], [1], [2], [0, 0, 0, 1, 1, 2], [0], [0]>} : vector<2x8x8xbf16>, vector<2x8x8xbf16>, vector<2x8x8xf32> -> vector<2x8x8xf32>
    "tpu.trace_stop"() : () -> ()
    %333 = vector.shape_cast %332 : vector<2x8x8xf32> to vector<16x8xf32>
    %334 = arith.truncf %333 : vector<16x8xf32> to vector<16x8xbf16>
    %335 = vector.extract_strided_slice %303 {offsets = [0, 0], sizes = [8, 32], strides = [1, 1]} : vector<32x32xbf16> to vector<8x32xbf16>
    %cst_92 = arith.constant dense<0.000000e+00> : vector<16x32xf32>
    %336 = tpu.matmul %334, %335, %cst_92 {dimension_numbers = #tpu.dot_dimension_numbers<[1], [0], [0], [1], [0, 0, 1, 1], [], []>} : vector<16x8xbf16>, vector<8x32xbf16>, vector<16x32xf32> -> vector<16x32xf32>
    %337 = arith.addf %301, %336 : vector<16x32xf32>
    %338 = vector.extract_strided_slice %268 {offsets = [0, 8], sizes = [16, 8], strides = [1, 1]} : vector<16x64xf32> to vector<16x8xf32>
    %339 = vector.shape_cast %338 : vector<16x8xf32> to vector<2x8x8xf32>
    %340 = vector.extract_strided_slice %339 {offsets = [0, 0, 4], sizes = [2, 8, 4], strides = [1, 1, 1]} : vector<2x8x8xf32> to vector<2x8x4xf32>
    %cst_93 = arith.constant 0.000000e+00 : f32
    %341 = vector.broadcast %cst_93 : f32 to vector<2x8x4xf32>
    %342 = arith.subf %341, %340 : vector<2x8x4xf32>
    %343 = vector.extract_strided_slice %339 {offsets = [0, 0, 0], sizes = [2, 8, 4], strides = [1, 1, 1]} : vector<2x8x8xf32> to vector<2x8x4xf32>
    %344 = tpu.concatenate %342, %343 in 2 : vector<2x8x4xf32>, vector<2x8x4xf32> -> vector<2x8x8xf32>
    %345 = vector.broadcast %2 : vector<1x8x8xf32> to vector<2x8x8xf32>
    %346 = arith.mulf %339, %345 : vector<2x8x8xf32>
    %347 = vector.broadcast %4 : vector<1x8x8xf32> to vector<2x8x8xf32>
    %348 = arith.mulf %344, %347 : vector<2x8x8xf32>
    %349 = arith.addf %346, %348 : vector<2x8x8xf32>
    %cst_94 = arith.constant 0.353553385 : f32
    %350 = vector.broadcast %cst_94 : f32 to vector<2x8x8xf32>
    %351 = arith.mulf %349, %350 : vector<2x8x8xf32>
    %352 = arith.truncf %351 : vector<2x8x8xf32> to vector<2x8x8xbf16>
    "tpu.trace_start"() <{level = 10 : i32, message = "bqd,bkd->bqk"}> : () -> ()
    %cst_95 = arith.constant dense<0.000000e+00> : vector<2x8x8xf32>
    %353 = tpu.matmul %352, %283, %cst_95 {dimension_numbers = #tpu.dot_dimension_numbers<[2], [2], [1], [1], [0, 0, 0, 1, 1, 1], [0], [0]>} : vector<2x8x8xbf16>, vector<2x8x8xbf16>, vector<2x8x8xf32> -> vector<2x8x8xf32>
    "tpu.trace_stop"() : () -> ()
    %354 = arith.addf %353, %10 : vector<2x8x8xf32>
    %cst_96 = arith.constant dense<0xFF800000> : vector<2x8xf32>
    %355 = vector.multi_reduction <maximumf>, %354, %cst_96 [2] : vector<2x8x8xf32> to vector<2x8xf32>
    %356 = vector.shape_cast %355 : vector<2x8xf32> to vector<2x8x1xf32>
    %357 = vector.broadcast %356 : vector<2x8x1xf32> to vector<2x8x8xf32>
    %358 = arith.subf %354, %357 : vector<2x8x8xf32>
    %359 = math.exp %358 : vector<2x8x8xf32>
    %cst_97 = arith.constant dense<0.000000e+00> : vector<2x8xf32>
    %360 = vector.multi_reduction <add>, %359, %cst_97 [2] : vector<2x8x8xf32> to vector<2x8xf32>
    %361 = vector.shape_cast %360 : vector<2x8xf32> to vector<2x8x1xf32>
    %362 = tpu.reciprocal %361 {approx = true} : vector<2x8x1xf32> -> vector<2x8x1xf32>
    %363 = vector.broadcast %362 : vector<2x8x1xf32> to vector<2x8x8xf32>
    %364 = arith.mulf %359, %363 : vector<2x8x8xf32>
    %365 = arith.truncf %364 : vector<2x8x8xf32> to vector<2x8x8xbf16>
    "tpu.trace_start"() <{level = 10 : i32, message = "bqk,bkd->bqd"}> : () -> ()
    %cst_98 = arith.constant dense<0.000000e+00> : vector<2x8x8xf32>
    %366 = tpu.matmul %365, %284, %cst_98 {dimension_numbers = #tpu.dot_dimension_numbers<[2], [1], [1], [2], [0, 0, 0, 1, 1, 2], [0], [0]>} : vector<2x8x8xbf16>, vector<2x8x8xbf16>, vector<2x8x8xf32> -> vector<2x8x8xf32>
    "tpu.trace_stop"() : () -> ()
    %367 = vector.shape_cast %366 : vector<2x8x8xf32> to vector<16x8xf32>
    %368 = arith.truncf %367 : vector<16x8xf32> to vector<16x8xbf16>
    %369 = vector.extract_strided_slice %303 {offsets = [8, 0], sizes = [8, 32], strides = [1, 1]} : vector<32x32xbf16> to vector<8x32xbf16>
    %cst_99 = arith.constant dense<0.000000e+00> : vector<16x32xf32>
    %370 = tpu.matmul %368, %369, %cst_99 {dimension_numbers = #tpu.dot_dimension_numbers<[1], [0], [0], [1], [0, 0, 1, 1], [], []>} : vector<16x8xbf16>, vector<8x32xbf16>, vector<16x32xf32> -> vector<16x32xf32>
    %371 = arith.addf %337, %370 : vector<16x32xf32>
    %372 = vector.extract_strided_slice %268 {offsets = [0, 16], sizes = [16, 8], strides = [1, 1]} : vector<16x64xf32> to vector<16x8xf32>
    %373 = vector.shape_cast %372 : vector<16x8xf32> to vector<2x8x8xf32>
    %374 = vector.extract_strided_slice %373 {offsets = [0, 0, 4], sizes = [2, 8, 4], strides = [1, 1, 1]} : vector<2x8x8xf32> to vector<2x8x4xf32>
    %cst_100 = arith.constant 0.000000e+00 : f32
    %375 = vector.broadcast %cst_100 : f32 to vector<2x8x4xf32>
    %376 = arith.subf %375, %374 : vector<2x8x4xf32>
    %377 = vector.extract_strided_slice %373 {offsets = [0, 0, 0], sizes = [2, 8, 4], strides = [1, 1, 1]} : vector<2x8x8xf32> to vector<2x8x4xf32>
    %378 = tpu.concatenate %376, %377 in 2 : vector<2x8x4xf32>, vector<2x8x4xf32> -> vector<2x8x8xf32>
    %379 = vector.broadcast %2 : vector<1x8x8xf32> to vector<2x8x8xf32>
    %380 = arith.mulf %373, %379 : vector<2x8x8xf32>
    %381 = vector.broadcast %4 : vector<1x8x8xf32> to vector<2x8x8xf32>
    %382 = arith.mulf %378, %381 : vector<2x8x8xf32>
    %383 = arith.addf %380, %382 : vector<2x8x8xf32>
    %cst_101 = arith.constant 0.353553385 : f32
    %384 = vector.broadcast %cst_101 : f32 to vector<2x8x8xf32>
    %385 = arith.mulf %383, %384 : vector<2x8x8xf32>
    %386 = arith.truncf %385 : vector<2x8x8xf32> to vector<2x8x8xbf16>
    "tpu.trace_start"() <{level = 10 : i32, message = "bqd,bkd->bqk"}> : () -> ()
    %cst_102 = arith.constant dense<0.000000e+00> : vector<2x8x8xf32>
    %387 = tpu.matmul %386, %299, %cst_102 {dimension_numbers = #tpu.dot_dimension_numbers<[2], [2], [1], [1], [0, 0, 0, 1, 1, 1], [0], [0]>} : vector<2x8x8xbf16>, vector<2x8x8xbf16>, vector<2x8x8xf32> -> vector<2x8x8xf32>
    "tpu.trace_stop"() : () -> ()
    %388 = arith.addf %387, %10 : vector<2x8x8xf32>
    %cst_103 = arith.constant dense<0xFF800000> : vector<2x8xf32>
    %389 = vector.multi_reduction <maximumf>, %388, %cst_103 [2] : vector<2x8x8xf32> to vector<2x8xf32>
    %390 = vector.shape_cast %389 : vector<2x8xf32> to vector<2x8x1xf32>
    %391 = vector.broadcast %390 : vector<2x8x1xf32> to vector<2x8x8xf32>
    %392 = arith.subf %388, %391 : vector<2x8x8xf32>
    %393 = math.exp %392 : vector<2x8x8xf32>
    %cst_104 = arith.constant dense<0.000000e+00> : vector<2x8xf32>
    %394 = vector.multi_reduction <add>, %393, %cst_104 [2] : vector<2x8x8xf32> to vector<2x8xf32>
    %395 = vector.shape_cast %394 : vector<2x8xf32> to vector<2x8x1xf32>
    %396 = tpu.reciprocal %395 {approx = true} : vector<2x8x1xf32> -> vector<2x8x1xf32>
    %397 = vector.broadcast %396 : vector<2x8x1xf32> to vector<2x8x8xf32>
    %398 = arith.mulf %393, %397 : vector<2x8x8xf32>
    %399 = arith.truncf %398 : vector<2x8x8xf32> to vector<2x8x8xbf16>
    "tpu.trace_start"() <{level = 10 : i32, message = "bqk,bkd->bqd"}> : () -> ()
    %cst_105 = arith.constant dense<0.000000e+00> : vector<2x8x8xf32>
    %400 = tpu.matmul %399, %300, %cst_105 {dimension_numbers = #tpu.dot_dimension_numbers<[2], [1], [1], [2], [0, 0, 0, 1, 1, 2], [0], [0]>} : vector<2x8x8xbf16>, vector<2x8x8xbf16>, vector<2x8x8xf32> -> vector<2x8x8xf32>
    "tpu.trace_stop"() : () -> ()
    %401 = vector.shape_cast %400 : vector<2x8x8xf32> to vector<16x8xf32>
    %402 = arith.truncf %401 : vector<16x8xf32> to vector<16x8xbf16>
    %403 = vector.extract_strided_slice %303 {offsets = [16, 0], sizes = [8, 32], strides = [1, 1]} : vector<32x32xbf16> to vector<8x32xbf16>
    %cst_106 = arith.constant dense<0.000000e+00> : vector<16x32xf32>
    %404 = tpu.matmul %402, %403, %cst_106 {dimension_numbers = #tpu.dot_dimension_numbers<[1], [0], [0], [1], [0, 0, 1, 1], [], []>} : vector<16x8xbf16>, vector<8x32xbf16>, vector<16x32xf32> -> vector<16x32xf32>
    %405 = arith.addf %371, %404 : vector<16x32xf32>
    %406 = vector.extract_strided_slice %268 {offsets = [0, 24], sizes = [16, 8], strides = [1, 1]} : vector<16x64xf32> to vector<16x8xf32>
    %407 = vector.shape_cast %406 : vector<16x8xf32> to vector<2x8x8xf32>
    %408 = vector.extract_strided_slice %407 {offsets = [0, 0, 4], sizes = [2, 8, 4], strides = [1, 1, 1]} : vector<2x8x8xf32> to vector<2x8x4xf32>
    %cst_107 = arith.constant 0.000000e+00 : f32
    %409 = vector.broadcast %cst_107 : f32 to vector<2x8x4xf32>
    %410 = arith.subf %409, %408 : vector<2x8x4xf32>
    %411 = vector.extract_strided_slice %407 {offsets = [0, 0, 0], sizes = [2, 8, 4], strides = [1, 1, 1]} : vector<2x8x8xf32> to vector<2x8x4xf32>
    %412 = tpu.concatenate %410, %411 in 2 : vector<2x8x4xf32>, vector<2x8x4xf32> -> vector<2x8x8xf32>
    %413 = vector.broadcast %2 : vector<1x8x8xf32> to vector<2x8x8xf32>
    %414 = arith.mulf %407, %413 : vector<2x8x8xf32>
    %415 = vector.broadcast %4 : vector<1x8x8xf32> to vector<2x8x8xf32>
    %416 = arith.mulf %412, %415 : vector<2x8x8xf32>
    %417 = arith.addf %414, %416 : vector<2x8x8xf32>
    %cst_108 = arith.constant 0.353553385 : f32
    %418 = vector.broadcast %cst_108 : f32 to vector<2x8x8xf32>
    %419 = arith.mulf %417, %418 : vector<2x8x8xf32>
    %420 = arith.truncf %419 : vector<2x8x8xf32> to vector<2x8x8xbf16>
    "tpu.trace_start"() <{level = 10 : i32, message = "bqd,bkd->bqk"}> : () -> ()
    %cst_109 = arith.constant dense<0.000000e+00> : vector<2x8x8xf32>
    %421 = tpu.matmul %420, %299, %cst_109 {dimension_numbers = #tpu.dot_dimension_numbers<[2], [2], [1], [1], [0, 0, 0, 1, 1, 1], [0], [0]>} : vector<2x8x8xbf16>, vector<2x8x8xbf16>, vector<2x8x8xf32> -> vector<2x8x8xf32>
    "tpu.trace_stop"() : () -> ()
    %422 = arith.addf %421, %10 : vector<2x8x8xf32>
    %cst_110 = arith.constant dense<0xFF800000> : vector<2x8xf32>
    %423 = vector.multi_reduction <maximumf>, %422, %cst_110 [2] : vector<2x8x8xf32> to vector<2x8xf32>
    %424 = vector.shape_cast %423 : vector<2x8xf32> to vector<2x8x1xf32>
    %425 = vector.broadcast %424 : vector<2x8x1xf32> to vector<2x8x8xf32>
    %426 = arith.subf %422, %425 : vector<2x8x8xf32>
    %427 = math.exp %426 : vector<2x8x8xf32>
    %cst_111 = arith.constant dense<0.000000e+00> : vector<2x8xf32>
    %428 = vector.multi_reduction <add>, %427, %cst_111 [2] : vector<2x8x8xf32> to vector<2x8xf32>
    %429 = vector.shape_cast %428 : vector<2x8xf32> to vector<2x8x1xf32>
    %430 = tpu.reciprocal %429 {approx = true} : vector<2x8x1xf32> -> vector<2x8x1xf32>
    %431 = vector.broadcast %430 : vector<2x8x1xf32> to vector<2x8x8xf32>
    %432 = arith.mulf %427, %431 : vector<2x8x8xf32>
    %433 = arith.truncf %432 : vector<2x8x8xf32> to vector<2x8x8xbf16>
    "tpu.trace_start"() <{level = 10 : i32, message = "bqk,bkd->bqd"}> : () -> ()
    %cst_112 = arith.constant dense<0.000000e+00> : vector<2x8x8xf32>
    %434 = tpu.matmul %433, %300, %cst_112 {dimension_numbers = #tpu.dot_dimension_numbers<[2], [1], [1], [2], [0, 0, 0, 1, 1, 2], [0], [0]>} : vector<2x8x8xbf16>, vector<2x8x8xbf16>, vector<2x8x8xf32> -> vector<2x8x8xf32>
    "tpu.trace_stop"() : () -> ()
    %435 = vector.shape_cast %434 : vector<2x8x8xf32> to vector<16x8xf32>
    %436 = arith.truncf %435 : vector<16x8xf32> to vector<16x8xbf16>
    %437 = vector.extract_strided_slice %303 {offsets = [24, 0], sizes = [8, 32], strides = [1, 1]} : vector<32x32xbf16> to vector<8x32xbf16>
    %cst_113 = arith.constant dense<0.000000e+00> : vector<16x32xf32>
    %438 = tpu.matmul %436, %437, %cst_113 {dimension_numbers = #tpu.dot_dimension_numbers<[1], [0], [0], [1], [0, 0, 1, 1], [], []>} : vector<16x8xbf16>, vector<8x32xbf16>, vector<16x32xf32> -> vector<16x32xf32>
    %439 = arith.addf %405, %438 : vector<16x32xf32>
    %440 = arith.truncf %439 : vector<16x32xf32> to vector<16x32xbf16>
    %441 = arith.addf %243, %440 : vector<16x32xbf16>
    %c1_114 = arith.constant 1 : index
    %c0_115 = arith.constant 0 : index
    %c0_116 = arith.constant 0 : index
    %442 = vector.load %arg8[%c1_114, %c0_115, %c0_116] : memref<2x1x32xbf16, #tpu.memory_space<vmem>>, vector<1x1x32xbf16>
    %443 = vector.shape_cast %442 : vector<1x1x32xbf16> to vector<1x32xbf16>
    %444 = arith.extf %441 : vector<16x32xbf16> to vector<16x32xf32>
    %445 = arith.mulf %444, %444 : vector<16x32xf32>
    %cst_117 = arith.constant dense<0.000000e+00> : vector<16xf32>
    %446 = vector.multi_reduction <add>, %445, %cst_117 [1] : vector<16x32xf32> to vector<16xf32>
    %447 = vector.shape_cast %446 : vector<16xf32> to vector<16x1xf32>
    %cst_118 = arith.constant 3.200000e+01 : f32
    %448 = vector.broadcast %cst_118 : f32 to vector<16x1xf32>
    %449 = arith.divf %447, %448 : vector<16x1xf32>
    %cst_119 = arith.constant 9.99999997E-7 : f32
    %450 = vector.broadcast %cst_119 : f32 to vector<16x1xf32>
    %451 = arith.addf %449, %450 : vector<16x1xf32>
    %452 = math.rsqrt %451 : vector<16x1xf32>
    %453 = vector.broadcast %452 : vector<16x1xf32> to vector<16x32xf32>
    %454 = arith.mulf %444, %453 : vector<16x32xf32>
    %455 = arith.extf %443 : vector<1x32xbf16> to vector<1x32xf32>
    %456 = vector.broadcast %455 : vector<1x32xf32> to vector<16x32xf32>
    %457 = arith.mulf %454, %456 : vector<16x32xf32>
    %458 = arith.truncf %457 : vector<16x32xf32> to vector<16x32xbf16>
    %c1_120 = arith.constant 1 : index
    %c0_121 = arith.constant 0 : index
    %c0_122 = arith.constant 0 : index
    %459 = vector.load %arg9[%c1_120, %c0_121, %c0_122] : memref<2x32x128xbf16, #tpu.memory_space<vmem>>, vector<1x32x128xbf16>
    %460 = vector.shape_cast %459 : vector<1x32x128xbf16> to vector<32x128xbf16>
    %cst_123 = arith.constant dense<0.000000e+00> : vector<16x128xf32>
    %461 = tpu.matmul %458, %460, %cst_123 {dimension_numbers = #tpu.dot_dimension_numbers<[1], [0], [0], [1], [0, 0, 1, 1], [], []>} : vector<16x32xbf16>, vector<32x128xbf16>, vector<16x128xf32> -> vector<16x128xf32>
    %462 = vector.extract_strided_slice %461 {offsets = [0, 0], sizes = [16, 64], strides = [1, 1]} : vector<16x128xf32> to vector<16x64xf32>
    %463 = vector.extract_strided_slice %461 {offsets = [0, 64], sizes = [16, 64], strides = [1, 1]} : vector<16x128xf32> to vector<16x64xf32>
    %464 = arith.negf %462 : vector<16x64xf32>
    %465 = math.exp %464 : vector<16x64xf32>
    %cst_124 = arith.constant 1.000000e+00 : f32
    %466 = vector.broadcast %cst_124 : f32 to vector<16x64xf32>
    %467 = arith.addf %466, %465 : vector<16x64xf32>
    %468 = arith.divf %466, %467 : vector<16x64xf32>
    %469 = arith.mulf %462, %468 : vector<16x64xf32>
    %470 = arith.mulf %469, %463 : vector<16x64xf32>
    %471 = arith.truncf %470 : vector<16x64xf32> to vector<16x64xbf16>
    %c1_125 = arith.constant 1 : index
    %c0_126 = arith.constant 0 : index
    %c0_127 = arith.constant 0 : index
    %472 = vector.load %arg10[%c1_125, %c0_126, %c0_127] : memref<2x64x32xbf16, #tpu.memory_space<vmem>>, vector<1x64x32xbf16>
    %473 = vector.shape_cast %472 : vector<1x64x32xbf16> to vector<64x32xbf16>
    %cst_128 = arith.constant dense<0.000000e+00> : vector<16x32xf32>
    %474 = tpu.matmul %471, %473, %cst_128 {dimension_numbers = #tpu.dot_dimension_numbers<[1], [0], [0], [1], [0, 0, 1, 1], [], []>} : vector<16x64xbf16>, vector<64x32xbf16>, vector<16x32xf32> -> vector<16x32xf32>
    %475 = arith.truncf %474 : vector<16x32xf32> to vector<16x32xbf16>
    %476 = arith.addf %441, %475 : vector<16x32xbf16>
    %477 = vector.shape_cast %476 : vector<16x32xbf16> to vector<2x8x32xbf16>
    %478 = vector.extract_strided_slice %477 {offsets = [0, 7, 0], sizes = [2, 1, 32], strides = [1, 1, 1]} : vector<2x8x32xbf16> to vector<2x1x32xbf16>
    %479 = vector.shape_cast %478 : vector<2x1x32xbf16> to vector<2x32xbf16>
    %c0_129 = arith.constant 0 : index
    %c0_130 = arith.constant 0 : index
    %480 = vector.load %arg11[%c0_129, %c0_130] : memref<1x32xbf16, #tpu.memory_space<vmem>>, vector<1x32xbf16>
    %481 = arith.extf %479 : vector<2x32xbf16> to vector<2x32xf32>
    %482 = arith.mulf %481, %481 : vector<2x32xf32>
    %cst_131 = arith.constant dense<0.000000e+00> : vector<2xf32>
    %483 = vector.multi_reduction <add>, %482, %cst_131 [1] : vector<2x32xf32> to vector<2xf32>
    %484 = vector.shape_cast %483 : vector<2xf32> to vector<2x1xf32>
    %cst_132 = arith.constant 3.200000e+01 : f32
    %485 = vector.broadcast %cst_132 : f32 to vector<2x1xf32>
    %486 = arith.divf %484, %485 : vector<2x1xf32>
    %cst_133 = arith.constant 9.99999997E-7 : f32
    %487 = vector.broadcast %cst_133 : f32 to vector<2x1xf32>
    %488 = arith.addf %486, %487 : vector<2x1xf32>
    %489 = math.rsqrt %488 : vector<2x1xf32>
    %490 = vector.broadcast %489 : vector<2x1xf32> to vector<2x32xf32>
    %491 = arith.mulf %481, %490 : vector<2x32xf32>
    %492 = arith.extf %480 : vector<1x32xbf16> to vector<1x32xf32>
    %493 = vector.broadcast %492 : vector<1x32xf32> to vector<2x32xf32>
    %494 = arith.mulf %491, %493 : vector<2x32xf32>
    %495 = arith.mulf %494, %494 : vector<2x32xf32>
    %cst_134 = arith.constant dense<0.000000e+00> : vector<2xf32>
    %496 = vector.multi_reduction <add>, %495, %cst_134 [1] : vector<2x32xf32> to vector<2xf32>
    %497 = vector.shape_cast %496 : vector<2xf32> to vector<2x1xf32>
    %498 = math.sqrt %497 : vector<2x1xf32>
    %cst_135 = arith.constant 9.99999996E-13 : f32
    %499 = vector.broadcast %cst_135 : f32 to vector<2x1xf32>
    %500 = arith.maximumf %498, %499 : vector<2x1xf32>
    %501 = vector.broadcast %500 : vector<2x1xf32> to vector<2x32xf32>
    %502 = arith.divf %494, %501 : vector<2x32xf32>
    %503 = arith.truncf %502 : vector<2x32xf32> to vector<2x32xbf16>
    %c0_136 = arith.constant 0 : index
    %c0_137 = arith.constant 0 : index
    %504 = vector.load %arg12[%c0_136, %c0_137] : memref<2x32xbf16, #tpu.memory_space<vmem>>, vector<2x32xbf16>
    tpu.vector_store %arg12[%c0_136, %c0_137], %503 {strides = array<i32>} : memref<2x32xbf16, #tpu.memory_space<vmem>>, vector<2x32xbf16>,
    return
  }
  func.func @transform_0(%arg0: i32) -> (i32, i32) {
    %c0_i32 = arith.constant 0 : i32
    %c0_i32_0 = arith.constant 0 : i32
    %c0_i32_1 = arith.constant 0 : i32
    return %c0_i32, %c0_i32_0 : i32, i32
  }
  func.func @transform_1(%arg0: i32) -> (i32, i32) {
    %c0_i32 = arith.constant 0 : i32
    %c0_i32_0 = arith.constant 0 : i32
    %c0_i32_1 = arith.constant 0 : i32
    return %c0_i32, %c0_i32_0 : i32, i32
  }
  func.func @transform_2(%arg0: i32) -> (i32, i32) {
    %c0_i32 = arith.constant 0 : i32
    %c0_i32_0 = arith.constant 0 : i32
    %c0_i32_1 = arith.constant 0 : i32
    return %c0_i32, %c0_i32_0 : i32, i32
  }
  func.func @transform_3(%arg0: i32) -> (i32, i32, i32) {
    %c0_i32 = arith.constant 0 : i32
    %c0_i32_0 = arith.constant 0 : i32
    %c0_i32_1 = arith.constant 0 : i32
    %c0_i32_2 = arith.constant 0 : i32
    return %c0_i32, %c0_i32_0, %c0_i32_1 : i32, i32, i32
  }
  func.func @transform_4(%arg0: i32) -> (i32, i32, i32) {
    %c0_i32 = arith.constant 0 : i32
    %c0_i32_0 = arith.constant 0 : i32
    %c0_i32_1 = arith.constant 0 : i32
    %c0_i32_2 = arith.constant 0 : i32
    return %c0_i32, %c0_i32_0, %c0_i32_1 : i32, i32, i32
  }
  func.func @transform_5(%arg0: i32) -> (i32, i32, i32) {
    %c0_i32 = arith.constant 0 : i32
    %c0_i32_0 = arith.constant 0 : i32
    %c0_i32_1 = arith.constant 0 : i32
    %c0_i32_2 = arith.constant 0 : i32
    return %c0_i32, %c0_i32_0, %c0_i32_1 : i32, i32, i32
  }
  func.func @transform_6(%arg0: i32) -> (i32, i32, i32) {
    %c0_i32 = arith.constant 0 : i32
    %c0_i32_0 = arith.constant 0 : i32
    %c0_i32_1 = arith.constant 0 : i32
    %c0_i32_2 = arith.constant 0 : i32
    return %c0_i32, %c0_i32_0, %c0_i32_1 : i32, i32, i32
  }
  func.func @transform_7(%arg0: i32) -> (i32, i32, i32) {
    %c0_i32 = arith.constant 0 : i32
    %c0_i32_0 = arith.constant 0 : i32
    %c0_i32_1 = arith.constant 0 : i32
    %c0_i32_2 = arith.constant 0 : i32
    return %c0_i32, %c0_i32_0, %c0_i32_1 : i32, i32, i32
  }
  func.func @transform_8(%arg0: i32) -> (i32, i32, i32) {
    %c0_i32 = arith.constant 0 : i32
    %c0_i32_0 = arith.constant 0 : i32
    %c0_i32_1 = arith.constant 0 : i32
    %c0_i32_2 = arith.constant 0 : i32
    return %c0_i32, %c0_i32_0, %c0_i32_1 : i32, i32, i32
  }
  func.func @transform_9(%arg0: i32) -> (i32, i32, i32) {
    %c0_i32 = arith.constant 0 : i32
    %c0_i32_0 = arith.constant 0 : i32
    %c0_i32_1 = arith.constant 0 : i32
    %c0_i32_2 = arith.constant 0 : i32
    return %c0_i32, %c0_i32_0, %c0_i32_1 : i32, i32, i32
  }
  func.func @transform_10(%arg0: i32) -> (i32, i32) {
    %c0_i32 = arith.constant 0 : i32
    %c0_i32_0 = arith.constant 0 : i32
    %c0_i32_1 = arith.constant 0 : i32
    return %c0_i32, %c0_i32_0 : i32, i32
  }
  func.func @transform_11(%arg0: i32) -> (i32, i32) {
    %c0_i32 = arith.constant 0 : i32
    %c0_i32_0 = arith.constant 0 : i32
    %c0_i32_1 = arith.constant 0 : i32
    return %c0_i32, %c0_i32_0 : i32, i32
  }
}

</mosaic_0001>

<bundles_post_ra>
// kernel: tpu_custom_call.1
= control target key start
LH: loop header
LB: loop body
LE: loop exit
PB: predicated region body
PF: predicated region fallthrough
CT: control target
= control target key end

     0   :  { %16 = vsyncpa [#allocation3], 0  ;;  %s5010_s0 = inlined_call_operand.vmem [shape: bf16[16,32], index: 0, kind: input, shape index: {}]   ;;  %s5011_s1 = inlined_call_operand.hbm [shape: f32[8,8], index: 1, kind: input, shape index: {}]   ;;  %s5012_s2 = inlined_call_operand.hbm [shape: f32[8,8], index: 2, kind: input, shape index: {}]   ;;  %s5013_s3 = inlined_call_operand.vmem [shape: bf16[2,1,32], index: 3, kind: input, shape index: {}]   ;;  %s5014_s4 = inlined_call_operand.vmem [shape: bf16[2,32,64], index: 4, kind: input, shape index: {}]   ;;  %s5015_s5 = inlined_call_operand.vmem [shape: bf16[2,1,64], index: 5, kind: input, shape index: {}]   ;;  %s5016_s6 = inlined_call_operand.vmem [shape: bf16[2,32,32], index: 6, kind: input, shape index: {}]   ;;  %s5017_s7 = inlined_call_operand.vmem [shape: bf16[2,1,32], index: 7, kind: input, shape index: {}]   ;;  %s5018_s8 = inlined_call_operand.vmem [shape: bf16[2,32,128], index: 8, kind: input, shape index: {}]   ;;  %s5019_s9 = inlined_call_operand.vmem [shape: bf16[2,64,32], index: 9, kind: input, shape index: {}]   ;;  %s5020_s10 = inlined_call_operand.vmem [shape: bf16[1,32], index: 10, kind: input, shape index: {}]   ;;  %s5021_s11 = inlined_call_operand.hbm [shape: bf16[2,32], index: 11, kind: output, shape index: {}]  }
   0x1   :  { %17 = vsyncpa [#allocation6], 0 }
   0x2   :  { %18 = vsyncpa [#allocation4], 0  ;;  %s4080_s17 = smov [#allocation2]   ;;  %s4081_s19 = smov [#allocation5]  }
   0x3   :  { %s27_s18 = sshll.u32 %s4080_s17, 4  ;;  %s37_s20 = sshll.u32 %s4081_s19, 4  ;;  %s28_s18 = int_to_ptr.vmem [resolvable:$true] %s27_s18  ;;  %s38_s20 = int_to_ptr.vmem [resolvable:$true] %s37_s20 }
   0x4   :  { %s4022_s21 = scalar_lea.vmem %s28_s18, 128  ;;  %p4027_p1 = scmp.lt.s32.totalorder %s28_s18, %s28_s18 }
   0x5   :  { %p4023_p0 = scmp.ne.s32.totalorder %s28_s18, %s4022_s21  ;;  %p4028_p2 = scmp.lt.s32.totalorder %s4022_s21, %s4022_s21 }
   0x7   :  { %p4029_p3 = por %p4028_p2, %p4027_p1 }
   0x9   :  { %p4030_p4 = pnand %p4029_p3, %p4023_p0 }
   0xb   :  { %4033 = shalt.err (!%p4030_p4)
}
   0xc   :  { %30 = dma.hbm_to_vmem [thread:$0]  %s5011_s1, 128, %s28_s18, [#allocation3]  }
   0xd   :  { %s4042_s24 = scalar_lea.vmem %s38_s20, 128  ;;  %p4047_p6 = scmp.lt.s32.totalorder %s38_s20, %s38_s20 }
   0xe   :  { %p4043_p5 = scmp.ne.s32.totalorder %s38_s20, %s4042_s24  ;;  %p4048_p7 = scmp.lt.s32.totalorder %s4042_s24, %s4042_s24 }
  0x10   :  { %p4049_p8 = por %p4048_p7, %p4047_p6 }
  0x12   :  { %p4050_p9 = pnand %p4049_p8, %p4043_p5 }
  0x14   :  { %4053 = shalt.err (!%p4050_p9)
}
  0x15   :  { %40 = dma.hbm_to_vmem [thread:$0]  %s5012_s2, 128, %s38_s20, [#allocation6]  }
  0x16   :  { %4074 = dma.done.wait [#allocation3], 128  }
  0x17   :  { %4075 = vsyncadd [#allocation3], 4294967168 }
  0x18   :  { %4076 = dma.done.wait [#allocation6], 128  }
  0x19   :  { %4077 = vsyncadd [#allocation6], 4294967168  ;;  %vm79_vm0 = vcmask 261120   ;;  %v64_v0 = vld [vmem:[%s5010_s0] sm:$0xf]  ;;  %v3886_v8 = vld [vmem:[%s5014_s4 + $0x8] sm:$0xff]   ;;  %v68_v17 = vlaneseq }
  0x1a   :  { %v65_v1 = vld [vmem:[%s5010_s0 + $0x4] sm:$0xf]  ;;  %v75_v2 = vunpack.c.l.bf16 %v64_v0  ;;  %v4082_v9 = vmov 0.0   ;;  %vm4083_vm1 = vmmov 0   ;;  %v74_v19 = vld [vmem:[%s5013_s3] sm:$0x1] }
  0x1b   :  { %v76_v3 = vunpack.c.l.bf16 %v65_v1  ;;  %3562 = vmatprep.subr.bf16.mxu1 %v4082_v9  ;;  %3566 = vmatprep.mubr.msk.bf16.mxu1 %vm4083_vm1, %v4082_v9  ;;  %v3887_v10 = vld [vmem:[%s5014_s4] sm:$0xff]   ;;  %v4197_v18 = vshrl.u32 %v68_v17, 7  ;;  %v95_v20 = vunpack.c.l.bf16 %v74_v19  ;;  %s4084_s18 = smov 100   ;;  %s4085_s19 = smov 92   ;;  %vm187_vm2 = vcmask 31744   ;;  %v4237_v42 = vld [vmem:[#allocation5] sm:$0xff] }
  0x1c   :  { %v77_v4 = vmul.f32 %v75_v2, %v75_v2  ;;  %3563 = vmatpush3.bf16.msra.mxu1 %v3886_v8  ;;  %3576 = vmatprep.subr.bf16.mxu0 %v4082_v9  ;;  %v107_v30 = vld [vmem:[%s5015_s5] sm:$0x1]  ;;  %s4086_s20 = smov 4   ;;  %s4087_s21 = smov 32   ;;  %vm276_vm3 = vcmask 64512   ;;  %v71_v19 = vand.u32 127, %v68_v17 }
  0x1d   :  { %v78_v5 = vmul.f32 %v76_v3, %v76_v3  ;;  %3564 = vmatprep.subr.bf16.mxu1 %v4082_v9  ;;  %3578 = vmatprep.mubr.msk.bf16.mxu0 %vm4083_vm1, %v4082_v9  ;;  %v4203_v21 = vsub.s32 0, %v4197_v18  ;;  %v108_v31 = vunpack.c.l.bf16 %v107_v30  ;;  %v4233_v41 = vld [vmem:[#allocation2] sm:$0xff]  ;;  %s4088_s22 = smov 124   ;;  %s4089_s23 = smov 96   ;;  %vm402_vm5 = vcmask 1043456  }
  0x1e   :  { %v80_v6 = vsel %vm79_vm0, %v77_v4, 0.0  ;;  %s4090_s24 = smov 116   ;;  %vm72_vm4 = vcmp.le.s32.totalorder %v71_v19, %v4197_v18  ;;  %s4092_s25 = smov 8   ;;  %vm1578_vm6 = vcmask 523264   ;;  %vm3187_vm7 = vcmask 261127  }
  0x1f   :  { %v83_v7 = vsel %vm79_vm0, %v78_v5, 0.0  ;;  %81 = vadd.xlane.f32.xlu0 %v80_v6  ;;  %v99_v24 = vrot.slane %v95_v20, %v4203_v21  ;;  %v112_v32 = vrot.slane %v108_v31, %v4203_v21  ;;  %v4091_v20 = vmov -1e+30   ;;  %s4093_s26 = smov 80   ;;  %s4094_s27 = smov 120  }
  0x20   :  { %3565 = vmatpush3.bf16.msra.mxu1 %v3887_v10  ;;  %s4095_s28 = smov 84   ;;  %s4096_s1 = smov 108   ;;  %vm3191_vm8 = vcmask 253952   ;;  %vm3320_vm13 = vcmask 1041409  }
  0x21   :  { %3570 = vmatprep.subr.bf16.mxu1 %v4082_v9  ;;  %s4097_s29 = smov 40   ;;  %s4098_s12 = smov 16  }
  0x22   :  { %s4099_s15 = smov 88   ;;  %s5028_s16 = smov 112  }
  0x23   :  { %84 = vadd.xlane.f32.xlu0 %v83_v7  ;;  %s5026_s17 = smov 72   ;;  %s5024_s2 = smov 24  }
  0x24   :  { %s5022_s14 = smov 104   ;;  %s4104_s30 = smov 64  }
  0xa8   :  { %v82_v11 = vpop.xlane.xlu0 %81 }
  0xa9   :  { %v87_v12 = vmul.f32 0.03125, %v82_v11 }
  0xab   :  { %v89_v13 = vadd.f32 1e-06, %v87_v12 }
  0xac   :  { %v85_v14 = vpop.xlane.xlu0 %84 }
  0xad   :  { %3902 = vrsqrt.f32 %v89_v13  ;;  %v88_v15 = vmul.f32 0.03125, %v85_v14 }
  0xaf   :  { %v90_v16 = vadd.f32 1e-06, %v88_v15 }
  0xb1   :  { %3904 = vrsqrt.f32 %v90_v16 }
  0xba   :  { %v3903_v22 = vpop.eup %3902 }
  0xbb   :  { %v93_v23 = vmul.f32 %v3903_v22, %v75_v2  ;;  %v4289_v22 = vsel %vm72_vm4, 0.0, %v4091_v20 }
  0xbd   :  { %v100_v27 = vmul.f32 %v99_v24, %v93_v23 }
  0xbe   :  { %v3905_v25 = vpop.eup %3904 }
  0xbf   :  { %v94_v26 = vmul.f32 %v3905_v25, %v76_v3 }
  0xc1   :  { %v101_v28 = vmul.f32 %v99_v24, %v94_v26 }
  0xc3   :  { %v102_v29 = vpack.c.bf16 %v101_v28, %v100_v27 }
  0xc5   :  { %3567 = vmatmul.mubr.msk.bf16.vlgmr.msra.gmra.mxu1 %vm79_vm0, %v102_v29 }
  0xc6   :  { %3572 = vmatprep.mubr.msk.bf16.mxu1 %vm4083_vm1, %v4082_v9 }
 0x185   :  { %v162_v33 = vpop.f32.mrf.mxu1 }
 0x186   :  { %v4213_v34 = vadd.f32 %v162_v33, %v112_v32 }
 0x187   :  { %v3568_v35 = vpop.f32.mrf.mxu1 }
 0x188   :  { %181 = vrot.lane.b32.xlu0 %v4213_v34, %s4084_s18  ;;  %v4218_v36 = vsub.f32 0.0, %v4213_v34  ;;  %v263_v1 = vmul.f32 %v4213_v34, %v4233_v41 }
 0x189   :  { %v165_v37 = vpop.f32.mrf.mxu1 }
 0x18a   :  { %v4220_v38 = vadd.f32 %v165_v37, %v112_v32  ;;  %173 = vrot.lane.b32.xlu1 %v4218_v36, %s4085_s19 }
 0x18b   :  { %v3569_v39 = vpop.f32.mrf.mxu1 }
 0x18c   :  { %255 = vrot.lane.b32.xlu0 %v4213_v34, %s4086_s20  ;;  %v4227_v40 = vsub.f32 0.0, %v4220_v38  ;;  %v264_v10 = vmul.f32 %v4220_v38, %v4233_v41 }
 0x18e   :  { %175 = vrot.lane.b32.xlu1 %v4227_v40, %s4085_s19 }
 0x192   :  { %183 = vrot.lane.b32.xlu1 %v4220_v38, %s4084_s18 }
 0x196   :  { %191 = vrot.lane.b32.xlu1 %v4233_v41, %s4087_s21 }
 0x1fa   :  { %v182_v43 = vpop.permute.xlu0 %181 }
 0x1fc   :  { %v174_v44 = vpop.permute.xlu1 %173 }
 0x1fd   :  { %v188_v45 = vsel %vm187_vm2, %v174_v44, %v182_v43 }
 0x1fe   :  { %v196_v46 = vmul.f32 %v188_v45, %v4237_v42  ;;  %v256_v61 = vpop.permute.xlu0 %255 }
 0x200   :  { %200 = vrot.lane.b32.xlu1 %v196_v46, %s4087_s21  ;;  %v176_v47 = vpop.permute.xlu1 %175 }
 0x204   :  { %v184_v48 = vpop.permute.xlu1 %183 }
 0x205   :  { %v189_v49 = vsel %vm187_vm2, %v176_v47, %v184_v48 }
 0x206   :  { %v197_v50 = vmul.f32 %v189_v49, %v4237_v42 }
 0x208   :  { %202 = vrot.lane.b32.xlu1 %v197_v50, %s4087_s21  ;;  %v4251_v51 = vpop.permute.xlu1 %191 }
 0x209   :  { %v194_v52 = vmul.f32 %v4251_v51, %v4213_v34  ;;  %v195_v56 = vmul.f32 %v4251_v51, %v4220_v38 }
 0x20c   :  { %249 = vrot.lane.b32.xlu1 %v4218_v36, %s4088_s22 }
 0x210   :  { %251 = vrot.lane.b32.xlu1 %v4227_v40, %s4088_s22 }
 0x214   :  { %257 = vrot.lane.b32.xlu1 %v4220_v38, %s4086_s20 }
 0x272   :  { %v201_v53 = vpop.permute.xlu1 %200 }
 0x273   :  { %v206_v54 = vadd.f32 %v201_v53, %v194_v52 }
 0x275   :  { %v208_v55 = vpack.c.bf16 %v206_v54, %v206_v54 }
 0x277   :  { %274 = vrot.lane.b32.xlu0 %v208_v55, %s4089_s23 }
 0x27a   :  { %v203_v57 = vpop.permute.xlu1 %202 }
 0x27b   :  { %v207_v58 = vadd.f32 %v203_v57, %v195_v56  ;;  %496 = vrot.lane.b32.xlu0 %v4218_v36, %s4090_s24 }
 0x27d   :  { %v209_v59 = vpack.c.bf16 %v207_v58, %v207_v58 }
 0x27e   :  { %v250_v60 = vpop.permute.xlu1 %249 }
 0x27f   :  { %324 = vrot.lane.b32.xlu1 %v209_v59, %s4089_s23  ;;  %v261_v63 = vsel %vm187_vm2, %v250_v60, %v256_v61  ;;  %v4311_v59 = vpack.c.bf16 %v4220_v38, %v4220_v38  ;;  %v4317_v60 = vpack.c.bf16 %v4213_v34, %v4213_v34 }
 0x280   :  { %v265_v0 = vmul.f32 %v261_v63, %v4237_v42 }
 0x282   :  { %v252_v62 = vpop.permute.xlu1 %251  ;;  %v267_v3 = vadd.f32 %v265_v0, %v263_v1 }
 0x283   :  { %498 = vrot.lane.b32.xlu1 %v4227_v40, %s4090_s24 }
 0x284   :  { %v269_v7 = vmul.f32 0.35355338, %v267_v3 }
 0x286   :  { %v258_v2 = vpop.permute.xlu1 %257  ;;  %v271_v11 = vpack.c.bf16 %v269_v7, %v269_v7 }
 0x287   :  { %v262_v4 = vsel %vm187_vm2, %v252_v62, %v258_v2 }
 0x288   :  { %v266_v8 = vmul.f32 %v262_v4, %v4237_v42 }
 0x28a   :  { %v268_v12 = vadd.f32 %v266_v8, %v264_v10 }
 0x28c   :  { %v270_v15 = vmul.f32 0.35355338, %v268_v12 }
 0x28e   :  { %v272_v16 = vpack.c.bf16 %v270_v15, %v270_v15 }
 0x2e9   :  { %v275_v5 = vpop.permute.xlu0 %274 }
 0x2ea   :  { %v4269_v6 = vsel %vm276_vm3, %v275_v5, 0 }
 0x2eb   :  { %3571 = vmatpush3.bf16.xpose.msra.mxu1 %v4269_v6 }
 0x2ec   :  { %3582 = vmatprep.subr.bf16.mxu1 %v4082_v9 }
 0x2ed   :  { %v497_v35 = vpop.permute.xlu0 %496 }
 0x2f1   :  { %v325_v13 = vpop.permute.xlu1 %324 }
 0x2f2   :  { %3573 = vmatmul.mubr.msk.bf16.vlgmr.msra.gmra.mxu1 %vm276_vm3, %v271_v11  ;;  %v4278_v14 = vsel %vm276_vm3, %v325_v13, 0 }
 0x2f3   :  { %3577 = vmatpush3.bf16.xpose.msra.mxu0 %v4278_v14  ;;  %3584 = vmatprep.mubr.msk.bf16.mxu1 %vm4083_vm1, %v4082_v9 }
 0x2f4   :  { %3588 = vmatprep.subr.bf16.mxu0 %v4082_v9 }
 0x2f5   :  { %v499_v39 = vpop.permute.xlu1 %498 }
 0x2fa   :  { %3579 = vmatmul.mubr.msk.bf16.vlgmr.msra.gmra.mxu0 %vm276_vm3, %v272_v16 }
 0x2fb   :  { %3590 = vmatprep.mubr.msk.bf16.mxu0 %vm4083_vm1, %v4082_v9 }
 0x3b2   :  { %v317_v23 = vpop.f32.mrf.mxu1 }
 0x3b3   :  { %v318_v24 = vadd.f32 %v317_v23, %v4289_v22 }
 0x3b4   :  { %v3574_v25 = vpop.f32.mrf.mxu1 }
 0x3b5   :  { %v372_v26 = vsel %vm276_vm3, %v318_v24, -inf }
 0x3b6   :  { %373 = vmax.xlane.f32.xlu0 %v372_v26  ;;  %v320_v27 = vpop.f32.mrf.mxu1 }
 0x3b8   :  { %v3575_v28 = vpop.f32.mrf.mxu1 }
 0x3ba   :  { %v366_v29 = vpop.f32.mrf.mxu0 }
 0x3bb   :  { %v367_v30 = vadd.f32 %v366_v29, %v4289_v22 }
 0x3bc   :  { %v3580_v31 = vpop.f32.mrf.mxu0 }
 0x3bd   :  { %v375_v17 = vsel %vm276_vm3, %v367_v30, -inf }
 0x3be   :  { %376 = vmax.xlane.f32.xlu1 %v375_v17  ;;  %v369_v32 = vpop.f32.mrf.mxu0 }
 0x3c0   :  { %v3581_v33 = vpop.f32.mrf.mxu0 }
 0x3cc   :  { %502 = vrot.lane.b32.xlu0 %v4213_v34, %s4088_s22 }
 0x3cf   :  { %504 = vrot.lane.b32.xlu1 %v4220_v38, %s4088_s22 }
 0x3d0   :  { %510 = vrot.lane.b32.xlu0 %v4233_v41, %s4092_s25 }
 0x43f   :  { %v374_v37 = vpop.xlane.xlu0 %373 }
 0x440   :  { %v378_v50 = vsub.f32 %v318_v24, %v374_v37 }
 0x442   :  { %v380_v53 = vmul.f32 1.442695, %v378_v50 }
 0x443   :  { %v503_v43 = vpop.permute.xlu0 %502 }
 0x444   :  { %v508_v44 = vsel %vm187_vm2, %v497_v35, %v503_v43  ;;  %3906 = vpow2.f32 %v380_v53 }
 0x445   :  { %v515_v45 = vmul.f32 %v508_v44, %v4237_v42 }
 0x447   :  { %v377_v46 = vpop.xlane.xlu1 %376  ;;  %519 = vrot.lane.b32.xlu1 %v515_v45, %s4092_s25  ;;  %v4321_v61 = vpop.permute.xlu0 %510 }
 0x448   :  { %v379_v52 = vsub.f32 %v367_v30, %v377_v46  ;;  %v513_v62 = vmul.f32 %v4321_v61, %v4213_v34  ;;  %v514_v3 = vmul.f32 %v4321_v61, %v4220_v38 }
 0x44a   :  { %v382_v54 = vmul.f32 1.442695, %v379_v52 }
 0x44b   :  { %v505_v47 = vpop.permute.xlu1 %504 }
 0x44c   :  { %v509_v48 = vsel %vm187_vm2, %v499_v39, %v505_v47  ;;  %3908 = vpow2.f32 %v382_v54 }
 0x44d   :  { %v516_v49 = vmul.f32 %v509_v48, %v4237_v42 }
 0x44f   :  { %521 = vrot.lane.b32.xlu0 %v516_v49, %s4092_s25 }
 0x451   :  { %v3907_v55 = vpop.eup %3906 }
 0x452   :  { %v384_v57 = vsel %vm276_vm3, %v3907_v55, 0.0 }
 0x459   :  { %v3909_v56 = vpop.eup %3908 }
 0x45a   :  { %v387_v58 = vsel %vm276_vm3, %v3909_v56, 0.0 }
 0x46b   :  { %385 = vadd.xlane.f32.xlu1 %v384_v57 }
 0x46e   :  { %388 = vadd.xlane.f32.xlu0 %v387_v58 }
 0x47c   :  { %447 = vrot.lane.b32.xlu1 %v4311_v59, %s4093_s26 }
 0x484   :  { %397 = vrot.lane.b32.xlu0 %v4317_v60, %s4093_s26 }
 0x4b9   :  { %v520_v63 = vpop.permute.xlu1 %519 }
 0x4ba   :  { %v525_v0 = vadd.f32 %v520_v63, %v513_v62 }
 0x4bc   :  { %v527_v1 = vmul.f32 0.35355338, %v525_v0 }
 0x4be   :  { %v529_v2 = vpack.c.bf16 %v527_v1, %v527_v1 }
 0x4c0   :  { %532 = vrot.lane.b32.xlu1 %v529_v2, %s4094_s27 }
 0x4c1   :  { %v522_v4 = vpop.permute.xlu0 %521 }
 0x4c2   :  { %v526_v5 = vadd.f32 %v522_v4, %v514_v3 }
 0x4c4   :  { %v528_v7 = vmul.f32 0.35355338, %v526_v5 }
 0x4c6   :  { %v530_v8 = vpack.c.bf16 %v528_v7, %v528_v7 }
 0x4c8   :  { %578 = vrot.lane.b32.xlu0 %v530_v8, %s4094_s27 }
 0x4f4   :  { %v386_v10 = vpop.xlane.xlu1 %385 }
 0x4f5   :  { %3910 = vrcp.f32 %v386_v10 }
 0x4f7   :  { %v389_v11 = vpop.xlane.xlu0 %388 }
 0x4f8   :  { %3912 = vrcp.f32 %v389_v11  ;;  %v448_v12 = vpop.permute.xlu1 %447 }
 0x4f9   :  { %v453_v13 = vsel %vm402_vm5, %v448_v12, 0 }
 0x4fa   :  { %3589 = vmatpush3.bf16.msra.mxu0 %v453_v13 }
 0x4fb   :  { %v398_v15 = vpop.permute.xlu0 %397  ;;  %3600 = vmatprep.subr.bf16.mxu0 %v4082_v9 }
 0x4fc   :  { %v404_v16 = vsel %vm402_vm5, %v398_v15, 0 }
 0x4fd   :  { %3583 = vmatpush3.bf16.msra.mxu1 %v404_v16 }
 0x4fe   :  { %3594 = vmatprep.subr.bf16.mxu1 %v4082_v9 }
 0x502   :  { %v3911_v19 = vpop.eup %3910 }
 0x503   :  { %v392_v20 = vmul.f32 %v3911_v19, %v3907_v55 }
 0x505   :  { %v3913_v23 = vpop.eup %3912  ;;  %v394_v24 = vpack.c.bf16 %v392_v20, %v392_v20 }
 0x506   :  { %v393_v25 = vmul.f32 %v3913_v23, %v3909_v56 }
 0x507   :  { %3585 = vmatmul.mubr.msk.bf16.vlgmr.msra.gmra.mxu1 %vm276_vm3, %v394_v24 }
 0x508   :  { %3595 = vmatpush3.bf16.xpose.msra.mxu1 %v4269_v6  ;;  %v395_v26 = vpack.c.bf16 %v393_v25, %v393_v25  ;;  %3596 = vmatprep.mubr.msk.bf16.mxu1 %vm4083_vm1, %v4082_v9 }
 0x509   :  { %3606 = vmatprep.subr.bf16.mxu1 %v4082_v9 }
 0x50a   :  { %3591 = vmatmul.mubr.msk.bf16.vlgmr.msra.gmra.mxu0 %vm276_vm3, %v395_v26 }
 0x50b   :  { %3601 = vmatpush3.bf16.xpose.msra.mxu0 %v4278_v14  ;;  %3602 = vmatprep.mubr.msk.bf16.mxu0 %vm4083_vm1, %v4082_v9 }
 0x50c   :  { %3612 = vmatprep.subr.bf16.mxu0 %v4082_v9 }
 0x532   :  { %v533_v27 = vpop.permute.xlu1 %532 }
 0x533   :  { %3597 = vmatmul.mubr.msk.bf16.vlgmr.msra.gmra.mxu1 %vm276_vm3, %v533_v27 }
 0x534   :  { %3607 = vmatpush3.bf16.msra.mxu1 %v404_v16  ;;  %3608 = vmatprep.mubr.msk.bf16.mxu1 %vm4083_vm1, %v4082_v9 }
 0x535   :  { %3618 = vmatprep.subr.bf16.mxu1 %v4082_v9 }
 0x53a   :  { %v579_v6 = vpop.permute.xlu0 %578 }
 0x53b   :  { %3603 = vmatmul.mubr.msk.bf16.vlgmr.msra.gmra.mxu0 %vm276_vm3, %v579_v6 }
 0x53c   :  { %3613 = vmatpush3.bf16.msra.mxu0 %v453_v13  ;;  %3614 = vmatprep.mubr.msk.bf16.mxu0 %vm4083_vm1, %v4082_v9 }
 0x53d   :  { %3624 = vmatprep.subr.bf16.mxu0 %v4082_v9 }
 0x5c7   :  { %v4351_v14 = vpop.f32.mrf.mxu1 }
 0x5c9   :  { %v3586_v28 = vpop.f32.mrf.mxu1 }
 0x5ca   :  { %v4353_v29 = vpop.f32.mrf.mxu0  ;;  %v245_v28 = vld [vmem:[%s5016_s6] sm:$0xf] }
 0x5cb   :  { %v495_v30 = vpack.c.bf16 %v4353_v29, %v4351_v14  ;;  %v443_v31 = vpop.f32.mrf.mxu1 }
 0x5cc   :  { %v3592_v17 = vpop.f32.mrf.mxu0 }
 0x5cd   :  { %v3587_v32 = vpop.f32.mrf.mxu1 }
 0x5ce   :  { %v492_v33 = vpop.f32.mrf.mxu0 }
 0x5d0   :  { %v3593_v35 = vpop.f32.mrf.mxu0 }
 0x5f3   :  { %v571_v37 = vpop.f32.mrf.mxu1 }
 0x5f4   :  { %v572_v39 = vadd.f32 %v571_v37, %v4289_v22  ;;  %v785_v37 = vsel %vm402_vm5, %v245_v28, 0 }
 0x5f5   :  { %v3598_v43 = vpop.f32.mrf.mxu1 }
 0x5f6   :  { %v623_v44 = vsel %vm276_vm3, %v572_v39, -inf }
 0x5f7   :  { %624 = vmax.xlane.f32.xlu1 %v623_v44  ;;  %v574_v45 = vpop.f32.mrf.mxu1 }
 0x5f9   :  { %v3599_v46 = vpop.f32.mrf.mxu1 }
 0x5fb   :  { %v617_v47 = vpop.f32.mrf.mxu0 }
 0x5fc   :  { %v618_v48 = vadd.f32 %v617_v47, %v4289_v22 }
 0x5fd   :  { %v3604_v49 = vpop.f32.mrf.mxu0 }
 0x5fe   :  { %v626_v50 = vsel %vm276_vm3, %v618_v48, -inf }
 0x5ff   :  { %627 = vmax.xlane.f32.xlu0 %v626_v50  ;;  %v620_v52 = vpop.f32.mrf.mxu0 }
 0x601   :  { %v3605_v53 = vpop.f32.mrf.mxu0 }
 0x680   :  { %v625_v54 = vpop.xlane.xlu1 %624 }
 0x681   :  { %v629_v55 = vsub.f32 %v572_v39, %v625_v54  ;;  %v246_v39 = vld [vmem:[%s5016_s6 + $0x4] sm:$0xf] }
 0x682   :  { %v738_v43 = vsel %vm402_vm5, %v246_v39, 0 }
 0x683   :  { %v631_v56 = vmul.f32 1.442695, %v629_v55 }
 0x685   :  { %3914 = vpow2.f32 %v631_v56 }
 0x688   :  { %v628_v57 = vpop.xlane.xlu0 %627 }
 0x689   :  { %v630_v58 = vsub.f32 %v618_v48, %v628_v57 }
 0x68b   :  { %v633_v62 = vmul.f32 1.442695, %v630_v58 }
 0x68d   :  { %3916 = vpow2.f32 %v633_v62 }
 0x692   :  { %v3915_v63 = vpop.eup %3914 }
 0x693   :  { %v635_v0 = vsel %vm276_vm3, %v3915_v63, 0.0 }
 0x694   :  { %636 = vadd.xlane.f32.xlu0 %v635_v0 }
 0x69a   :  { %v3917_v1 = vpop.eup %3916 }
 0x69b   :  { %v638_v2 = vsel %vm276_vm3, %v3917_v1, 0.0 }
 0x69c   :  { %639 = vadd.xlane.f32.xlu1 %v638_v2 }
 0x6aa   :  { %212 = vrot.lane.b32.xlu0 %v4218_v36, %s4095_s28 }
 0x6ad   :  { %214 = vrot.lane.b32.xlu1 %v4227_v40, %s4095_s28 }
 0x6ae   :  { %220 = vrot.lane.b32.xlu0 %v4220_v38, %s4085_s19 }
 0x6b1   :  { %218 = vrot.lane.b32.xlu1 %v4213_v34, %s4085_s19 }
 0x6b2   :  { %830 = vrot.lane.b32.xlu0 %v4227_v40, %s4096_s1 }
 0x6b5   :  { %828 = vrot.lane.b32.xlu1 %v4218_v36, %s4096_s1 }
 0x6b6   :  { %836 = vrot.lane.b32.xlu0 %v4220_v38, %s4090_s24 }
 0x6b9   :  { %834 = vrot.lane.b32.xlu1 %v4213_v34, %s4090_s24 }
 0x6bd   :  { %226 = vrot.lane.b32.xlu1 %v4233_v41, %s4097_s29 }
 0x71d   :  { %v637_v3 = vpop.xlane.xlu0 %636 }
 0x71e   :  { %3918 = vrcp.f32 %v637_v3 }
 0x721   :  { %v213_v4 = vpop.permute.xlu0 %212 }
 0x725   :  { %v221_v5 = vpop.permute.xlu0 %220  ;;  %v640_v7 = vpop.xlane.xlu1 %639 }
 0x726   :  { %3920 = vrcp.f32 %v640_v7 }
 0x729   :  { %v215_v8 = vpop.permute.xlu1 %214  ;;  %v831_v12 = vpop.permute.xlu0 %830 }
 0x72a   :  { %v225_v10 = vsel %vm187_vm2, %v215_v8, %v221_v5 }
 0x72b   :  { %v3919_v11 = vpop.eup %3918  ;;  %v232_v13 = vmul.f32 %v225_v10, %v4237_v42 }
 0x72c   :  { %v643_v15 = vmul.f32 %v3919_v11, %v3915_v63 }
 0x72d   :  { %237 = vrot.lane.b32.xlu1 %v232_v13, %s4097_s29  ;;  %v219_v16 = vpop.permute.xlu1 %218  ;;  %v837_v24 = vpop.permute.xlu0 %836 }
 0x72e   :  { %v224_v19 = vsel %vm187_vm2, %v213_v4, %v219_v16  ;;  %v645_v20 = vpack.c.bf16 %v643_v15, %v643_v15  ;;  %v841_v27 = vsel %vm187_vm2, %v831_v12, %v837_v24 }
 0x72f   :  { %v231_v23 = vmul.f32 %v224_v19, %v4237_v42  ;;  %v848_v33 = vmul.f32 %v841_v27, %v4237_v42 }
 0x730   :  { %3609 = vmatmul.mubr.msk.bf16.vlgmr.msra.gmra.mxu1 %vm276_vm3, %v645_v20 }
 0x731   :  { %235 = vrot.lane.b32.xlu0 %v231_v23, %s4097_s29  ;;  %v829_v25 = vpop.permute.xlu1 %828  ;;  %3620 = vmatprep.mubr.msk.bf16.mxu1 %vm4083_vm1, %v4082_v9 }
 0x732   :  { %3619 = vmatpush3.bf16.msra.mxu1 %v738_v43 }
 0x733   :  { %v3921_v26 = vpop.eup %3920  ;;  %3630 = vmatprep.subr.bf16.mxu1 %v4082_v9 }
 0x734   :  { %v644_v6 = vmul.f32 %v3921_v26, %v3917_v1 }
 0x735   :  { %842 = vrot.lane.b32.xlu0 %v4233_v41, %s4098_s12  ;;  %v835_v31 = vpop.permute.xlu1 %834 }
 0x736   :  { %v840_v17 = vsel %vm187_vm2, %v829_v25, %v835_v31  ;;  %v646_v32 = vpack.c.bf16 %v644_v6, %v644_v6 }
 0x737   :  { %v847_v35 = vmul.f32 %v840_v17, %v4237_v42 }
 0x738   :  { %3615 = vmatmul.mubr.msk.bf16.vlgmr.msra.gmra.mxu0 %vm276_vm3, %v646_v32 }
 0x739   :  { %853 = vrot.lane.b32.xlu0 %v848_v33, %s4098_s12  ;;  %851 = vrot.lane.b32.xlu1 %v847_v35, %s4098_s12  ;;  %v4417_v44 = vpop.permute.xlu1 %226 }
 0x73a   :  { %3625 = vmatpush3.bf16.msra.mxu0 %v785_v37  ;;  %3626 = vmatprep.mubr.msk.bf16.mxu0 %vm4083_vm1, %v4082_v9  ;;  %v230_v45 = vmul.f32 %v4417_v44, %v4220_v38  ;;  %v229_v46 = vmul.f32 %v4417_v44, %v4213_v34 }
 0x73b   :  { %3636 = vmatprep.subr.bf16.mxu0 %v4082_v9 }
 0x740   :  { %3627 = vmatmul.mubr.msk.bf16.vlgmr.msra.gmra.mxu0 %vm276_vm3, %v495_v30 }
 0x741   :  { %3638 = vmatprep.mubr.msk.bf16.mxu0 %vm4083_vm1, %v4082_v9 }
 0x79f   :  { %v238_v14 = vpop.permute.xlu1 %237 }
 0x7a0   :  { %v242_v29 = vadd.f32 %v238_v14, %v230_v45 }
 0x7a2   :  { %v244_v30 = vpack.c.bf16 %v242_v29, %v242_v29 }
 0x7a3   :  { %v236_v47 = vpop.permute.xlu0 %235 }
 0x7a4   :  { %v241_v48 = vadd.f32 %v236_v47, %v229_v46  ;;  %919 = vrot.lane.b32.xlu0 %v244_v30, %s4099_s15 }
 0x7a6   :  { %v243_v49 = vpack.c.bf16 %v241_v48, %v241_v48 }
 0x7a7   :  { %v4424_v50 = vpop.permute.xlu0 %842 }
 0x7a8   :  { %867 = vrot.lane.b32.xlu1 %v243_v49, %s4099_s15  ;;  %v846_v52 = vmul.f32 %v4424_v50, %v4220_v38  ;;  %v845_v53 = vmul.f32 %v4424_v50, %v4213_v34 }
 0x7ab   :  { %v854_v54 = vpop.permute.xlu0 %853  ;;  %v852_v55 = vpop.permute.xlu1 %851 }
 0x7ac   :  { %v858_v56 = vadd.f32 %v854_v54, %v846_v52  ;;  %v857_v57 = vadd.f32 %v852_v55, %v845_v53 }
 0x7ae   :  { %v860_v58 = vmul.f32 0.35355338, %v858_v56  ;;  %v859_v62 = vmul.f32 0.35355338, %v857_v57 }
 0x7b0   :  { %v862_v63 = vpack.c.bf16 %v860_v58, %v860_v58  ;;  %v861_v0 = vpack.c.bf16 %v859_v62, %v859_v62 }
 0x7b2   :  { %916 = vrot.lane.b32.xlu0 %v862_v63, %s5028_s16  ;;  %864 = vrot.lane.b32.xlu1 %v861_v0, %s5028_s16 }
 0x7f0   :  { %v684_v1 = vpop.f32.mrf.mxu1 }
 0x7f2   :  { %v3610_v2 = vpop.f32.mrf.mxu1 }
 0x7f4   :  { %v687_v3 = vpop.f32.mrf.mxu1 }
 0x7f6   :  { %v3611_v4 = vpop.f32.mrf.mxu1 }
 0x7f8   :  { %v727_v5 = vpop.f32.mrf.mxu0 }
 0x7f9   :  { %v733_v7 = vpack.c.bf16 %v727_v5, %v684_v1 }
 0x7fa   :  { %v3616_v8 = vpop.f32.mrf.mxu0 }
 0x7fb   :  { %3621 = vmatmul.mubr.msk.bf16.vlgmr.msra.gmra.mxu1 %vm276_vm3, %v733_v7 }
 0x7fc   :  { %v730_v10 = vpop.f32.mrf.mxu0  ;;  %3632 = vmatprep.mubr.msk.bf16.mxu1 %vm4083_vm1, %v4082_v9 }
 0x7fe   :  { %v3617_v11 = vpop.f32.mrf.mxu0 }
 0x800   :  { %v4436_v12 = vpop.f32.mrf.mxu0 }
 0x802   :  { %v3628_v13 = vpop.f32.mrf.mxu0 }
 0x803   :  { %v247_v13 = vld [vmem:[%s5016_s6 + $0x8] sm:$0xf] }
 0x804   :  { %v4438_v15 = vpop.f32.mrf.mxu0 }
 0x806   :  { %v3629_v16 = vpop.f32.mrf.mxu0 }
 0x816   :  { %v920_v19 = vpop.permute.xlu0 %919 }
 0x817   :  { %v4441_v20 = vsel %vm276_vm3, %v920_v19, 0 }
 0x818   :  { %3637 = vmatpush3.bf16.xpose.msra.mxu0 %v4441_v20 }
 0x819   :  { %3648 = vmatprep.subr.bf16.mxu0 %v4082_v9 }
 0x81a   :  { %v868_v23 = vpop.permute.xlu1 %867 }
 0x81b   :  { %v4446_v24 = vsel %vm276_vm3, %v868_v23, 0 }
 0x81c   :  { %3631 = vmatpush3.bf16.xpose.msra.mxu1 %v4446_v24 }
 0x81d   :  { %3642 = vmatprep.subr.bf16.mxu1 %v4082_v9 }
 0x824   :  { %v917_v25 = vpop.permute.xlu0 %916  ;;  %v865_v26 = vpop.permute.xlu1 %864 }
 0x825   :  { %3633 = vmatmul.mubr.msk.bf16.vlgmr.msra.gmra.mxu1 %vm276_vm3, %v865_v26  ;;  %3639 = vmatmul.mubr.msk.bf16.vlgmr.msra.gmra.mxu0 %vm276_vm3, %v917_v25  ;;  %v1092_v25 = vsel %vm402_vm5, %v247_v13, 0 }
 0x826   :  { %3644 = vmatprep.mubr.msk.bf16.mxu1 %vm4083_vm1, %v4082_v9  ;;  %3650 = vmatprep.mubr.msk.bf16.mxu0 %vm4083_vm1, %v4082_v9 }
 0x8bb   :  { %v4456_v27 = vpop.f32.mrf.mxu1 }
 0x8bd   :  { %v3622_v6 = vpop.f32.mrf.mxu1 }
 0x8bf   :  { %v4458_v28 = vpop.f32.mrf.mxu1 }
 0x8c1   :  { %v3623_v31 = vpop.f32.mrf.mxu1 }
 0x8e5   :  { %v909_v17 = vpop.f32.mrf.mxu1  ;;  %v961_v32 = vpop.f32.mrf.mxu0 }
 0x8e6   :  { %v910_v33 = vadd.f32 %v909_v17, %v4289_v22  ;;  %v962_v35 = vadd.f32 %v961_v32, %v4289_v22 }
 0x8e7   :  { %v3634_v37 = vpop.f32.mrf.mxu1  ;;  %v3640_v39 = vpop.f32.mrf.mxu0 }
 0x8e8   :  { %v970_v43 = vsel %vm276_vm3, %v962_v35, -inf  ;;  %v967_v45 = vsel %vm276_vm3, %v910_v33, -inf }
 0x8e9   :  { %971 = vmax.xlane.f32.xlu0 %v970_v43  ;;  %v964_v14 = vpop.f32.mrf.mxu0  ;;  %968 = vmax.xlane.f32.xlu1 %v967_v45  ;;  %v912_v29 = vpop.f32.mrf.mxu1 }
 0x8eb   :  { %v3635_v30 = vpop.f32.mrf.mxu1  ;;  %v3641_v46 = vpop.f32.mrf.mxu0 }
 0x972   :  { %v972_v47 = vpop.xlane.xlu0 %971  ;;  %v969_v48 = vpop.xlane.xlu1 %968 }
 0x973   :  { %v974_v49 = vsub.f32 %v962_v35, %v972_v47  ;;  %v973_v52 = vsub.f32 %v910_v33, %v969_v48 }
 0x975   :  { %v977_v53 = vmul.f32 1.442695, %v974_v49  ;;  %v975_v54 = vmul.f32 1.442695, %v973_v52 }
 0x977   :  { %3922 = vpow2.f32 %v977_v53 }
 0x978   :  { %3924 = vpow2.f32 %v975_v54 }
 0x984   :  { %v3923_v55 = vpop.eup %3922 }
 0x985   :  { %v3925_v56 = vpop.eup %3924  ;;  %v982_v57 = vsel %vm276_vm3, %v3923_v55, 0.0 }
 0x986   :  { %983 = vadd.xlane.f32.xlu1 %v982_v57  ;;  %v979_v58 = vsel %vm276_vm3, %v3925_v56, 0.0 }
 0x987   :  { %980 = vadd.xlane.f32.xlu0 %v979_v58 }
 0x997   :  { %1039 = vrot.lane.b32.xlu1 %v4311_v59, %s5026_s17 }
 0x99b   :  { %1137 = vrot.lane.b32.xlu1 %v4218_v36, %s4084_s18 }
 0x99d   :  { %991 = vrot.lane.b32.xlu0 %v4317_v60, %s5026_s17 }
 0x99f   :  { %1143 = vrot.lane.b32.xlu1 %v4213_v34, %s4096_s1 }
 0x9a1   :  { %1139 = vrot.lane.b32.xlu0 %v4227_v40, %s4084_s18 }
 0x9a3   :  { %1151 = vrot.lane.b32.xlu1 %v4233_v41, %s5024_s2 }
 0x9a5   :  { %1145 = vrot.lane.b32.xlu0 %v4220_v38, %s4096_s1 }
 0xa0f   :  { %v984_v59 = vpop.xlane.xlu1 %983 }
 0xa10   :  { %v981_v62 = vpop.xlane.xlu0 %980  ;;  %3926 = vrcp.f32 %v984_v59 }
 0xa11   :  { %3928 = vrcp.f32 %v981_v62 }
 0xa13   :  { %v1040_v36 = vpop.permute.xlu1 %1039 }
 0xa14   :  { %v992_v63 = vpop.permute.xlu0 %991  ;;  %v4481_v60 = vsel %vm402_vm5, %v1040_v36, 0 }
 0xa15   :  { %v997_v0 = vsel %vm402_vm5, %v992_v63, 0  ;;  %3649 = vmatpush3.bf16.msra.mxu0 %v4481_v60 }
 0xa16   :  { %3643 = vmatpush3.bf16.msra.mxu1 %v997_v0  ;;  %3660 = vmatprep.subr.bf16.mxu0 %v4082_v9 }
 0xa17   :  { %v1138_v40 = vpop.permute.xlu1 %1137  ;;  %3654 = vmatprep.subr.bf16.mxu1 %v4082_v9 }
 0xa18   :  { %v1140_v41 = vpop.permute.xlu0 %1139 }
 0xa1b   :  { %v1144_v1 = vpop.permute.xlu1 %1143 }
 0xa1c   :  { %v1146_v2 = vpop.permute.xlu0 %1145  ;;  %v1149_v3 = vsel %vm187_vm2, %v1138_v40, %v1144_v1 }
 0xa1d   :  { %v3927_v4 = vpop.eup %3926  ;;  %v1150_v5 = vsel %vm187_vm2, %v1140_v41, %v1146_v2  ;;  %v1156_v7 = vmul.f32 %v1149_v3, %v4237_v42 }
 0xa1e   :  { %v3929_v8 = vpop.eup %3928  ;;  %v1157_v10 = vmul.f32 %v1150_v5, %v4237_v42  ;;  %v988_v11 = vmul.f32 %v3927_v4, %v3923_v55  ;;  %v825_v55 = vadd.f32 %v4438_v15, %v4458_v28 }
 0xa1f   :  { %1160 = vrot.lane.b32.xlu0 %v1156_v7, %s5024_s2  ;;  %v987_v16 = vmul.f32 %v3929_v8, %v3925_v56  ;;  %v4506_v42 = vpop.permute.xlu1 %1151 }
 0xa20   :  { %1162 = vrot.lane.b32.xlu1 %v1157_v10, %s5024_s2  ;;  %v990_v19 = vpack.c.bf16 %v988_v11, %v988_v11  ;;  %v1154_v26 = vmul.f32 %v4506_v42, %v4213_v34 }
 0xa21   :  { %v989_v23 = vpack.c.bf16 %v987_v16, %v987_v16 }
 0xa22   :  { %3651 = vmatmul.mubr.msk.bf16.vlgmr.msra.gmra.mxu0 %vm276_vm3, %v990_v19 }
 0xa23   :  { %3645 = vmatmul.mubr.msk.bf16.vlgmr.msra.gmra.mxu1 %vm276_vm3, %v989_v23  ;;  %3661 = vmatpush3.bf16.xpose.msra.mxu0 %v4446_v24  ;;  %v1155_v24 = vmul.f32 %v4506_v42, %v4220_v38 }
 0xa24   :  { %3655 = vmatpush3.bf16.msra.mxu1 %v1092_v25  ;;  %3656 = vmatprep.mubr.msk.bf16.mxu1 %vm4083_vm1, %v4082_v9 }
 0xa25   :  { %3666 = vmatprep.subr.bf16.mxu1 %v4082_v9  ;;  %3662 = vmatprep.mubr.msk.bf16.mxu0 %vm4083_vm1, %v4082_v9 }
 0xa26   :  { %3672 = vmatprep.subr.bf16.mxu0 %v4082_v9 }
 0xa91   :  { %v1161_v6 = vpop.permute.xlu0 %1160 }
 0xa92   :  { %v1166_v31 = vadd.f32 %v1161_v6, %v1154_v26  ;;  %v1163_v17 = vpop.permute.xlu1 %1162 }
 0xa93   :  { %v1167_v32 = vadd.f32 %v1163_v17, %v1155_v24  ;;  %v248_v17 = vld [vmem:[%s5016_s6 + $0xc] sm:$0xf] }
 0xa94   :  { %v1168_v33 = vmul.f32 0.35355338, %v1166_v31 }
 0xa95   :  { %v1169_v35 = vmul.f32 0.35355338, %v1167_v32  ;;  %v1379_v32 = vsel %vm402_vm5, %v248_v17, 0 }
 0xa96   :  { %v1170_v37 = vpack.c.bf16 %v1168_v33, %v1168_v33 }
 0xa97   :  { %v1171_v39 = vpack.c.bf16 %v1169_v35, %v1169_v35 }
 0xa98   :  { %1173 = vrot.lane.b32.xlu0 %v1170_v37, %s5022_s14 }
 0xa99   :  { %1219 = vrot.lane.b32.xlu1 %v1171_v39, %s5022_s14 }
 0xae2   :  { %v1081_v43 = vpop.f32.mrf.mxu0 }
 0xae3   :  { %v1033_v45 = vpop.f32.mrf.mxu1 }
 0xae4   :  { %v1087_v14 = vpack.c.bf16 %v1081_v43, %v1033_v45  ;;  %v3652_v34 = vpop.f32.mrf.mxu0 }
 0xae5   :  { %v3646_v29 = vpop.f32.mrf.mxu1 }
 0xae6   :  { %3657 = vmatmul.mubr.msk.bf16.vlgmr.msra.gmra.mxu1 %vm276_vm3, %v1087_v14  ;;  %v1084_v38 = vpop.f32.mrf.mxu0 }
 0xae7   :  { %3667 = vmatpush3.bf16.xpose.msra.mxu1 %v4441_v20  ;;  %v1036_v30 = vpop.f32.mrf.mxu1  ;;  %3668 = vmatprep.mubr.msk.bf16.mxu1 %vm4083_vm1, %v4082_v9  ;;  %v822_v20 = vadd.f32 %v4436_v12, %v4456_v27 }
 0xae8   :  { %v3653_v46 = vpop.f32.mrf.mxu0  ;;  %3678 = vmatprep.subr.bf16.mxu1 %v4082_v9 }
 0xae9   :  { %v3647_v47 = vpop.f32.mrf.mxu1 }
 0xb0a   :  { %v1174_v48 = vpop.permute.xlu0 %1173 }
 0xb0b   :  { %v1220_v49 = vpop.permute.xlu1 %1219  ;;  %3663 = vmatmul.mubr.msk.bf16.vlgmr.msra.gmra.mxu0 %vm276_vm3, %v1174_v48 }
 0xb0c   :  { %3669 = vmatmul.mubr.msk.bf16.vlgmr.msra.gmra.mxu1 %vm276_vm3, %v1220_v49  ;;  %3673 = vmatpush3.bf16.msra.mxu0 %v997_v0  ;;  %v4010_v49 = vld [vmem:[%s5010_s0] sm:$0xf] }
 0xb0d   :  { %3679 = vmatpush3.bf16.msra.mxu1 %v4481_v60  ;;  %3674 = vmatprep.mubr.msk.bf16.mxu0 %vm4083_vm1, %v4082_v9 }
 0xb0e   :  { %3680 = vmatprep.mubr.msk.bf16.mxu1 %vm4083_vm1, %v4082_v9  ;;  %3684 = vmatprep.subr.bf16.mxu0 %v4082_v9 }
 0xb0f   :  { %3690 = vmatprep.subr.bf16.mxu1 %v4082_v9 }
 0xba6   :  { %v1128_v52 = vpop.f32.mrf.mxu1 }
 0xba7   :  { %v4530_v53 = vadd.f32 %v1128_v52, %v822_v20 }
 0xba8   :  { %v3658_v54 = vpop.f32.mrf.mxu1 }
 0xbaa   :  { %v1131_v56 = vpop.f32.mrf.mxu1 }
 0xbab   :  { %v4534_v57 = vadd.f32 %v1131_v56, %v825_v55 }
 0xbac   :  { %v3659_v58 = vpop.f32.mrf.mxu1 }
 0xbad   :  { %v4011_v58 = vld [vmem:[%s5010_s0 + $0x4] sm:$0xf] }
 0xbcb   :  { %v1212_v59 = vpop.f32.mrf.mxu0 }
 0xbcc   :  { %v1213_v62 = vadd.f32 %v1212_v59, %v4289_v22  ;;  %v1258_v36 = vpop.f32.mrf.mxu1 }
 0xbcd   :  { %v1259_v63 = vadd.f32 %v1258_v36, %v4289_v22  ;;  %v3664_v60 = vpop.f32.mrf.mxu0 }
 0xbce   :  { %v3670_v0 = vpop.f32.mrf.mxu1  ;;  %v1264_v12 = vsel %vm276_vm3, %v1213_v62, -inf }
 0xbcf   :  { %1265 = vmax.xlane.f32.xlu0 %v1264_v12  ;;  %v1215_v27 = vpop.f32.mrf.mxu0  ;;  %v1267_v40 = vsel %vm276_vm3, %v1259_v63, -inf  ;;  %v3889_v0 = vld [vmem:[%s5018_s8] sm:$0xff]  }
 0xbd0   :  { %1268 = vmax.xlane.f32.xlu1 %v1267_v40  ;;  %v1261_v15 = vpop.f32.mrf.mxu1 }
 0xbd1   :  { %v3665_v28 = vpop.f32.mrf.mxu0 }
 0xbd2   :  { %v3671_v41 = vpop.f32.mrf.mxu1 }
 0xc58   :  { %v1266_v1 = vpop.xlane.xlu0 %1265 }
 0xc59   :  { %v1270_v2 = vsub.f32 %v1213_v62, %v1266_v1  ;;  %v1269_v3 = vpop.xlane.xlu1 %1268  ;;  %v1434_v1 = vld [vmem:[%s5017_s7] sm:$0x1] }
 0xc5a   :  { %v1271_v4 = vsub.f32 %v1259_v63, %v1269_v3 }
 0xc5b   :  { %v1272_v5 = vmul.f32 1.442695, %v1270_v2  ;;  %v1453_v2 = vunpack.c.l.bf16 %v1434_v1  ;;  %v3392_v1 = vld [vmem:[%s5013_s3 + $0x1] sm:$0x1] }
 0xc5c   :  { %v1274_v7 = vmul.f32 1.442695, %v1271_v4 }
 0xc5d   :  { %3930 = vpow2.f32 %v1272_v5  ;;  %v1457_v5 = vrot.slane %v1453_v2, %v4203_v21  ;;  %v1653_v2 = vunpack.c.l.bf16 %v3392_v1 }
 0xc5e   :  { %3932 = vpow2.f32 %v1274_v7 }
 0xc6a   :  { %v3931_v8 = vpop.eup %3930 }
 0xc6b   :  { %v1276_v10 = vsel %vm276_vm3, %v3931_v8, 0.0  ;;  %v3933_v11 = vpop.eup %3932 }
 0xc6c   :  { %1277 = vadd.xlane.f32.xlu0 %v1276_v10  ;;  %v1279_v13 = vsel %vm276_vm3, %v3933_v11, 0.0 }
 0xc70   :  { %1280 = vadd.xlane.f32.xlu0 %v1279_v13 }
 0xcf5   :  { %v1278_v16 = vpop.xlane.xlu0 %1277 }
 0xcf6   :  { %3934 = vrcp.f32 %v1278_v16  ;;  %v3890_v16 = vld [vmem:[%s5019_s9 + $0x18] sm:$0xff]  }
 0xcf9   :  { %v1281_v19 = vpop.xlane.xlu0 %1280 }
 0xcfa   :  { %3936 = vrcp.f32 %v1281_v19  ;;  %v3891_v19 = vld [vmem:[%s5019_s9 + $0x10] sm:$0xff]  }
 0xd03   :  { %v3935_v23 = vpop.eup %3934 }
 0xd04   :  { %v1284_v25 = vmul.f32 %v3935_v23, %v3931_v8  ;;  %v3892_v23 = vld [vmem:[%s5019_s9 + $0x8] sm:$0xff]  }
 0xd06   :  { %v1286_v26 = vpack.c.bf16 %v1284_v25, %v1284_v25  ;;  %v3893_v25 = vld [vmem:[%s5019_s9] sm:$0xff]  }
 0xd07   :  { %v3937_v6 = vpop.eup %3936 }
 0xd08   :  { %3675 = vmatmul.mubr.msk.bf16.vlgmr.msra.gmra.mxu0 %vm276_vm3, %v1286_v26  ;;  %v1285_v24 = vmul.f32 %v3937_v6, %v3933_v11 }
 0xd09   :  { %3686 = vmatprep.mubr.msk.bf16.mxu0 %vm4083_vm1, %v4082_v9  ;;  %3685 = vmatpush3.bf16.msra.mxu0 %v1379_v32 }
 0xd0a   :  { %v1287_v31 = vpack.c.bf16 %v1285_v24, %v1285_v24  ;;  %3698 = vmatprep.subr.bf16.mxu0 %v4082_v9 }
 0xd0c   :  { %3681 = vmatmul.mubr.msk.bf16.vlgmr.msra.gmra.mxu1 %vm276_vm3, %v1287_v31 }
 0xd0d   :  { %3694 = vmatprep.mubr.msk.bf16.mxu1 %vm4083_vm1, %v4082_v9 }
 0xdc8   :  { %v1325_v33 = vpop.f32.mrf.mxu0 }
 0xdca   :  { %v3676_v35 = vpop.f32.mrf.mxu0 }
 0xdcc   :  { %v1328_v37 = vpop.f32.mrf.mxu0  ;;  %v1368_v39 = vpop.f32.mrf.mxu1 }
 0xdcd   :  { %v1374_v43 = vpack.c.bf16 %v1368_v39, %v1325_v33 }
 0xdce   :  { %v3677_v45 = vpop.f32.mrf.mxu0  ;;  %v3682_v14 = vpop.f32.mrf.mxu1 }
 0xdcf   :  { %3687 = vmatmul.mubr.msk.bf16.vlgmr.msra.gmra.mxu0 %vm276_vm3, %v1374_v43 }
 0xdd0   :  { %v1371_v34 = vpop.f32.mrf.mxu1  ;;  %3706 = vmatprep.mubr.msk.bf16.mxu0 %vm4083_vm1, %v4082_v9  ;;  %3699 = vmatpush3.bf16.msra.mxu0 %v3890_v16  ;;  %v3397_v16 = vld [vmem:[%s5015_s5 + $0x1] sm:$0x1] }
 0xdd1   :  { %3700 = vmatprep.subr.bf16.mxu0 %v4082_v9 }
 0xdd2   :  { %v3683_v29 = vpop.f32.mrf.mxu1 }
 0xdd4   :  { %3701 = vmatpush3.bf16.msra.mxu0 %v3891_v19  ;;  %v1668_v19 = vunpack.c.l.bf16 %v3397_v16 }
 0xdd5   :  { %3702 = vmatprep.subr.bf16.mxu0 %v4082_v9 }
 0xdd8   :  { %3703 = vmatpush3.bf16.msra.mxu0 %v3892_v23  ;;  %v1672_v23 = vrot.slane %v1668_v19, %v4203_v21 }
 0xdd9   :  { %3704 = vmatprep.subr.bf16.mxu0 %v4082_v9 }
 0xddc   :  { %3705 = vmatpush3.bf16.msra.mxu0 %v3893_v25 }
 0xddd   :  { %3724 = vmatprep.subr.bf16.mxu0 %v4082_v9 }
 0xe8f   :  { %v1415_v38 = vpop.f32.mrf.mxu0 }
 0xe90   :  { %v1422_v30 = vadd.f32 %v1415_v38, %v4530_v53 }
 0xe91   :  { %v3688_v46 = vpop.f32.mrf.mxu0 }
 0xe92   :  { %v3452_v47 = vpack.c.bf16 %v1422_v30, %v1422_v30 }
 0xe93   :  { %v1418_v48 = vpop.f32.mrf.mxu0 }
 0xe94   :  { %v4560_v20 = vadd.bf16 %v4010_v49, %v3452_v47  ;;  %v1423_v52 = vadd.f32 %v1418_v48, %v4534_v57  ;;  %v3888_v57 = vld [vmem:[%s5018_s8 + $0x8] sm:$0xff]  }
 0xe95   :  { %v3689_v54 = vpop.f32.mrf.mxu0  ;;  %3691 = vmatpush3.bf16.msra.mxu1 %v3888_v57 }
 0xe96   :  { %v3453_v55 = vpack.c.bf16 %v1423_v52, %v1423_v52  ;;  %v1435_v56 = vunpack.c.l.bf16 %v4560_v20  ;;  %3692 = vmatprep.subr.bf16.mxu1 %v4082_v9 }
 0xe98   :  { %v4567_v53 = vadd.bf16 %v4011_v58, %v3453_v55  ;;  %v1437_v59 = vmul.f32 %v1435_v56, %v1435_v56 }
 0xe99   :  { %3693 = vmatpush3.bf16.msra.mxu1 %v3889_v0 }
 0xe9a   :  { %v1439_v62 = vsel %vm79_vm0, %v1437_v59, 0.0  ;;  %v1436_v36 = vunpack.c.l.bf16 %v4567_v53  ;;  %3710 = vmatprep.subr.bf16.mxu1 %v4082_v9 }
 0xe9b   :  { %1440 = vadd.xlane.f32.xlu1 %v1439_v62 }
 0xe9c   :  { %v1438_v63 = vmul.f32 %v1436_v36, %v1436_v36 }
 0xe9e   :  { %v1442_v60 = vsel %vm79_vm0, %v1438_v63, 0.0 }
 0xe9f   :  { %1443 = vadd.xlane.f32.xlu0 %v1442_v60 }
 0xf24   :  { %v1441_v12 = vpop.xlane.xlu1 %1440 }
 0xf25   :  { %v1445_v27 = vmul.f32 0.03125, %v1441_v12 }
 0xf27   :  { %v1447_v40 = vadd.f32 1e-06, %v1445_v27 }
 0xf28   :  { %v1444_v15 = vpop.xlane.xlu0 %1443 }
 0xf29   :  { %3938 = vrsqrt.f32 %v1447_v40  ;;  %v1446_v28 = vmul.f32 0.03125, %v1444_v15 }
 0xf2b   :  { %v1448_v41 = vadd.f32 1e-06, %v1446_v28 }
 0xf2d   :  { %3940 = vrsqrt.f32 %v1448_v41 }
 0xf36   :  { %v3939_v3 = vpop.eup %3938 }
 0xf37   :  { %v1451_v4 = vmul.f32 %v3939_v3, %v1435_v56 }
 0xf39   :  { %v1458_v10 = vmul.f32 %v1457_v5, %v1451_v4 }
 0xf3a   :  { %v3941_v7 = vpop.eup %3940 }
 0xf3b   :  { %v1452_v8 = vmul.f32 %v3941_v7, %v1436_v36 }
 0xf3d   :  { %v1459_v11 = vmul.f32 %v1457_v5, %v1452_v8  ;;  %v1657_v5 = vrot.slane %v1653_v2, %v4203_v21 }
 0xf3f   :  { %v1460_v13 = vpack.c.bf16 %v1459_v11, %v1458_v10 }
 0xf41   :  { %3695 = vmatmul.mubr.msk.bf16.vlgmr.msra.gmra.mxu1 %vm79_vm0, %v1460_v13 }
 0xf42   :  { %3714 = vmatprep.mubr.msk.bf16.mxu1 %vm4083_vm1, %v4082_v9 }
0x1001   :  { %v1514_v26 = vpop.f32.mrf.mxu1 }
0x1002   :  { %1537 = vrot.lane.b32.xlu1 %v1514_v26, %s4104_s30  ;;  %v3383_v17 = vmul.f32 -1.442695, %v1514_v26 }
0x1003   :  { %v3696_v6 = vpop.f32.mrf.mxu1 }
0x1004   :  { %3942 = vpow2.f32 %v3383_v17 }
0x1005   :  { %v1517_v24 = vpop.f32.mrf.mxu1 }
0x1006   :  { %1539 = vrot.lane.b32.xlu0 %v1517_v24, %s4104_s30  ;;  %v3384_v32 = vmul.f32 -1.442695, %v1517_v24 }
0x1007   :  { %v3697_v31 = vpop.f32.mrf.mxu1 }
0x1008   :  { %3944 = vpow2.f32 %v3384_v32 }
0x1011   :  { %v3943_v33 = vpop.eup %3942 }
0x1012   :  { %v1527_v37 = vadd.f32 1.0, %v3943_v33 }
0x1014   :  { %3946 = vrcp.f32 %v1527_v37 }
0x1015   :  { %v3945_v35 = vpop.eup %3944 }
0x1016   :  { %v1528_v39 = vadd.f32 1.0, %v3945_v35 }
0x1018   :  { %3948 = vrcp.f32 %v1528_v39 }
0x1021   :  { %v3947_v43 = vpop.eup %3946 }
0x1022   :  { %v1533_v34 = vmul.f32 %v3947_v43, %v1514_v26  ;;  %v4656_v43 = vld [vmem:[#allocation5] sm:$0xff] }
0x1025   :  { %v3949_v45 = vpop.eup %3948 }
0x1026   :  { %v1534_v29 = vmul.f32 %v3949_v45, %v1517_v24 }
0x1074   :  { %v1538_v14 = vpop.permute.xlu1 %1537 }
0x1075   :  { %v1543_v30 = vmul.f32 %v1538_v14, %v1533_v34 }
0x1078   :  { %v1540_v38 = vpop.permute.xlu0 %1539 }
0x1079   :  { %v1544_v46 = vmul.f32 %v1540_v38, %v1534_v29 }
0x107b   :  { %v1545_v47 = vpack.c.bf16 %v1544_v46, %v1543_v30 }
0x107d   :  { %3707 = vmatmul.mubr.msk.bf16.vlgmr.msra.gmra.mxu0 %vm1578_vm6, %v1545_v47 }
0x107e   :  { %3726 = vmatprep.mubr.msk.bf16.mxu0 %vm4083_vm1, %v4082_v9 }
0x113d   :  { %v1616_v48 = vpop.f32.mrf.mxu0 }
0x113e   :  { %v3454_v49 = vpack.c.bf16 %v1616_v48, %v1616_v48 }
0x113f   :  { %v3708_v52 = vpop.f32.mrf.mxu0 }
0x1140   :  { %v4609_v54 = vadd.bf16 %v3454_v49, %v4560_v20  ;;  %v3894_v20 = vld [vmem:[%s5014_s4 + $0x18] sm:$0xff]  }
0x1141   :  { %v1619_v55 = vpop.f32.mrf.mxu0  ;;  %3711 = vmatpush3.bf16.msra.mxu1 %v3894_v20 }
0x1142   :  { %v3455_v56 = vpack.c.bf16 %v1619_v55, %v1619_v55  ;;  %v1635_v58 = vunpack.c.l.bf16 %v4609_v54  ;;  %3712 = vmatprep.subr.bf16.mxu1 %v4082_v9 }
0x1143   :  { %v3709_v59 = vpop.f32.mrf.mxu0 }
0x1144   :  { %v4613_v62 = vadd.bf16 %v3455_v56, %v4567_v53  ;;  %v1637_v36 = vmul.f32 %v1635_v58, %v1635_v58  ;;  %v3895_v53 = vld [vmem:[%s5014_s4 + $0x10] sm:$0xff]  }
0x1145   :  { %3713 = vmatpush3.bf16.msra.mxu1 %v3895_v53 }
0x1146   :  { %v1639_v63 = vsel %vm79_vm0, %v1637_v36, 0.0  ;;  %v1636_v60 = vunpack.c.l.bf16 %v4613_v62  ;;  %3718 = vmatprep.subr.bf16.mxu1 %v4082_v9 }
0x1147   :  { %1640 = vadd.xlane.f32.xlu1 %v1639_v63 }
0x1148   :  { %v1638_v57 = vmul.f32 %v1636_v60, %v1636_v60 }
0x114a   :  { %v1642_v0 = vsel %vm79_vm0, %v1638_v57, 0.0 }
0x114b   :  { %1643 = vadd.xlane.f32.xlu0 %v1642_v0  ;;  %v4013_v0 = vld [vmem:[#allocation2] sm:$0xff] }
0x11d0   :  { %v1641_v12 = vpop.xlane.xlu1 %1640 }
0x11d1   :  { %v1645_v27 = vmul.f32 0.03125, %v1641_v12 }
0x11d3   :  { %v1647_v40 = vadd.f32 1e-06, %v1645_v27 }
0x11d4   :  { %v1644_v15 = vpop.xlane.xlu0 %1643 }
0x11d5   :  { %3950 = vrsqrt.f32 %v1647_v40  ;;  %v1646_v28 = vmul.f32 0.03125, %v1644_v15 }
0x11d7   :  { %v1648_v41 = vadd.f32 1e-06, %v1646_v28 }
0x11d9   :  { %3952 = vrsqrt.f32 %v1648_v41 }
0x11e2   :  { %v3951_v3 = vpop.eup %3950 }
0x11e3   :  { %v1651_v4 = vmul.f32 %v3951_v3, %v1635_v58 }
0x11e5   :  { %v1658_v10 = vmul.f32 %v1657_v5, %v1651_v4 }
0x11e6   :  { %v3953_v7 = vpop.eup %3952 }
0x11e7   :  { %v1652_v8 = vmul.f32 %v3953_v7, %v1636_v60 }
0x11e9   :  { %v1659_v11 = vmul.f32 %v1657_v5, %v1652_v8 }
0x11eb   :  { %v1660_v13 = vpack.c.bf16 %v1659_v11, %v1658_v10 }
0x11ed   :  { %3715 = vmatmul.mubr.msk.bf16.vlgmr.msra.gmra.mxu1 %vm79_vm0, %v1660_v13 }
0x11ee   :  { %3720 = vmatprep.mubr.msk.bf16.mxu1 %vm4083_vm1, %v4082_v9 }
0x12ad   :  { %v1722_v25 = vpop.f32.mrf.mxu1 }
0x12ae   :  { %v4637_v26 = vadd.f32 %v1722_v25, %v1672_v23 }
0x12af   :  { %v3716_v6 = vpop.f32.mrf.mxu1 }
0x12b0   :  { %v4640_v24 = vsub.f32 0.0, %v4637_v26  ;;  %v1749_v30 = vmul.f32 %v4637_v26, %v4251_v51  ;;  %v1816_v20 = vmul.f32 %v4013_v0, %v4637_v26 }
0x12b1   :  { %v1725_v31 = vpop.f32.mrf.mxu1 }
0x12b2   :  { %v4642_v17 = vadd.f32 %v1725_v31, %v1672_v23  ;;  %1733 = vrot.lane.b32.xlu1 %v4640_v24, %s4085_s19 }
0x12b3   :  { %v3717_v32 = vpop.f32.mrf.mxu1 }
0x12b4   :  { %v4647_v33 = vsub.f32 0.0, %v4642_v17  ;;  %v1750_v49 = vmul.f32 %v4642_v17, %v4251_v51  ;;  %v1817_v40 = vmul.f32 %v4013_v0, %v4642_v17 }
0x12b6   :  { %1741 = vrot.lane.b32.xlu1 %v4637_v26, %s4084_s18  ;;  %1735 = vrot.lane.b32.xlu0 %v4647_v33, %s4085_s19 }
0x12ba   :  { %1743 = vrot.lane.b32.xlu1 %v4642_v17, %s4084_s18 }
0x1324   :  { %v1734_v35 = vpop.permute.xlu1 %1733 }
0x1328   :  { %v1742_v37 = vpop.permute.xlu1 %1741  ;;  %v1736_v14 = vpop.permute.xlu0 %1735 }
0x1329   :  { %v1747_v39 = vsel %vm187_vm2, %v1734_v35, %v1742_v37 }
0x132a   :  { %v1751_v45 = vmul.f32 %v4656_v43, %v1747_v39 }
0x132c   :  { %v1744_v34 = vpop.permute.xlu1 %1743  ;;  %1755 = vrot.lane.b32.xlu0 %v1751_v45, %s4087_s21 }
0x132d   :  { %v1748_v29 = vsel %vm187_vm2, %v1736_v14, %v1744_v34 }
0x132e   :  { %v1752_v38 = vmul.f32 %v4656_v43, %v1748_v29 }
0x1330   :  { %1802 = vrot.lane.b32.xlu0 %v4640_v24, %s4088_s22  ;;  %1757 = vrot.lane.b32.xlu1 %v1752_v38, %s4087_s21  ;;  %s5030_s21 = smov 112  }
0x1334   :  { %1808 = vrot.lane.b32.xlu0 %v4637_v26, %s4086_s20  ;;  %1804 = vrot.lane.b32.xlu1 %v4647_v33, %s4088_s22 }
0x1338   :  { %1810 = vrot.lane.b32.xlu1 %v4642_v17, %s4086_s20 }
0x139e   :  { %v1756_v46 = vpop.permute.xlu0 %1755 }
0x139f   :  { %v1761_v47 = vadd.f32 %v1756_v46, %v1749_v30 }
0x13a1   :  { %v1763_v48 = vpack.c.bf16 %v1761_v47, %v1761_v47 }
0x13a2   :  { %v1758_v52 = vpop.permute.xlu1 %1757  ;;  %v1803_v58 = vpop.permute.xlu0 %1802 }
0x13a3   :  { %v1762_v55 = vadd.f32 %v1758_v52, %v1750_v49  ;;  %1827 = vrot.lane.b32.xlu0 %v1763_v48, %s4089_s23 }
0x13a5   :  { %v1764_v56 = vpack.c.bf16 %v1762_v55, %v1762_v55 }
0x13a6   :  { %v1805_v59 = vpop.permute.xlu1 %1804  ;;  %v1809_v36 = vpop.permute.xlu0 %1808 }
0x13a7   :  { %1876 = vrot.lane.b32.xlu1 %v1764_v56, %s4089_s23  ;;  %2047 = vrot.lane.b32.xlu0 %v4640_v24, %s4090_s24  ;;  %v1814_v63 = vsel %vm187_vm2, %v1803_v58, %v1809_v36  ;;  %v4721_v36 = vpack.c.bf16 %v4637_v26, %v4637_v26  ;;  %s5033_s23 = smov 104  }
0x13a8   :  { %v1818_v51 = vmul.f32 %v4656_v43, %v1814_v63  ;;  %v4727_v63 = vpack.c.bf16 %v4642_v17, %v4642_v17 }
0x13aa   :  { %v1811_v60 = vpop.permute.xlu1 %1810  ;;  %v1820_v53 = vadd.f32 %v1818_v51, %v1816_v20  ;;  %v2062_v20 = vmul.f32 %v4642_v17, %v4321_v61 }
0x13ab   :  { %2049 = vrot.lane.b32.xlu1 %v4647_v33, %s4090_s24  ;;  %v1815_v57 = vsel %vm187_vm2, %v1805_v59, %v1811_v60  ;;  %v2061_v60 = vmul.f32 %v4637_v26, %v4321_v61 }
0x13ac   :  { %v1819_v12 = vmul.f32 %v4656_v43, %v1815_v57  ;;  %v1822_v28 = vmul.f32 0.35355338, %v1820_v53 }
0x13ae   :  { %v1821_v41 = vadd.f32 %v1819_v12, %v1817_v40  ;;  %v1824_v3 = vpack.c.bf16 %v1822_v28, %v1822_v28 }
0x13b0   :  { %v1823_v4 = vmul.f32 0.35355338, %v1821_v41 }
0x13b2   :  { %v1825_v5 = vpack.c.bf16 %v1823_v4, %v1823_v4 }
0x1415   :  { %v1828_v27 = vpop.permute.xlu0 %1827 }
0x1416   :  { %v4688_v15 = vsel %vm276_vm3, %v1828_v27, 0 }
0x1417   :  { %3719 = vmatpush3.bf16.xpose.msra.mxu1 %v4688_v15 }
0x1418   :  { %3730 = vmatprep.subr.bf16.mxu1 %v4082_v9 }
0x1419   :  { %v1877_v1 = vpop.permute.xlu1 %1876  ;;  %v2048_v35 = vpop.permute.xlu0 %2047 }
0x141a   :  { %v4693_v2 = vsel %vm276_vm3, %v1877_v1, 0 }
0x141b   :  { %3725 = vmatpush3.bf16.xpose.msra.mxu0 %v4693_v2 }
0x141c   :  { %3736 = vmatprep.subr.bf16.mxu0 %v4082_v9 }
0x141d   :  { %v2050_v37 = vpop.permute.xlu1 %2049 }
0x141e   :  { %3721 = vmatmul.mubr.msk.bf16.vlgmr.msra.gmra.mxu1 %vm276_vm3, %v1824_v3 }
0x141f   :  { %3732 = vmatprep.mubr.msk.bf16.mxu1 %vm4083_vm1, %v4082_v9 }
0x1422   :  { %3727 = vmatmul.mubr.msk.bf16.vlgmr.msra.gmra.mxu0 %vm276_vm3, %v1825_v5 }
0x1423   :  { %3738 = vmatprep.mubr.msk.bf16.mxu0 %vm4083_vm1, %v4082_v9 }
0x14de   :  { %v1869_v7 = vpop.f32.mrf.mxu1 }
0x14df   :  { %v1870_v8 = vadd.f32 %v1869_v7, %v4289_v22 }
0x14e0   :  { %v3722_v10 = vpop.f32.mrf.mxu1 }
0x14e1   :  { %v1924_v11 = vsel %vm276_vm3, %v1870_v8, -inf }
0x14e2   :  { %v1918_v13 = vpop.f32.mrf.mxu0  ;;  %1925 = vmax.xlane.f32.xlu0 %v1924_v11  ;;  %v1872_v16 = vpop.f32.mrf.mxu1 }
0x14e3   :  { %v1919_v19 = vadd.f32 %v1918_v13, %v4289_v22 }
0x14e4   :  { %v3723_v23 = vpop.f32.mrf.mxu1  ;;  %v3728_v25 = vpop.f32.mrf.mxu0 }
0x14e5   :  { %v1927_v6 = vsel %vm276_vm3, %v1919_v19, -inf }
0x14e6   :  { %1928 = vmax.xlane.f32.xlu1 %v1927_v6  ;;  %v1921_v31 = vpop.f32.mrf.mxu0 }
0x14e8   :  { %v3729_v32 = vpop.f32.mrf.mxu0 }
0x14f7   :  { %2055 = vrot.lane.b32.xlu1 %v4642_v17, %s4088_s22 }
0x14f8   :  { %2053 = vrot.lane.b32.xlu0 %v4637_v26, %s4088_s22  ;;  %s5031_s22 = smov 72  }
0x156b   :  { %v1926_v39 = vpop.xlane.xlu0 %1925 }
0x156c   :  { %v1930_v47 = vsub.f32 %v1870_v8, %v1926_v39 }
0x156e   :  { %v1932_v48 = vmul.f32 1.442695, %v1930_v47 }
0x156f   :  { %v1929_v45 = vpop.xlane.xlu1 %1928  ;;  %v2054_v14 = vpop.permute.xlu0 %2053 }
0x1570   :  { %v2059_v34 = vsel %vm187_vm2, %v2048_v35, %v2054_v14  ;;  %3954 = vpow2.f32 %v1932_v48  ;;  %v1931_v49 = vsub.f32 %v1919_v19, %v1929_v45 }
0x1571   :  { %v2063_v29 = vmul.f32 %v4656_v43, %v2059_v34 }
0x1572   :  { %v1934_v52 = vmul.f32 1.442695, %v1931_v49 }
0x1573   :  { %v2056_v38 = vpop.permute.xlu1 %2055  ;;  %2067 = vrot.lane.b32.xlu0 %v2063_v29, %s4092_s25 }
0x1574   :  { %v2060_v30 = vsel %vm187_vm2, %v2050_v37, %v2056_v38  ;;  %3956 = vpow2.f32 %v1934_v52 }
0x1575   :  { %v2064_v46 = vmul.f32 %v4656_v43, %v2060_v30 }
0x1577   :  { %2069 = vrot.lane.b32.xlu1 %v2064_v46, %s4092_s25 }
0x157d   :  { %v3955_v55 = vpop.eup %3954 }
0x157e   :  { %v1936_v56 = vsel %vm276_vm3, %v3955_v55, 0.0 }
0x1581   :  { %v3957_v58 = vpop.eup %3956 }
0x1582   :  { %v1939_v59 = vsel %vm276_vm3, %v3957_v58, 0.0 }
0x1592   :  { %1937 = vadd.xlane.f32.xlu0 %v1936_v56 }
0x159b   :  { %1940 = vadd.xlane.f32.xlu1 %v1939_v59 }
0x15a8   :  { %1949 = vrot.lane.b32.xlu0 %v4721_v36, %s4093_s26 }
0x15ac   :  { %1998 = vrot.lane.b32.xlu1 %v4727_v63, %s4093_s26 }
0x15e5   :  { %v2068_v51 = vpop.permute.xlu0 %2067 }
0x15e6   :  { %v2073_v57 = vadd.f32 %v2068_v51, %v2061_v60 }
0x15e8   :  { %v2075_v0 = vmul.f32 0.35355338, %v2073_v57 }
0x15e9   :  { %v2070_v53 = vpop.permute.xlu1 %2069 }
0x15ea   :  { %v2077_v12 = vpack.c.bf16 %v2075_v0, %v2075_v0  ;;  %v2074_v27 = vadd.f32 %v2070_v53, %v2062_v20 }
0x15ec   :  { %v2076_v40 = vmul.f32 0.35355338, %v2074_v27  ;;  %2080 = vrot.lane.b32.xlu0 %v2077_v12, %s4094_s27 }
0x15ee   :  { %v2078_v28 = vpack.c.bf16 %v2076_v40, %v2076_v40 }
0x15f0   :  { %2126 = vrot.lane.b32.xlu1 %v2078_v28, %s4094_s27 }
0x161b   :  { %v1938_v41 = vpop.xlane.xlu0 %1937 }
0x161c   :  { %3958 = vrcp.f32 %v1938_v41 }
0x161f   :  { %v1950_v1 = vpop.permute.xlu0 %1949 }
0x1620   :  { %v1955_v3 = vsel %vm402_vm5, %v1950_v1, 0 }
0x1621   :  { %3731 = vmatpush3.bf16.msra.mxu1 %v1955_v3 }
0x1622   :  { %3742 = vmatprep.subr.bf16.mxu1 %v4082_v9 }
0x1624   :  { %v1941_v4 = vpop.xlane.xlu1 %1940 }
0x1625   :  { %3960 = vrcp.f32 %v1941_v4 }
0x1628   :  { %v1999_v61 = vpop.permute.xlu1 %1998 }
0x1629   :  { %v3959_v5 = vpop.eup %3958  ;;  %v2004_v7 = vsel %vm402_vm5, %v1999_v61, 0 }
0x162a   :  { %3737 = vmatpush3.bf16.msra.mxu0 %v2004_v7  ;;  %v1944_v8 = vmul.f32 %v3959_v5, %v3955_v55 }
0x162b   :  { %3748 = vmatprep.subr.bf16.mxu0 %v4082_v9 }
0x162c   :  { %v1946_v10 = vpack.c.bf16 %v1944_v8, %v1944_v8 }
0x162e   :  { %3733 = vmatmul.mubr.msk.bf16.vlgmr.msra.gmra.mxu1 %vm276_vm3, %v1946_v10 }
0x162f   :  { %3743 = vmatpush3.bf16.xpose.msra.mxu1 %v4688_v15  ;;  %3744 = vmatprep.mubr.msk.bf16.mxu1 %vm4083_vm1, %v4082_v9 }
0x1630   :  { %3754 = vmatprep.subr.bf16.mxu1 %v4082_v9 }
0x1632   :  { %v3961_v11 = vpop.eup %3960 }
0x1633   :  { %v1945_v13 = vmul.f32 %v3961_v11, %v3957_v58 }
0x1635   :  { %v1947_v16 = vpack.c.bf16 %v1945_v13, %v1945_v13 }
0x1637   :  { %3739 = vmatmul.mubr.msk.bf16.vlgmr.msra.gmra.mxu0 %vm276_vm3, %v1947_v16 }
0x1638   :  { %3749 = vmatpush3.bf16.xpose.msra.mxu0 %v4693_v2  ;;  %3750 = vmatprep.mubr.msk.bf16.mxu0 %vm4083_vm1, %v4082_v9 }
0x1639   :  { %3760 = vmatprep.subr.bf16.mxu0 %v4082_v9 }
0x165e   :  { %v2081_v19 = vpop.permute.xlu0 %2080 }
0x165f   :  { %3745 = vmatmul.mubr.msk.bf16.vlgmr.msra.gmra.mxu1 %vm276_vm3, %v2081_v19 }
0x1660   :  { %3755 = vmatpush3.bf16.msra.mxu1 %v1955_v3  ;;  %3756 = vmatprep.mubr.msk.bf16.mxu1 %vm4083_vm1, %v4082_v9 }
0x1661   :  { %3766 = vmatprep.subr.bf16.mxu1 %v4082_v9 }
0x1662   :  { %v2127_v15 = vpop.permute.xlu1 %2126 }
0x1663   :  { %3751 = vmatmul.mubr.msk.bf16.vlgmr.msra.gmra.mxu0 %vm276_vm3, %v2127_v15 }
0x1664   :  { %3761 = vmatpush3.bf16.msra.mxu0 %v2004_v7  ;;  %3762 = vmatprep.mubr.msk.bf16.mxu0 %vm4083_vm1, %v4082_v9 }
0x1665   :  { %3772 = vmatprep.subr.bf16.mxu0 %v4082_v9 }
0x16ee   :  { %v4759_v2 = vpop.f32.mrf.mxu1 }
0x16f0   :  { %v3734_v23 = vpop.f32.mrf.mxu1 }
0x16f2   :  { %v1994_v25 = vpop.f32.mrf.mxu1 }
0x16f4   :  { %v3735_v6 = vpop.f32.mrf.mxu1 }
0x16f7   :  { %v4761_v31 = vpop.f32.mrf.mxu0 }
0x16f8   :  { %v2046_v32 = vpack.c.bf16 %v4761_v31, %v4759_v2  ;;  %v2391_v31 = vmul.f32 %v4642_v17, %v4424_v50 }
0x16f9   :  { %v3740_v35 = vpop.f32.mrf.mxu0 }
0x16fb   :  { %v2043_v37 = vpop.f32.mrf.mxu0 }
0x16fd   :  { %v3741_v39 = vpop.f32.mrf.mxu0 }
0x16fe   :  { %v3401_v39 = vld [vmem:[%s5016_s6 + $0x10] sm:$0xf] }
0x171f   :  { %v2119_v45 = vpop.f32.mrf.mxu1 }
0x1720   :  { %v2120_v14 = vadd.f32 %v2119_v45, %v4289_v22  ;;  %v1781_v45 = vmul.f32 %v4637_v26, %v4417_v44 }
0x1721   :  { %v3746_v34 = vpop.f32.mrf.mxu1 }
0x1722   :  { %v2171_v29 = vsel %vm276_vm3, %v2120_v14, -inf }
0x1723   :  { %v2165_v38 = vpop.f32.mrf.mxu0  ;;  %2172 = vmax.xlane.f32.xlu0 %v2171_v29  ;;  %v2122_v30 = vpop.f32.mrf.mxu1 }
0x1724   :  { %v2166_v46 = vadd.f32 %v2165_v38, %v4289_v22  ;;  %v2333_v30 = vsel %vm402_vm5, %v3401_v39, 0 }
0x1725   :  { %v3747_v47 = vpop.f32.mrf.mxu1  ;;  %v3752_v48 = vpop.f32.mrf.mxu0 }
0x1726   :  { %v2174_v49 = vsel %vm276_vm3, %v2166_v46, -inf  ;;  %v3402_v47 = vld [vmem:[%s5016_s6 + $0x14] sm:$0xf] }
0x1727   :  { %2175 = vmax.xlane.f32.xlu1 %v2174_v49  ;;  %v2168_v52 = vpop.f32.mrf.mxu0  ;;  %v2286_v48 = vsel %vm402_vm5, %v3402_v47, 0  ;;  %v1782_v49 = vmul.f32 %v4642_v17, %v4417_v44 }
0x1729   :  { %v3753_v55 = vpop.f32.mrf.mxu0 }
0x1738   :  { %1767 = vrot.lane.b32.xlu1 %v4640_v24, %s4095_s28 }
0x173c   :  { %1773 = vrot.lane.b32.xlu1 %v4637_v26, %s4085_s19 }
0x1740   :  { %1775 = vrot.lane.b32.xlu1 %v4642_v17, %s4085_s19 }
0x1744   :  { %2378 = vrot.lane.b32.xlu1 %v4647_v33, %s4096_s1 }
0x1748   :  { %2384 = vrot.lane.b32.xlu1 %v4642_v17, %s4090_s24 }
0x17ac   :  { %v2173_v56 = vpop.xlane.xlu0 %2172 }
0x17ad   :  { %v2177_v58 = vsub.f32 %v2120_v14, %v2173_v56 }
0x17af   :  { %v2179_v59 = vmul.f32 1.442695, %v2177_v58 }
0x17b0   :  { %v2176_v60 = vpop.xlane.xlu1 %2175 }
0x17b1   :  { %3962 = vpow2.f32 %v2179_v59  ;;  %v2178_v51 = vsub.f32 %v2166_v46, %v2176_v60  ;;  %v2390_v59 = vmul.f32 %v4637_v26, %v4424_v50 }
0x17b3   :  { %v2181_v57 = vmul.f32 1.442695, %v2178_v51 }
0x17b4   :  { %v1768_v27 = vpop.permute.xlu1 %1767 }
0x17b5   :  { %3964 = vpow2.f32 %v2181_v57 }
0x17b8   :  { %v1774_v40 = vpop.permute.xlu1 %1773 }
0x17b9   :  { %v1779_v28 = vsel %vm187_vm2, %v1768_v27, %v1774_v40 }
0x17ba   :  { %v1783_v41 = vmul.f32 %v4656_v43, %v1779_v28 }
0x17bc   :  { %v1776_v1 = vpop.permute.xlu1 %1775 }
0x17be   :  { %v3963_v0 = vpop.eup %3962 }
0x17bf   :  { %v2183_v20 = vsel %vm276_vm3, %v3963_v0, 0.0 }
0x17c0   :  { %2184 = vadd.xlane.f32.xlu0 %v2183_v20  ;;  %v2379_v4 = vpop.permute.xlu1 %2378 }
0x17c2   :  { %v3965_v53 = vpop.eup %3964 }
0x17c3   :  { %v2186_v12 = vsel %vm276_vm3, %v3965_v53, 0.0 }
0x17c4   :  { %2187 = vadd.xlane.f32.xlu0 %v2186_v12  ;;  %v2385_v5 = vpop.permute.xlu1 %2384 }
0x17c5   :  { %v2389_v11 = vsel %vm187_vm2, %v2379_v4, %v2385_v5 }
0x17c6   :  { %v2393_v19 = vmul.f32 %v4656_v43, %v2389_v11 }
0x17da   :  { %1769 = vrot.lane.b32.xlu0 %v4647_v33, %s4095_s28 }
0x17de   :  { %2376 = vrot.lane.b32.xlu0 %v4640_v24, %s4096_s1 }
0x17e2   :  { %2382 = vrot.lane.b32.xlu0 %v4637_v26, %s4090_s24 }
0x17e6   :  { %1787 = vrot.lane.b32.xlu0 %v1783_v41, %s4097_s29 }
0x1849   :  { %v2185_v3 = vpop.xlane.xlu0 %2184 }
0x184a   :  { %3966 = vrcp.f32 %v2185_v3 }
0x184d   :  { %v2188_v61 = vpop.xlane.xlu0 %2187 }
0x184e   :  { %3968 = vrcp.f32 %v2188_v61 }
0x1851   :  { %v1770_v7 = vpop.permute.xlu0 %1769 }
0x1852   :  { %v1780_v8 = vsel %vm187_vm2, %v1770_v7, %v1776_v1 }
0x1853   :  { %v1784_v10 = vmul.f32 %v4656_v43, %v1780_v8 }
0x1855   :  { %1789 = vrot.lane.b32.xlu1 %v1784_v10, %s4097_s29  ;;  %v2377_v13 = vpop.permute.xlu0 %2376 }
0x1857   :  { %v3967_v16 = vpop.eup %3966 }
0x1858   :  { %v2191_v15 = vmul.f32 %v3967_v16, %v3963_v0 }
0x1859   :  { %2398 = vrot.lane.b32.xlu1 %v2393_v19, %s4098_s12  ;;  %v2383_v23 = vpop.permute.xlu0 %2382 }
0x185a   :  { %v2388_v25 = vsel %vm187_vm2, %v2377_v13, %v2383_v23  ;;  %v2193_v6 = vpack.c.bf16 %v2191_v15, %v2191_v15 }
0x185b   :  { %v3969_v35 = vpop.eup %3968  ;;  %v2392_v37 = vmul.f32 %v4656_v43, %v2388_v25 }
0x185c   :  { %3757 = vmatmul.mubr.msk.bf16.vlgmr.msra.gmra.mxu1 %vm276_vm3, %v2193_v6  ;;  %v2192_v14 = vmul.f32 %v3969_v35, %v3965_v53 }
0x185d   :  { %2396 = vrot.lane.b32.xlu0 %v2392_v37, %s4098_s12  ;;  %v1788_v34 = vpop.permute.xlu0 %1787  ;;  %3768 = vmatprep.mubr.msk.bf16.mxu1 %vm4083_vm1, %v4082_v9 }
0x185e   :  { %v1793_v29 = vadd.f32 %v1788_v34, %v1781_v45  ;;  %v2194_v38 = vpack.c.bf16 %v2192_v14, %v2192_v14  ;;  %3767 = vmatpush3.bf16.msra.mxu1 %v2286_v48 }
0x185f   :  { %3778 = vmatprep.subr.bf16.mxu1 %v4082_v9 }
0x1860   :  { %v1795_v46 = vpack.c.bf16 %v1793_v29, %v1793_v29  ;;  %3763 = vmatmul.mubr.msk.bf16.vlgmr.msra.gmra.mxu0 %vm276_vm3, %v2194_v38 }
0x1861   :  { %3773 = vmatpush3.bf16.msra.mxu0 %v2333_v30  ;;  %3774 = vmatprep.mubr.msk.bf16.mxu0 %vm4083_vm1, %v4082_v9 }
0x1862   :  { %2412 = vrot.lane.b32.xlu0 %v1795_v46, %s4099_s15  ;;  %3784 = vmatprep.subr.bf16.mxu0 %v4082_v9 }
0x1868   :  { %3775 = vmatmul.mubr.msk.bf16.vlgmr.msra.gmra.mxu0 %vm276_vm3, %v2046_v32 }
0x1869   :  { %3786 = vmatprep.mubr.msk.bf16.mxu0 %vm4083_vm1, %v4082_v9 }
0x18c7   :  { %v1790_v52 = vpop.permute.xlu1 %1789 }
0x18c8   :  { %v1794_v55 = vadd.f32 %v1790_v52, %v1782_v49 }
0x18ca   :  { %v1796_v2 = vpack.c.bf16 %v1794_v55, %v1794_v55 }
0x18cb   :  { %v2399_v32 = vpop.permute.xlu1 %2398 }
0x18cc   :  { %v2403_v56 = vadd.f32 %v2399_v32, %v2391_v31  ;;  %2464 = vrot.lane.b32.xlu1 %v1796_v2, %s4099_s15 }
0x18ce   :  { %v2405_v58 = vmul.f32 0.35355338, %v2403_v56 }
0x18cf   :  { %v2397_v60 = vpop.permute.xlu0 %2396 }
0x18d0   :  { %v2407_v51 = vpack.c.bf16 %v2405_v58, %v2405_v58  ;;  %v2402_v57 = vadd.f32 %v2397_v60, %v2390_v59 }
0x18d2   :  { %v2404_v0 = vmul.f32 0.35355338, %v2402_v57  ;;  %2461 = vrot.lane.b32.xlu1 %v2407_v51, %s5030_s21 }
0x18d4   :  { %v2406_v44 = vpack.c.bf16 %v2404_v0, %v2404_v0  ;;  %v2413_v12 = vpop.permute.xlu0 %2412 }
0x18d5   :  { %v4834_v3 = vsel %vm276_vm3, %v2413_v12, 0 }
0x18d6   :  { %2409 = vrot.lane.b32.xlu0 %v2406_v44, %s5030_s21  ;;  %v2697_v44 = vmul.f32 %v4642_v17, %v4506_v42 }
0x191c   :  { %v2232_v20 = vpop.f32.mrf.mxu1 }
0x191e   :  { %v3758_v53 = vpop.f32.mrf.mxu1 }
0x1920   :  { %v2235_v27 = vpop.f32.mrf.mxu1  ;;  %v2275_v40 = vpop.f32.mrf.mxu0 }
0x1921   :  { %v2281_v28 = vpack.c.bf16 %v2275_v40, %v2232_v20 }
0x1922   :  { %v3759_v41 = vpop.f32.mrf.mxu1  ;;  %v3764_v1 = vpop.f32.mrf.mxu0 }
0x1923   :  { %3769 = vmatmul.mubr.msk.bf16.vlgmr.msra.gmra.mxu1 %vm276_vm3, %v2281_v28 }
0x1924   :  { %3779 = vmatpush3.bf16.xpose.msra.mxu1 %v4834_v3  ;;  %v2278_v50 = vpop.f32.mrf.mxu0  ;;  %3780 = vmatprep.mubr.msk.bf16.mxu1 %vm4083_vm1, %v4082_v9 }
0x1925   :  { %3790 = vmatprep.subr.bf16.mxu1 %v4082_v9 }
0x1926   :  { %v3765_v4 = vpop.f32.mrf.mxu0 }
0x1928   :  { %v4841_v61 = vpop.f32.mrf.mxu0 }
0x192a   :  { %v3776_v5 = vpop.f32.mrf.mxu0 }
0x192c   :  { %v4843_v7 = vpop.f32.mrf.mxu0 }
0x192e   :  { %v3777_v8 = vpop.f32.mrf.mxu0 }
0x193e   :  { %v2465_v10 = vpop.permute.xlu1 %2464 }
0x193f   :  { %v4846_v11 = vsel %vm276_vm3, %v2465_v10, 0 }
0x1940   :  { %3785 = vmatpush3.bf16.xpose.msra.mxu0 %v4846_v11 }
0x1941   :  { %3796 = vmatprep.subr.bf16.mxu0 %v4082_v9 }
0x1944   :  { %v2462_v13 = vpop.permute.xlu1 %2461 }
0x1947   :  { %3787 = vmatmul.mubr.msk.bf16.vlgmr.msra.gmra.mxu0 %vm276_vm3, %v2462_v13 }
0x1948   :  { %v2410_v16 = vpop.permute.xlu0 %2409  ;;  %3798 = vmatprep.mubr.msk.bf16.mxu0 %vm4083_vm1, %v4082_v9 }
0x1949   :  { %3781 = vmatmul.mubr.msk.bf16.vlgmr.msra.gmra.mxu1 %vm276_vm3, %v2410_v16 }
0x194a   :  { %3792 = vmatprep.mubr.msk.bf16.mxu1 %vm4083_vm1, %v4082_v9 }
0x19e3   :  { %v4856_v19 = vpop.f32.mrf.mxu1 }
0x19e5   :  { %v3770_v15 = vpop.f32.mrf.mxu1 }
0x19e7   :  { %v4858_v23 = vpop.f32.mrf.mxu1 }
0x19e9   :  { %v3771_v25 = vpop.f32.mrf.mxu1 }
0x1a07   :  { %v2506_v6 = vpop.f32.mrf.mxu0 }
0x1a08   :  { %v2507_v35 = vadd.f32 %v2506_v6, %v4289_v22 }
0x1a09   :  { %v2454_v37 = vpop.f32.mrf.mxu1  ;;  %v3788_v39 = vpop.f32.mrf.mxu0 }
0x1a0a   :  { %v2455_v45 = vadd.f32 %v2454_v37, %v4289_v22  ;;  %v2515_v14 = vsel %vm276_vm3, %v2507_v35, -inf }
0x1a0b   :  { %2516 = vmax.xlane.f32.xlu1 %v2515_v14  ;;  %v3782_v34 = vpop.f32.mrf.mxu1  ;;  %v2509_v29 = vpop.f32.mrf.mxu0 }
0x1a0c   :  { %v2512_v38 = vsel %vm276_vm3, %v2455_v45, -inf }
0x1a0d   :  { %v3789_v30 = vpop.f32.mrf.mxu0  ;;  %2513 = vmax.xlane.f32.xlu0 %v2512_v38  ;;  %v2457_v46 = vpop.f32.mrf.mxu1 }
0x1a0f   :  { %v3783_v47 = vpop.f32.mrf.mxu1 }
0x1a1c   :  { %2536 = vrot.lane.b32.xlu1 %v4721_v36, %s5031_s22 }
0x1a20   :  { %2682 = vrot.lane.b32.xlu1 %v4640_v24, %s4084_s18 }
0x1a24   :  { %2684 = vrot.lane.b32.xlu1 %v4647_v33, %s4084_s18  ;;  %s5032_s18 = smov 24  }
0x1a28   :  { %2690 = vrot.lane.b32.xlu1 %v4642_v17, %s4096_s1 }
0x1a94   :  { %v2517_v48 = vpop.xlane.xlu1 %2516 }
0x1a95   :  { %v2519_v49 = vsub.f32 %v2507_v35, %v2517_v48 }
0x1a96   :  { %v2514_v52 = vpop.xlane.xlu0 %2513 }
0x1a97   :  { %v2522_v55 = vmul.f32 1.442695, %v2519_v49  ;;  %v2518_v2 = vsub.f32 %v2455_v45, %v2514_v52 }
0x1a98   :  { %v2537_v31 = vpop.permute.xlu1 %2536 }
0x1a99   :  { %3970 = vpow2.f32 %v2522_v55  ;;  %v2520_v32 = vmul.f32 1.442695, %v2518_v2  ;;  %v4873_v56 = vsel %vm402_vm5, %v2537_v31, 0  ;;  %v2373_v55 = vadd.f32 %v4843_v7, %v4858_v23 }
0x1a9a   :  { %3791 = vmatpush3.bf16.msra.mxu1 %v4873_v56 }
0x1a9b   :  { %3972 = vpow2.f32 %v2520_v32  ;;  %3802 = vmatprep.subr.bf16.mxu1 %v4082_v9 }
0x1a9c   :  { %v2683_v24 = vpop.permute.xlu1 %2682 }
0x1aa0   :  { %v2685_v33 = vpop.permute.xlu1 %2684 }
0x1aa4   :  { %v2691_v36 = vpop.permute.xlu1 %2690 }
0x1aa5   :  { %v2695_v58 = vsel %vm187_vm2, %v2685_v33, %v2691_v36 }
0x1aa6   :  { %v3971_v59 = vpop.eup %3970  ;;  %v2699_v60 = vmul.f32 %v4656_v43, %v2695_v58 }
0x1aa7   :  { %v2527_v51 = vsel %vm276_vm3, %v3971_v59, 0.0 }
0x1aa8   :  { %v3973_v57 = vpop.eup %3972  ;;  %2704 = vrot.lane.b32.xlu1 %v2699_v60, %s5032_s18  ;;  %2528 = vadd.xlane.f32.xlu0 %v2527_v51 }
0x1aa9   :  { %v2524_v0 = vsel %vm276_vm3, %v3973_v57, 0.0 }
0x1aac   :  { %2525 = vadd.xlane.f32.xlu0 %v2524_v0 }
0x1ac2   :  { %2584 = vrot.lane.b32.xlu0 %v4727_v63, %s5031_s22 }
0x1ac6   :  { %2688 = vrot.lane.b32.xlu0 %v4637_v26, %s4096_s1 }
0x1b1a   :  { %v2705_v20 = vpop.permute.xlu1 %2704 }
0x1b1b   :  { %v2709_v53 = vadd.f32 %v2705_v20, %v2697_v44 }
0x1b1d   :  { %v2711_v12 = vmul.f32 0.35355338, %v2709_v53 }
0x1b1f   :  { %v2713_v27 = vpack.c.bf16 %v2711_v12, %v2711_v12 }
0x1b21   :  { %2761 = vrot.lane.b32.xlu1 %v2713_v27, %s5033_s23 }
0x1b31   :  { %v2529_v40 = vpop.xlane.xlu0 %2528 }
0x1b32   :  { %3974 = vrcp.f32 %v2529_v40 }
0x1b35   :  { %v2526_v28 = vpop.xlane.xlu0 %2525 }
0x1b36   :  { %3976 = vrcp.f32 %v2526_v28 }
0x1b39   :  { %v2585_v41 = vpop.permute.xlu0 %2584 }
0x1b3a   :  { %v2590_v1 = vsel %vm402_vm5, %v2585_v41, 0 }
0x1b3b   :  { %3797 = vmatpush3.bf16.msra.mxu0 %v2590_v1 }
0x1b3c   :  { %3808 = vmatprep.subr.bf16.mxu0 %v4082_v9 }
0x1b3d   :  { %v2689_v63 = vpop.permute.xlu0 %2688 }
0x1b3e   :  { %v2694_v50 = vsel %vm187_vm2, %v2683_v24, %v2689_v63 }
0x1b3f   :  { %v3975_v17 = vpop.eup %3974  ;;  %v2698_v4 = vmul.f32 %v4656_v43, %v2694_v50  ;;  %v3403_v43 = vld [vmem:[%s5016_s6 + $0x18] sm:$0xf] }
0x1b40   :  { %v2533_v5 = vmul.f32 %v3975_v17, %v3971_v59  ;;  %v2637_v15 = vsel %vm402_vm5, %v3403_v43, 0 }
0x1b41   :  { %2702 = vrot.lane.b32.xlu0 %v2698_v4, %s5032_s18 }
0x1b42   :  { %v2535_v8 = vpack.c.bf16 %v2533_v5, %v2533_v5 }
0x1b43   :  { %v3977_v10 = vpop.eup %3976 }
0x1b44   :  { %3799 = vmatmul.mubr.msk.bf16.vlgmr.msra.gmra.mxu0 %vm276_vm3, %v2535_v8  ;;  %v2532_v13 = vmul.f32 %v3977_v10, %v3973_v57  ;;  %v3404_v10 = vld [vmem:[%s5016_s6 + $0x1c] sm:$0xf] }
0x1b45   :  { %3809 = vmatpush3.bf16.xpose.msra.mxu0 %v4834_v3  ;;  %3810 = vmatprep.mubr.msk.bf16.mxu0 %vm4083_vm1, %v4082_v9  ;;  %v2696_v3 = vmul.f32 %v4637_v26, %v4506_v42 }
0x1b46   :  { %v2534_v16 = vpack.c.bf16 %v2532_v13, %v2532_v13  ;;  %3820 = vmatprep.subr.bf16.mxu0 %v4082_v9  ;;  %v2921_v13 = vsel %vm402_vm5, %v3404_v10, 0 }
0x1b48   :  { %3793 = vmatmul.mubr.msk.bf16.vlgmr.msra.gmra.mxu1 %vm276_vm3, %v2534_v16 }
0x1b49   :  { %3804 = vmatprep.mubr.msk.bf16.mxu1 %vm4083_vm1, %v4082_v9  ;;  %3803 = vmatpush3.bf16.msra.mxu1 %v2637_v15 }
0x1b4a   :  { %3814 = vmatprep.subr.bf16.mxu1 %v4082_v9 }
0x1b93   :  { %v2762_v26 = vpop.permute.xlu1 %2761 }
0x1bb3   :  { %v2703_v25 = vpop.permute.xlu0 %2702 }
0x1bb4   :  { %v2708_v6 = vadd.f32 %v2703_v25, %v2696_v3 }
0x1bb6   :  { %v2710_v35 = vmul.f32 0.35355338, %v2708_v6 }
0x1bb8   :  { %v2712_v37 = vpack.c.bf16 %v2710_v35, %v2710_v35 }
0x1bba   :  { %2715 = vrot.lane.b32.xlu0 %v2712_v37, %s5033_s23 }
0x1c04   :  { %v2626_v39 = vpop.f32.mrf.mxu0 }
0x1c06   :  { %v3800_v45 = vpop.f32.mrf.mxu0 }
0x1c08   :  { %v2578_v14 = vpop.f32.mrf.mxu1  ;;  %v2629_v34 = vpop.f32.mrf.mxu0 }
0x1c09   :  { %v2632_v29 = vpack.c.bf16 %v2626_v39, %v2578_v14 }
0x1c0a   :  { %v3794_v38 = vpop.f32.mrf.mxu1  ;;  %v3801_v30 = vpop.f32.mrf.mxu0 }
0x1c0b   :  { %3805 = vmatmul.mubr.msk.bf16.vlgmr.msra.gmra.mxu1 %vm276_vm3, %v2632_v29 }
0x1c0c   :  { %3815 = vmatpush3.bf16.xpose.msra.mxu1 %v4846_v11  ;;  %v2581_v46 = vpop.f32.mrf.mxu1  ;;  %3816 = vmatprep.mubr.msk.bf16.mxu1 %vm4083_vm1, %v4082_v9  ;;  %v2370_v11 = vadd.f32 %v4841_v61, %v4856_v19 }
0x1c0d   :  { %3826 = vmatprep.subr.bf16.mxu1 %v4082_v9 }
0x1c0e   :  { %v3795_v42 = vpop.f32.mrf.mxu1 }
0x1c13   :  { %3817 = vmatmul.mubr.msk.bf16.vlgmr.msra.gmra.mxu1 %vm276_vm3, %v2762_v26 }
0x1c14   :  { %3827 = vmatpush3.bf16.msra.mxu1 %v2590_v1  ;;  %3828 = vmatprep.mubr.msk.bf16.mxu1 %vm4083_vm1, %v4082_v9 }
0x1c15   :  { %3838 = vmatprep.subr.bf16.mxu1 %v4082_v9 }
0x1c2c   :  { %v2716_v47 = vpop.permute.xlu0 %2715 }
0x1c2d   :  { %3811 = vmatmul.mubr.msk.bf16.vlgmr.msra.gmra.mxu0 %vm276_vm3, %v2716_v47 }
0x1c2e   :  { %3821 = vmatpush3.bf16.msra.mxu0 %v4873_v56  ;;  %3822 = vmatprep.mubr.msk.bf16.mxu0 %vm4083_vm1, %v4082_v9 }
0x1c2f   :  { %3832 = vmatprep.subr.bf16.mxu0 %v4082_v9 }
0x1ccb   :  { %v2673_v48 = vpop.f32.mrf.mxu1 }
0x1ccc   :  { %v4926_v49 = vadd.f32 %v2673_v48, %v2370_v11 }
0x1ccd   :  { %v3806_v52 = vpop.f32.mrf.mxu1 }
0x1ccf   :  { %v2676_v2 = vpop.f32.mrf.mxu1 }
0x1cd0   :  { %v4930_v31 = vadd.f32 %v2676_v2, %v2373_v55 }
0x1cd1   :  { %v3807_v32 = vpop.f32.mrf.mxu1 }
0x1cd3   :  { %v2800_v56 = vpop.f32.mrf.mxu1 }
0x1cd4   :  { %v2801_v24 = vadd.f32 %v2800_v56, %v4289_v22 }
0x1cd5   :  { %v3818_v33 = vpop.f32.mrf.mxu1 }
0x1cd6   :  { %v2809_v36 = vsel %vm276_vm3, %v2801_v24, -inf }
0x1cd7   :  { %2810 = vmax.xlane.f32.xlu1 %v2809_v36  ;;  %v2803_v58 = vpop.f32.mrf.mxu1 }
0x1cd8   :  { %v3427_v58 = vld [vmem:[%s5017_s7 + $0x1] sm:$0x1] }
0x1cd9   :  { %v3819_v61 = vpop.f32.mrf.mxu1 }
0x1cda   :  { %v2996_v61 = vunpack.c.l.bf16 %v3427_v58 }
0x1ced   :  { %v2754_v19 = vpop.f32.mrf.mxu0 }
0x1cee   :  { %v2755_v59 = vadd.f32 %v2754_v19, %v4289_v22 }
0x1cef   :  { %v3812_v60 = vpop.f32.mrf.mxu0 }
0x1cf0   :  { %v2806_v51 = vsel %vm276_vm3, %v2755_v59, -inf  ;;  %v3000_v60 = vrot.slane %v2996_v61, %v4203_v21 }
0x1cf1   :  { %2807 = vmax.xlane.f32.xlu0 %v2806_v51  ;;  %v2757_v7 = vpop.f32.mrf.mxu0 }
0x1cf3   :  { %v3813_v23 = vpop.f32.mrf.mxu0 }
0x1d60   :  { %v2811_v57 = vpop.xlane.xlu1 %2810 }
0x1d61   :  { %v2813_v0 = vsub.f32 %v2801_v24, %v2811_v57 }
0x1d63   :  { %v2816_v53 = vmul.f32 1.442695, %v2813_v0 }
0x1d7a   :  { %v2808_v44 = vpop.xlane.xlu0 %2807 }
0x1d7b   :  { %v2812_v20 = vsub.f32 %v2755_v59, %v2808_v44  ;;  %v3898_v44 = vld [vmem:[%s5019_s9 + $0x38] sm:$0xff]  }
0x1d7d   :  { %v2814_v12 = vmul.f32 1.442695, %v2812_v20  ;;  %v3899_v20 = vld [vmem:[%s5019_s9 + $0x30] sm:$0xff]  }
0x1d7f   :  { %3978 = vpow2.f32 %v2814_v12  ;;  %v3901_v12 = vld [vmem:[%s5019_s9 + $0x20] sm:$0xff]  }
0x1d80   :  { %3980 = vpow2.f32 %v2816_v53  ;;  %v3900_v53 = vld [vmem:[%s5019_s9 + $0x28] sm:$0xff]  }
0x1d8c   :  { %v3979_v27 = vpop.eup %3978 }
0x1d8d   :  { %v2818_v40 = vsel %vm276_vm3, %v3979_v27, 0.0  ;;  %v3981_v28 = vpop.eup %3980 }
0x1d8e   :  { %2819 = vadd.xlane.f32.xlu0 %v2818_v40  ;;  %v2821_v22 = vsel %vm276_vm3, %v3981_v28, 0.0 }
0x1d92   :  { %2822 = vadd.xlane.f32.xlu0 %v2821_v22 }
0x1e17   :  { %v2820_v41 = vpop.xlane.xlu0 %2819 }
0x1e18   :  { %3982 = vrcp.f32 %v2820_v41 }
0x1e1b   :  { %v2823_v1 = vpop.xlane.xlu0 %2822 }
0x1e1c   :  { %3984 = vrcp.f32 %v2823_v1 }
0x1e25   :  { %v3983_v63 = vpop.eup %3982 }
0x1e26   :  { %v2826_v50 = vmul.f32 %v3983_v63, %v3979_v27 }
0x1e28   :  { %v2828_v17 = vpack.c.bf16 %v2826_v50, %v2826_v50 }
0x1e29   :  { %v3985_v4 = vpop.eup %3984 }
0x1e2a   :  { %3823 = vmatmul.mubr.msk.bf16.vlgmr.msra.gmra.mxu0 %vm276_vm3, %v2828_v17  ;;  %v2827_v5 = vmul.f32 %v3985_v4, %v3981_v28 }
0x1e2b   :  { %3834 = vmatprep.mubr.msk.bf16.mxu0 %vm4083_vm1, %v4082_v9  ;;  %3833 = vmatpush3.bf16.msra.mxu0 %v2921_v13 }
0x1e2c   :  { %v2829_v8 = vpack.c.bf16 %v2827_v5, %v2827_v5  ;;  %3846 = vmatprep.subr.bf16.mxu0 %v4082_v9 }
0x1e2e   :  { %3829 = vmatmul.mubr.msk.bf16.vlgmr.msra.gmra.mxu1 %vm276_vm3, %v2829_v8 }
0x1e2f   :  { %3842 = vmatprep.mubr.msk.bf16.mxu1 %vm4083_vm1, %v4082_v9 }
0x1eea   :  { %v2867_v16 = vpop.f32.mrf.mxu0 }
0x1eec   :  { %v3824_v43 = vpop.f32.mrf.mxu0 }
0x1eee   :  { %v2870_v15 = vpop.f32.mrf.mxu0  ;;  %v2910_v3 = vpop.f32.mrf.mxu1 }
0x1eef   :  { %v2916_v25 = vpack.c.bf16 %v2910_v3, %v2867_v16 }
0x1ef0   :  { %v3825_v6 = vpop.f32.mrf.mxu0  ;;  %v3830_v35 = vpop.f32.mrf.mxu1 }
0x1ef1   :  { %3835 = vmatmul.mubr.msk.bf16.vlgmr.msra.gmra.mxu0 %vm276_vm3, %v2916_v25 }
0x1ef2   :  { %v2913_v37 = vpop.f32.mrf.mxu1  ;;  %3854 = vmatprep.mubr.msk.bf16.mxu0 %vm4083_vm1, %v4082_v9  ;;  %3847 = vmatpush3.bf16.msra.mxu0 %v3898_v44 }
0x1ef3   :  { %3848 = vmatprep.subr.bf16.mxu0 %v4082_v9 }
0x1ef4   :  { %v3831_v39 = vpop.f32.mrf.mxu1 }
0x1ef6   :  { %3849 = vmatpush3.bf16.msra.mxu0 %v3899_v20 }
0x1ef7   :  { %3850 = vmatprep.subr.bf16.mxu0 %v4082_v9 }
0x1efa   :  { %3851 = vmatpush3.bf16.msra.mxu0 %v3900_v53 }
0x1efb   :  { %3852 = vmatprep.subr.bf16.mxu0 %v4082_v9 }
0x1efe   :  { %3853 = vmatpush3.bf16.msra.mxu0 %v3901_v12 }
0x1fb1   :  { %v2957_v45 = vpop.f32.mrf.mxu0 }
0x1fb2   :  { %v2964_v14 = vadd.f32 %v2957_v45, %v4926_v49 }
0x1fb3   :  { %v3836_v34 = vpop.f32.mrf.mxu0 }
0x1fb4   :  { %v3456_v29 = vpack.c.bf16 %v2964_v14, %v2964_v14 }
0x1fb5   :  { %v2960_v38 = vpop.f32.mrf.mxu0 }
0x1fb6   :  { %v4954_v30 = vadd.bf16 %v3456_v29, %v4609_v54  ;;  %v2965_v46 = vadd.f32 %v2960_v38, %v4930_v31  ;;  %v3896_v54 = vld [vmem:[%s5018_s8 + $0x18] sm:$0xff]  }
0x1fb7   :  { %v3837_v42 = vpop.f32.mrf.mxu0  ;;  %3839 = vmatpush3.bf16.msra.mxu1 %v3896_v54 }
0x1fb8   :  { %v2978_v26 = vunpack.c.l.bf16 %v4954_v30  ;;  %v3457_v47 = vpack.c.bf16 %v2965_v46, %v2965_v46  ;;  %3840 = vmatprep.subr.bf16.mxu1 %v4082_v9 }
0x1fba   :  { %v4959_v11 = vadd.bf16 %v3457_v47, %v4613_v62  ;;  %v2980_v48 = vmul.f32 %v2978_v26, %v2978_v26  ;;  %v3897_v62 = vld [vmem:[%s5018_s8 + $0x10] sm:$0xff]  }
0x1fbb   :  { %3841 = vmatpush3.bf16.msra.mxu1 %v3897_v62 }
0x1fbc   :  { %v2979_v52 = vunpack.c.l.bf16 %v4959_v11  ;;  %v2982_v49 = vsel %vm79_vm0, %v2980_v48, 0.0 }
0x1fbd   :  { %2983 = vadd.xlane.f32.xlu1 %v2982_v49 }
0x1fbe   :  { %v2981_v55 = vmul.f32 %v2979_v52, %v2979_v52 }
0x1fc0   :  { %v2985_v2 = vsel %vm79_vm0, %v2981_v55, 0.0 }
0x1fc1   :  { %2986 = vadd.xlane.f32.xlu0 %v2985_v2 }
0x2046   :  { %v2984_v31 = vpop.xlane.xlu1 %2983 }
0x2047   :  { %v2988_v32 = vmul.f32 0.03125, %v2984_v31 }
0x2049   :  { %v2990_v56 = vadd.f32 1e-06, %v2988_v32 }
0x204a   :  { %v2987_v24 = vpop.xlane.xlu0 %2986 }
0x204b   :  { %3986 = vrsqrt.f32 %v2990_v56  ;;  %v2989_v33 = vmul.f32 0.03125, %v2987_v24 }
0x204d   :  { %v2991_v36 = vadd.f32 1e-06, %v2989_v33 }
0x204f   :  { %3988 = vrsqrt.f32 %v2991_v36 }
0x2058   :  { %v3987_v19 = vpop.eup %3986 }
0x2059   :  { %v2994_v59 = vmul.f32 %v3987_v19, %v2978_v26 }
0x205b   :  { %v3001_v23 = vmul.f32 %v3000_v60, %v2994_v59 }
0x205c   :  { %v3989_v51 = vpop.eup %3988 }
0x205d   :  { %v2995_v7 = vmul.f32 %v3989_v51, %v2979_v52 }
0x205f   :  { %v3002_v57 = vmul.f32 %v3000_v60, %v2995_v7 }
0x2061   :  { %v3003_v0 = vpack.c.bf16 %v3002_v57, %v3001_v23 }
0x2063   :  { %3843 = vmatmul.mubr.msk.bf16.vlgmr.msra.gmra.mxu1 %vm79_vm0, %v3003_v0 }
0x2123   :  { %v3058_v27 = vpop.f32.mrf.mxu1 }
0x2124   :  { %3081 = vrot.lane.b32.xlu1 %v3058_v27, %s4104_s30  ;;  %v3435_v41 = vmul.f32 -1.442695, %v3058_v27 }
0x2125   :  { %v3844_v40 = vpop.f32.mrf.mxu1 }
0x2126   :  { %3990 = vpow2.f32 %v3435_v41  ;;  %v4105_v41 = vmov 1966171168  }
0x2127   :  { %v3061_v28 = vpop.f32.mrf.mxu1 }
0x2128   :  { %3083 = vrot.lane.b32.xlu0 %v3061_v28, %s4104_s30  ;;  %v3436_v1 = vmul.f32 -1.442695, %v3061_v28 }
0x2129   :  { %v3845_v22 = vpop.f32.mrf.mxu1 }
0x212a   :  { %3992 = vpow2.f32 %v3436_v1  ;;  %v3258_v1 = vunpack.c.l.s4 %v4105_v41 }
0x2133   :  { %v3991_v63 = vpop.eup %3990 }
0x2134   :  { %v3071_v9 = vadd.f32 1.0, %v3991_v63 }
0x2136   :  { %3994 = vrcp.f32 %v3071_v9 }
0x2137   :  { %v3993_v50 = vpop.eup %3992 }
0x2138   :  { %v3072_v17 = vadd.f32 1.0, %v3993_v50 }
0x213a   :  { %3996 = vrcp.f32 %v3072_v17  ;;  %v3259_v17 = vunpack.c.0.s8 %v3258_v1 }
0x2143   :  { %v3995_v4 = vpop.eup %3994 }
0x2144   :  { %v3077_v10 = vmul.f32 %v3995_v4, %v3058_v27 }
0x2147   :  { %v3997_v5 = vpop.eup %3996 }
0x2148   :  { %v3078_v13 = vmul.f32 %v3997_v5, %v3061_v28 }
0x2196   :  { %v3082_v8 = vpop.permute.xlu1 %3081 }
0x2197   :  { %v3087_v43 = vmul.f32 %v3082_v8, %v3077_v10  ;;  %v3262_v8 = vsub.s32 %v3259_v17, %v4197_v18 }
0x219a   :  { %v3084_v16 = vpop.permute.xlu0 %3083 }
0x219b   :  { %v3088_v15 = vmul.f32 %v3084_v16, %v3078_v13  ;;  %v4106_v16 = vmov 1935823168  }
0x219d   :  { %v3089_v3 = vpack.c.bf16 %v3088_v15, %v3087_v43  ;;  %v3290_v43 = vunpack.c.l.s4 %v4106_v16 }
0x219f   :  { %3855 = vmatmul.mubr.msk.bf16.vlgmr.msra.gmra.mxu0 %vm1578_vm6, %v3089_v3 }
0x225f   :  { %v3160_v25 = vpop.f32.mrf.mxu0 }
0x2260   :  { %v3458_v6 = vpack.c.bf16 %v3160_v25, %v3160_v25  ;;  %v3291_v25 = vunpack.c.0.s8 %v3290_v43 }
0x2261   :  { %v3856_v35 = vpop.f32.mrf.mxu0 }
0x2262   :  { %v3175_v37 = vadd.bf16 %v3458_v6, %v4954_v30 }
0x2263   :  { %v3163_v39 = vpop.f32.mrf.mxu0 }
0x2264   :  { %v3178_v45 = vunpack.c.l.bf16 %v3175_v37  ;;  %v3459_v14 = vpack.c.bf16 %v3163_v39, %v3163_v39  ;;  %v3294_v39 = vsub.s32 %v3291_v25, %v4197_v18 }
0x2265   :  { %v3857_v34 = vpop.f32.mrf.mxu0 }
0x2266   :  { %v3176_v29 = vadd.bf16 %v3459_v14, %v4959_v11  ;;  %v3180_v38 = vmul.f32 %v3178_v45, %v3178_v45  ;;  %v3177_v11 = vld [vmem:[%s5020_s10] sm:$0x1]  ;;  %s4107_s10 = smov [#allocation7]  }
0x2267   :  { %v3208_v62 = vunpack.c.l.bf16 %v3177_v11  ;;  %s3345_s16 = sshll.u32 %s4107_s10, 4  ;;  %s3346_s16 = int_to_ptr.vmem [resolvable:$true] %s3345_s16 }
0x2268   :  { %v3179_v46 = vunpack.c.l.bf16 %v3176_v29  ;;  %v3188_v42 = vsel %vm3187_vm7, %v3180_v38, 0.0  ;;  %s4054_s3 = scalar_lea.vmem %s3346_s16, 16  ;;  %s4058_s5 = scalar_lea.vmem %s3346_s16, 32 }
0x2269   :  { %3189 = vadd.xlane.f32.xlu0 %v3188_v42  ;;  %v3212_v31 = vrot.slane %v3208_v62, %v4203_v21  ;;  %p4055_p10 = scmp.ne.s32.totalorder %s3346_s16, %s4054_s3  ;;  %p4059_p11 = scmp.lt.s32.totalorder %s3346_s16, %s3346_s16 }
0x226a   :  { %v3181_v26 = vmul.f32 %v3179_v46, %v3179_v46  ;;  %p4060_p12 = scmp.lt.s32.totalorder %s4058_s5, %s4054_s3 }
0x226c   :  { %v3184_v47 = vrot.slane %v3181_v26, 7  ;;  %p4061_p13 = por %p4060_p12, %p4059_p11 }
0x226e   :  { %v3192_v48 = vsel %vm3191_vm8, %v3184_v47, 0.0  ;;  %p4062_p0 = pnand %p4061_p13, %p4055_p10 }
0x226f   :  { %3193 = vadd.xlane.f32.xlu1 %v3192_v48 }
0x22f2   :  { %v3190_v52 = vpop.xlane.xlu0 %3189 }
0x22f3   :  { %v3195_v30 = vmul.f32 0.03125, %v3190_v52 }
0x22f5   :  { %v3197_v49 = vadd.f32 1e-06, %v3195_v30 }
0x22f7   :  { %3998 = vrsqrt.f32 %v3197_v49 }
0x22f8   :  { %v3194_v55 = vpop.xlane.xlu1 %3193 }
0x22f9   :  { %v3196_v2 = vmul.f32 0.03125, %v3194_v55 }
0x22fb   :  { %v3198_v54 = vadd.f32 1e-06, %v3196_v2 }
0x22fd   :  { %4000 = vrsqrt.f32 %v3198_v54 }
0x2304   :  { %v3999_v32 = vpop.eup %3998 }
0x2305   :  { %v3206_v56 = vmul.f32 %v3999_v32, %v3178_v45 }
0x2307   :  { %v3213_v24 = vmul.f32 %v3212_v31, %v3206_v56 }
0x2309   :  { %v3215_v33 = vmul.f32 %v3213_v24, %v3213_v24 }
0x230a   :  { %v4001_v36 = vpop.eup %4000 }
0x230b   :  { %v3203_v58 = vrot.slane %v4001_v36, 1  ;;  %v3222_v61 = vsel %vm3187_vm7, %v3215_v33, 0.0 }
0x230c   :  { %3223 = vadd.xlane.f32.xlu1 %v3222_v61 }
0x230d   :  { %v3207_v19 = vmul.f32 %v3203_v58, %v3179_v46 }
0x230f   :  { %v3214_v59 = vmul.f32 %v3212_v31, %v3207_v19 }
0x2311   :  { %v3216_v60 = vmul.f32 %v3214_v59, %v3214_v59 }
0x2313   :  { %v3219_v51 = vrot.slane %v3216_v60, 7 }
0x2315   :  { %v3225_v7 = vsel %vm3191_vm8, %v3219_v51, 0.0 }
0x2316   :  { %3226 = vadd.xlane.f32.xlu0 %v3225_v7 }
0x2395   :  { %v3224_v23 = vpop.xlane.xlu1 %3223 }
0x2396   :  { %4002 = vrsqrt.f32 %v3224_v23  ;;  %vm3230_vm9 = vcmp.eq.f32.partialorder %v3224_v23, inf  ;;  %v3233_v44 = vand.u32 2147483648, %v3224_v23  ;;  %vm3232_vm10 = vcmp.eq.f32.partialorder %v3224_v23, 0.0 }
0x239f   :  { %v3227_v57 = vpop.xlane.xlu0 %3226 }
0x23a0   :  { %4004 = vrsqrt.f32 %v3227_v57  ;;  %vm3237_vm11 = vcmp.eq.f32.partialorder %v3227_v57, inf  ;;  %v3240_v28 = vand.u32 2147483648, %v3227_v57  ;;  %vm3239_vm12 = vcmp.eq.f32.partialorder %v3227_v57, 0.0 }
0x23a3   :  { %v4003_v21 = vpop.eup %4002 }
0x23a4   :  { %v3229_v0 = vmul.f32 %v4003_v21, %v3224_v23 }
0x23a6   :  { %v3231_v20 = vsel %vm3230_vm9, %v3224_v23, %v3229_v0 }
0x23a7   :  { %v3234_v53 = vsel %vm3232_vm10, %v3233_v44, %v3231_v20 }
0x23a8   :  { %v3242_v12 = vmax.f32 %v3234_v53, 1e-12 }
0x23aa   :  { %4006 = vrcp.f32 %v3242_v12 }
0x23ad   :  { %v4005_v27 = vpop.eup %4004 }
0x23ae   :  { %v3236_v40 = vmul.f32 %v4005_v27, %v3227_v57 }
0x23b0   :  { %v3238_v22 = vsel %vm3237_vm11, %v3227_v57, %v3236_v40 }
0x23b1   :  { %v3241_v63 = vsel %vm3239_vm12, %v3240_v28, %v3238_v22 }
0x23b2   :  { %v3243_v50 = vmax.f32 %v3241_v63, 1e-12 }
0x23b4   :  { %v3246_v9 = vrot.slane %v3243_v50, 1 }
0x23b6   :  { %4008 = vrcp.f32 %v3246_v9 }
0x23b7   :  { %v4007_v4 = vpop.eup %4006 }
0x23b8   :  { %v3250_v5 = vmul.f32 %v4007_v4, %v3213_v24 }
0x23ba   :  { %v3253_v10 = vpack.c.bf16 %v3250_v5, %v3250_v5 }
0x23bc   :  { %v3263_v13 = vrot.slane %v3253_v10, %v3262_v8 }
0x23be   :  { %v3264_v15 = vcombine.high %v3263_v13, %v3263_v13 }
0x23c0   :  { %v3271_v3 = vrot.slane %v3264_v15, %v3262_v8 }
0x23c2   :  { %v3272_v37 = vcombine.high %v3271_v3, %v3271_v3 }
0x23c3   :  { %v4009_v6 = vpop.eup %4008 }
0x23c4   :  { %v3252_v35 = vmul.f32 %v4009_v6, %v3214_v59  ;;  %v3295_v34 = vrot.slane %v3272_v37, %v3294_v39 }
0x23c6   :  { %v3254_v45 = vpack.c.bf16 %v3252_v35, %v3252_v35  ;;  %v3302_v46 = vrot.slane %v3295_v34, %v3294_v39 }
0x23c8   :  { %v3279_v14 = vrot.slane %v3254_v45, %v3262_v8  ;;  %v3317_v47 = vunpack.c.l.b16 %v3302_v46 }
0x23ca   :  { %v3280_v29 = vcombine.high %v3279_v14, %v3279_v14  ;;  %v3319_v30 = vrot.slane %v3317_v47, 1 }
0x23cc   :  { %v3287_v38 = vrot.slane %v3280_v29, %v3262_v8 }
0x23ce   :  { %v3288_v42 = vcombine.high %v3287_v38, %v3287_v38 }
0x23d0   :  { %v3309_v26 = vrot.slane %v3288_v42, %v3294_v39 }
0x23d2   :  { %v3316_v48 = vrot.slane %v3309_v26, %v3294_v39 }
0x23d4   :  { %v3318_v52 = vunpack.c.l.b16 %v3316_v48 }
0x23d6   :  { %v3321_v49 = vsel %vm3320_vm13, %v3318_v52, %v3319_v30 }
0x23d7   :  { %v3322_v55 = vpack.c.b16 %v3321_v49, %v3321_v49 }
0x23d9   :  { %v3329_v2 = vrot.slane %v3322_v55, %v3262_v8 }
0x23db   :  { %v3336_v54 = vrot.slane %v3329_v2, %v3262_v8 }
0x23dd   :  { %3338 = vst.msk [vmem:[#allocation7] sm:$0x1] %vm3191_vm8, %v3336_v54 }
0x23de   :  { %4065 = shalt.err (!%p4062_p0)
}
0x23df   :  { %3348 = dma.vmem_to_hbm [thread:$0]  %s3346_s16, 16, %s5021_s11, [#allocation4]  }
0x23e0   :  { %4078 = dma.done.wait [#allocation4], 16  }
0x23e1   :  { %4079 = vsyncadd [#allocation4], 4294967280 }
0x23e2   :  { %3352 = vsyncpa [#allocation3], 1 }
0x23e3   :  { %3353 = vsyncpa [#allocation6], 1 }
0x23e4   :  { %3354 = vsyncpa [#allocation4], 1 }

</bundles_post_ra>
